<compile_context>
chip_gen: v6e
topology: v6e:2x2x1
jax: 0.10.0
libtpu: 0.0.40
codegen_flags: <defaults>
</compile_context>

<pallas_src>
import jax
import jax.numpy as jnp
from jax import lax
from jax.experimental import pallas as pl
from jax.experimental.pallas import tpu as pltpu


# ----------------------------------------------------------------------------
# Fused kernel:  conv3x3+bias+ReLU  ->  VMEM scratch  ->  conv3x3+bias+ReLU
# (BN scale already folded into the weights, BN shift folded into the bias.)
# ----------------------------------------------------------------------------
def _up_double_conv_kernel(x2_ref, x1_ref, w1a_ref, w1b_ref, b1_ref,
                           w2_ref, b2_ref, o_ref, mid_ref):
    # Per grid step (one batch element x one row tile):
    #   x2_ref : (1, tm+4, W+2, C2)  skip-connection halo tile      (bf16)
    #   x1_ref : (1, tm+4, W+2, C1)  upsampled-input halo tile      (bf16)
    #   w1a    : (9*C2, Cmid)   w1b : (9*C1, Cmid)   w2 : (9*Cmid, Cout) (bf16)
    #   b*     : (1, Cmid) / (1, Cout) folded BatchNorm bias        (f32)
    #   o_ref  : (1, tm, W, Cout)                                   (f32)
    #   mid_ref: (tm+2, W+2, Cmid) VMEM scratch = conv1 out + zero W halo
    _, tm, W, cout = o_ref.shape
    te = mid_ref.shape[0]            # tm + 2 (conv1 computed with 1-row halo)
    cmid = mid_ref.shape[-1]
    r = pl.program_id(1)
    nt = pl.num_programs(1)

    def im2col(ref, rows):
        # Gather the 9 shifted 3x3-tap views from the halo'd VMEM tile and lay
        # them out lane-contiguously -> one MXU matmul with K = 9*C.
        taps = []
        for ky in range(3):
            for kx in range(3):
                if len(ref.shape) == 4:
                    taps.append(ref[0, ky:ky + rows, kx:kx + W, :])
                else:
                    taps.append(ref[ky:ky + rows, kx:kx + W, :])
        patch = jnp.concatenate(taps, axis=-1)            # (rows, W, 9*C)
        return patch.reshape(rows * W, patch.shape[-1])   # (rows*W, 9*C)

    # ---- conv1 + BN + ReLU on tm+2 rows (1-row halo for conv2) -------------
    # conv(concat([x2, x1], ch)) == x2-patch @ W1[:9*C2] + x1-patch @ W1[9*C2:]
    acc1 = jnp.dot(im2col(x2_ref, te), w1a_ref[...],
                   preferred_element_type=jnp.float32)
    acc1 = acc1 + jnp.dot(im2col(x1_ref, te), w1b_ref[...],
                          preferred_element_type=jnp.float32)
    y1 = jnp.maximum(acc1 + b1_ref[...], 0.0)             # f32, (te*W, Cmid)
    y1 = y1.reshape(te, W, cmid)

    # Conv1 halo rows that fall outside the image are conv2's zero padding --
    # they must be exactly zero, not conv1 applied to zero-padded input.
    row = lax.broadcasted_iota(jnp.int32, (te, 1, 1), 0)
    outside = jnp.logical_or(jnp.logical_and(r == 0, row == 0),
                             jnp.logical_and(r == nt - 1, row == te - 1))
    y1 = jnp.where(outside, 0.0, y1)

    # Stage the intermediate in VMEM (never written to HBM), with zeroed
    # W-halo columns acting as conv2's width padding.
    mid_ref[...] = jnp.zeros_like(mid_ref)
    mid_ref[:, 1:W + 1, :] = y1.astype(mid_ref.dtype)

    # ---- conv2 + BN + ReLU --------------------------------------------------
    acc2 = jnp.dot(im2col(mid_ref, tm), w2_ref[...],
                   preferred_element_type=jnp.float32)
    y2 = jnp.maximum(acc2 + b2_ref[...], 0.0)
    # TODO(synk): for small Cout (<128) the (..., Cout) store is not lane-dense
    # (masked vst on writeback).  Regrouping to a (tm, W*Cout) output slab
    # would fix it but needs an in-kernel sublane->lane relayout; kept the
    # known-good layout since this kernel is MXU-bound at these channel counts.
    o_ref[0] = y2.reshape(tm, W, cout).astype(o_ref.dtype)


# ----------------------------------------------------------------------------
# Glue: halo row tiles, BN folding, pallas_call wrapper
# ----------------------------------------------------------------------------
def _fold_bn(conv_b, gamma, beta, mean, var, eps=1e-5):
    scale = gamma / jnp.sqrt(var + eps)
    bias = (conv_b - mean) * scale + beta
    return scale, bias


def _halo_row_tiles(x_nhwc, tm):
    """(N,H,W,C) -> (N*nt, tm+4, W+2, C) zero-padded, overlapping row tiles."""
    N, H, W, C = x_nhwc.shape
    nt = H // tm
    xp = jnp.pad(x_nhwc, ((0, 0), (2, 2), (1, 1), (0, 0)))
    t = jnp.stack([xp[:, r * tm:r * tm + tm + 4] for r in range(nt)], axis=1)
    return t.reshape(N * nt, tm + 4, W + 2, C)


def _pick_tile_rows(H, max_rows=128):
    tm = min(H, max_rows)
    while H % tm:
        tm -= 1
    return tm


def up_double_conv_nhwc(x2, x1u, params, *, tile_rows=None,
                        compute_dtype=jnp.bfloat16):
    """Fused DoubleConv(concat([x2, x1u], channel)) on NHWC inputs."""
    N, H, W, C2 = x2.shape
    C1 = x1u.shape[-1]
    p1, p2 = params["conv1"], params["conv2"]
    cmid = p1["w"].shape[-1]
    cout = p2["w"].shape[-1]

    tm = _pick_tile_rows(H) if tile_rows is None else tile_rows
    assert H % tm == 0, (H, tm)
    nt = H // tm

    # Fold BN running stats (inference semantics) into scale/bias; the scale
    # is folded into the conv weights in f32 before the bf16 cast.
    s1, b1 = _fold_bn(p1["b"], p1["gamma"], p1["beta"], p1["mean"], p1["var"])
    s2, b2 = _fold_bn(p2["b"], p2["gamma"], p2["beta"], p2["mean"], p2["var"])

    # Split W1 along Cin so the channel concat is never materialized.
    w1 = p1["w"] * s1                              # (3,3,C2+C1,Cmid), x2 first
    w1a = w1[:, :, :C2, :].reshape(9 * C2, cmid).astype(compute_dtype)
    w1b = w1[:, :, C2:, :].reshape(9 * C1, cmid).astype(compute_dtype)
    w2w = (p2["w"] * s2).reshape(9 * cmid, cout).astype(compute_dtype)

    x2_t = _halo_row_tiles(x2, tm).astype(compute_dtype)
    x1_t = _halo_row_tiles(x1u, tm).astype(compute_dtype)

    idx = lambda n, r: (n * nt + r, 0, 0, 0)       # noqa: E731
    cst = lambda n, r: (0, 0)                      # noqa: E731

    # Advisory scheduling hint for XLA (conv FLOPs dominate).
    flops = 2 * N * H * W * 9 * ((C2 + C1) * cmid + cmid * cout)
    bytes_accessed = (2 * (x2_t.size + x1_t.size)          # bf16 activations
                      + 2 * (w1a.size + w1b.size + w2w.size)
                      + 4 * (cmid + cout)
                      + 4 * N * H * W * cout)               # f32 output

    out = pl.pallas_call(
        _up_double_conv_kernel,
        out_shape=jax.ShapeDtypeStruct((N * nt, tm, W, cout), jnp.float32),
        grid_spec=pltpu.PrefetchScalarGridSpec(
            num_scalar_prefetch=0,
            grid=(N, nt),
            in_specs=[
                pl.BlockSpec((1, tm + 4, W + 2, C2), idx),
                pl.BlockSpec((1, tm + 4, W + 2, C1), idx),
                pl.BlockSpec((9 * C2, cmid), cst),
                pl.BlockSpec((9 * C1, cmid), cst),
                pl.BlockSpec((1, cmid), cst),
                pl.BlockSpec((9 * cmid, cout), cst),
                pl.BlockSpec((1, cout), cst),
            ],
            out_specs=pl.BlockSpec((1, tm, W, cout), idx),
            scratch_shapes=[pltpu.VMEM((tm + 2, W + 2, cmid), compute_dtype)],
        ),
        compiler_params=pltpu.CompilerParams(
            dimension_semantics=("parallel", "parallel"),
            # Raised above the 16/32 MiB scoped default; at production tile
            # sizes tune per generation (<=128 MiB v5e/v6e, <=64 MiB v7x).
            vmem_limit_bytes=64 * 1024 * 1024,
        ),
        cost_estimate=pl.CostEstimate(flops=flops, transcendentals=0,
                                      bytes_accessed=bytes_accessed),
    )(x2_t, x1_t, w1a, w1b,
      b1.reshape(1, cmid).astype(jnp.float32),
      w2w,
      b2.reshape(1, cout).astype(jnp.float32))
    return out.reshape(N, H, W, cout)


# ----------------------------------------------------------------------------
# Bilinear x2 upsample, align_corners=True (2-tap gather + lerp, NHWC)
# ----------------------------------------------------------------------------
def upsample_bilinear_x2_ac_nhwc(x):
    N, H, W, C = x.shape

    def taps(n_in, n_out):
        c = jnp.arange(n_out, dtype=jnp.float32) * ((n_in - 1) / max(n_out - 1, 1))
        lo = jnp.clip(jnp.floor(c).astype(jnp.int32), 0, n_in - 1)
        hi = jnp.minimum(lo + 1, n_in - 1)
        f = c - lo.astype(jnp.float32)
        return lo, hi, f

    lo, hi, f = taps(H, 2 * H)
    x = (jnp.take(x, lo, axis=1) * (1.0 - f)[None, :, None, None]
         + jnp.take(x, hi, axis=1) * f[None, :, None, None])
    lo, hi, f = taps(W, 2 * W)
    x = (jnp.take(x, lo, axis=2) * (1.0 - f)[None, None, :, None]
         + jnp.take(x, hi, axis=2) * f[None, None, :, None])
    return x


# ----------------------------------------------------------------------------
# Up.forward
# ----------------------------------------------------------------------------
def up_forward_nhwc(x1, x2, params, *, tile_rows=None,
                    compute_dtype=jnp.bfloat16):
    x1u = upsample_bilinear_x2_ac_nhwc(x1)
    dy = x2.shape[1] - x1u.shape[1]
    dx = x2.shape[2] - x1u.shape[2]
    if dy or dx:
        x1u = jnp.pad(x1u, ((0, 0), (dy // 2, dy - dy // 2),
                            (dx // 2, dx - dx // 2), (0, 0)))
    return up_double_conv_nhwc(x2, x1u, params, tile_rows=tile_rows,
                               compute_dtype=compute_dtype)


def up_forward(x1_nchw, x2_nchw, params, *, tile_rows=None,
               compute_dtype=jnp.bfloat16):
    # NCHW wrapper to match the PyTorch module; a full NHWC model would keep
    # activations NHWC end-to-end and drop these boundary transposes.
    x1 = jnp.transpose(x1_nchw, (0, 2, 3, 1))
    x2 = jnp.transpose(x2_nchw, (0, 2, 3, 1))
    y = up_forward_nhwc(x1, x2, params, tile_rows=tile_rows,
                        compute_dtype=compute_dtype)
    return jnp.transpose(y, (0, 3, 1, 2))


# ----------------------------------------------------------------------------
# Parameters (deterministic init, PyTorch BN eps=1e-5 semantics)
# ----------------------------------------------------------------------------
def init_up_params(key, in_channels, out_channels):
    def conv_bn(k, cin, cout):
        kw, kb, kg, kt, km, kv = jax.random.split(k, 6)
        std = (2.0 / (9 * cin)) ** 0.5
        return {
            "w": std * jax.random.normal(kw, (3, 3, cin, cout), jnp.float32),
            "b": 0.1 * jax.random.normal(kb, (cout,), jnp.float32),
            "gamma": 1.0 + 0.2 * jax.random.normal(kg, (cout,), jnp.float32),
            "beta": 0.1 * jax.random.normal(kt, (cout,), jnp.float32),
            "mean": 0.1 * jax.random.normal(km, (cout,), jnp.float32),
            "var": 1.0 + 0.25 * jax.random.uniform(kv, (cout,), jnp.float32),
        }

    k1, k2 = jax.random.split(key)
    return {"conv1": conv_bn(k1, in_channels, out_channels),
            "conv2": conv_bn(k2, out_channels, out_channels)}


# ----------------------------------------------------------------------------
# Pure-JAX reference (independent path: matrix upsample + lax.conv + raw BN)
# ----------------------------------------------------------------------------
def _interp_matrix(n_in, n_out):
    if n_out == 1:
        coords = jnp.zeros((1,), jnp.float32)
    else:
        coords = jnp.arange(n_out, dtype=jnp.float32) * (n_in - 1) / (n_out - 1)
    lo = jnp.clip(jnp.floor(coords).astype(jnp.int32), 0, n_in - 1)
    hi = jnp.clip(lo + 1, 0, n_in - 1)
    frac = coords - lo.astype(jnp.float32)
    return (jax.nn.one_hot(lo, n_in, dtype=jnp.float32) * (1.0 - frac)[:, None]
            + jax.nn.one_hot(hi, n_in, dtype=jnp.float32) * frac[:, None])


def _upsample_ref_nchw(x):
    N, C, H, W = x.shape
    Mh = _interp_matrix(H, 2 * H)
    Mw = _interp_matrix(W, 2 * W)
    y = jnp.einsum("oh,nchw->ncow", Mh, x, precision=lax.Precision.HIGHEST)
    return jnp.einsum("pw,ncow->ncop", Mw, y, precision=lax.Precision.HIGHEST)


def _conv_bn_relu_ref(x, p, quant):
    scale = p["gamma"] / jnp.sqrt(p["var"] + 1e-5)
    if quant:
        # Quantize exactly where the kernel does: fold scale into w in f32,
        # round w and x to bf16, convolve in f32, add folded bias in f32.
        bias = (p["b"] - p["mean"]) * scale + p["beta"]
        x = x.astype(jnp.bfloat16).astype(jnp.float32)
        w = (p["w"] * scale).astype(jnp.bfloat16).astype(jnp.float32)
        w_oihw = jnp.transpose(w, (3, 2, 0, 1))
        z = lax.conv_general_dilated(
            x, w_oihw, (1, 1), "SAME",
            dimension_numbers=("NCHW", "OIHW", "NCHW"),
            precision=lax.Precision.HIGHEST) + bias[None, :, None, None]
    else:
        w_oihw = jnp.transpose(p["w"], (3, 2, 0, 1))
        z = lax.conv_general_dilated(
            x, w_oihw, (1, 1), "SAME",
            dimension_numbers=("NCHW", "OIHW", "NCHW"),
            precision=lax.Precision.HIGHEST) + p["b"][None, :, None, None]
        z = ((z - p["mean"][None, :, None, None]) * scale[None, :, None, None]
             + p["beta"][None, :, None, None])
    return jnp.maximum(z, 0.0)


def up_forward_ref(x1, x2, params, *, quantize_like_kernel=False):
    x1u = _upsample_ref_nchw(x1)
    dy = x2.shape[2] - x1u.shape[2]
    dx = x2.shape[3] - x1u.shape[3]
    x1u = jnp.pad(x1u, ((0, 0), (0, 0), (dy // 2, dy - dy // 2),
                        (dx // 2, dx - dx // 2)))
    x = jnp.concatenate([x2, x1u], axis=1)
    y = _conv_bn_relu_ref(x, params["conv1"], quantize_like_kernel)
    if quantize_like_kernel:
        y = y.astype(jnp.bfloat16).astype(jnp.float32)
    return _conv_bn_relu_ref(y, params["conv2"], quantize_like_kernel)


if __name__ == "__main__":
    key = jax.random.PRNGKey(0)
    k1, k2, kp = jax.random.split(key, 3)

    # Matches `up4 = Up(128, 64)` of Backbone: x1 (64 ch, 8x8) is upsampled to
    # 16x16 and fused with skip x2 (64 ch, 16x16); DoubleConv(128 -> 64).
    N, C1, C2, COUT = 2, 64, 64, 64
    x1 = jax.random.normal(k1, (N, C1, 8, 8), jnp.float32)
    x2 = jax.random.normal(k2, (N, C2, 16, 16), jnp.float32)
    params = init_up_params(kp, C1 + C2, COUT)

    # tile_rows=8 -> two row tiles per image: exercises the halo / tile
    # boundary logic, not just the single-tile path.
    fwd = jax.jit(lambda a, b, p: up_forward(a, b, p, tile_rows=8))
    out = jax.block_until_ready(fwd(x1, x2, params))
    assert out.shape == (N, COUT, 16, 16), out.shape

    # (1) Tight check vs a reference that rounds to bf16 exactly where the
    #     kernel does -> residual is only f32 accumulation order (~1e-5), so
    #     any indexing/layout/fusion bug (O(1) error) is caught decisively.
    ref_q = up_forward_ref(x1, x2, params, quantize_like_kernel=True)
    err_q = float(jnp.max(jnp.abs(out - ref_q)))
    assert jnp.allclose(out, ref_q, atol=1e-2, rtol=1e-2), err_q

    # (2) End-to-end accuracy vs the full-f32 reference: the difference is the
    #     intrinsic bf16 rounding of activations/weights (expected ~3e-2 max).
    ref = up_forward_ref(x1, x2, params)
    err = float(jnp.max(jnp.abs(out - ref)))
    assert jnp.allclose(out, ref, atol=2e-1, rtol=5e-2), err

    print("KERNEL_OK")
</pallas_src>

<mosaic_0001>
module attributes {stable_mosaic.version = 11 : i64} {
  func.func @_up_double_conv_kernel(%arg0: i32, %arg1: i32, %arg2: memref<1x12x18x64xbf16, #tpu.memory_space<vmem>>, %arg3: memref<1x12x18x64xbf16, #tpu.memory_space<vmem>>, %arg4: memref<576x64xbf16, #tpu.memory_space<vmem>>, %arg5: memref<576x64xbf16, #tpu.memory_space<vmem>>, %arg6: memref<1x64xf32, #tpu.memory_space<vmem>>, %arg7: memref<576x64xbf16, #tpu.memory_space<vmem>>, %arg8: memref<1x64xf32, #tpu.memory_space<vmem>>, %arg9: memref<1x8x16x64xf32, #tpu.memory_space<vmem>>, %arg10: memref<10x18x64xbf16, #tpu.memory_space<vmem>>) attributes {dimension_semantics = [#tpu.dimension_semantics<parallel>, #tpu.dimension_semantics<parallel>], iteration_bounds = array<i64: 2, 2>, scalar_prefetch = 0 : i64, scratch_operands = 1 : i64, tpu.core_type = #tpu.core_type<tc>, window_params = [{transform_indices = @transform_0, window_bounds = array<i64: 1, 12, 18, 64>}, {transform_indices = @transform_1, window_bounds = array<i64: 1, 12, 18, 64>}, {pipeline_mode = #tpu.pipeline_mode<synchronous>, transform_indices = @transform_2, window_bounds = array<i64: 576, 64>}, {pipeline_mode = #tpu.pipeline_mode<synchronous>, transform_indices = @transform_3, window_bounds = array<i64: 576, 64>}, {pipeline_mode = #tpu.pipeline_mode<synchronous>, transform_indices = @transform_4, window_bounds = array<i64: 1, 64>}, {pipeline_mode = #tpu.pipeline_mode<synchronous>, transform_indices = @transform_5, window_bounds = array<i64: 576, 64>}, {pipeline_mode = #tpu.pipeline_mode<synchronous>, transform_indices = @transform_6, window_bounds = array<i64: 1, 64>}, {transform_indices = @transform_7, window_bounds = array<i64: 1, 8, 16, 64>}]} {
    %c0 = arith.constant 0 : index
    %c0_0 = arith.constant 0 : index
    %c0_1 = arith.constant 0 : index
    %c0_2 = arith.constant 0 : index
    %0 = vector.load %arg2[%c0, %c0_0, %c0_1, %c0_2] : memref<1x12x18x64xbf16, #tpu.memory_space<vmem>>, vector<1x10x16x64xbf16>
    %1 = vector.shape_cast %0 : vector<1x10x16x64xbf16> to vector<10x16x64xbf16>
    %c0_3 = arith.constant 0 : index
    %c0_4 = arith.constant 0 : index
    %c1 = arith.constant 1 : index
    %c0_5 = arith.constant 0 : index
    %2 = vector.load %arg2[%c0_3, %c0_4, %c1, %c0_5] : memref<1x12x18x64xbf16, #tpu.memory_space<vmem>>, vector<1x10x16x64xbf16>
    %3 = vector.shape_cast %2 : vector<1x10x16x64xbf16> to vector<10x16x64xbf16>
    %c0_6 = arith.constant 0 : index
    %c0_7 = arith.constant 0 : index
    %c2 = arith.constant 2 : index
    %c0_8 = arith.constant 0 : index
    %4 = vector.load %arg2[%c0_6, %c0_7, %c2, %c0_8] : memref<1x12x18x64xbf16, #tpu.memory_space<vmem>>, vector<1x10x16x64xbf16>
    %5 = vector.shape_cast %4 : vector<1x10x16x64xbf16> to vector<10x16x64xbf16>
    %c0_9 = arith.constant 0 : index
    %c1_10 = arith.constant 1 : index
    %c0_11 = arith.constant 0 : index
    %c0_12 = arith.constant 0 : index
    %6 = vector.load %arg2[%c0_9, %c1_10, %c0_11, %c0_12] : memref<1x12x18x64xbf16, #tpu.memory_space<vmem>>, vector<1x10x16x64xbf16>
    %7 = vector.shape_cast %6 : vector<1x10x16x64xbf16> to vector<10x16x64xbf16>
    %c0_13 = arith.constant 0 : index
    %c1_14 = arith.constant 1 : index
    %c1_15 = arith.constant 1 : index
    %c0_16 = arith.constant 0 : index
    %8 = vector.load %arg2[%c0_13, %c1_14, %c1_15, %c0_16] : memref<1x12x18x64xbf16, #tpu.memory_space<vmem>>, vector<1x10x16x64xbf16>
    %9 = vector.shape_cast %8 : vector<1x10x16x64xbf16> to vector<10x16x64xbf16>
    %c0_17 = arith.constant 0 : index
    %c1_18 = arith.constant 1 : index
    %c2_19 = arith.constant 2 : index
    %c0_20 = arith.constant 0 : index
    %10 = vector.load %arg2[%c0_17, %c1_18, %c2_19, %c0_20] : memref<1x12x18x64xbf16, #tpu.memory_space<vmem>>, vector<1x10x16x64xbf16>
    %11 = vector.shape_cast %10 : vector<1x10x16x64xbf16> to vector<10x16x64xbf16>
    %c0_21 = arith.constant 0 : index
    %c2_22 = arith.constant 2 : index
    %c0_23 = arith.constant 0 : index
    %c0_24 = arith.constant 0 : index
    %12 = vector.load %arg2[%c0_21, %c2_22, %c0_23, %c0_24] : memref<1x12x18x64xbf16, #tpu.memory_space<vmem>>, vector<1x10x16x64xbf16>
    %13 = vector.shape_cast %12 : vector<1x10x16x64xbf16> to vector<10x16x64xbf16>
    %c0_25 = arith.constant 0 : index
    %c2_26 = arith.constant 2 : index
    %c1_27 = arith.constant 1 : index
    %c0_28 = arith.constant 0 : index
    %14 = vector.load %arg2[%c0_25, %c2_26, %c1_27, %c0_28] : memref<1x12x18x64xbf16, #tpu.memory_space<vmem>>, vector<1x10x16x64xbf16>
    %15 = vector.shape_cast %14 : vector<1x10x16x64xbf16> to vector<10x16x64xbf16>
    %c0_29 = arith.constant 0 : index
    %c2_30 = arith.constant 2 : index
    %c2_31 = arith.constant 2 : index
    %c0_32 = arith.constant 0 : index
    %16 = vector.load %arg2[%c0_29, %c2_30, %c2_31, %c0_32] : memref<1x12x18x64xbf16, #tpu.memory_space<vmem>>, vector<1x10x16x64xbf16>
    %17 = vector.shape_cast %16 : vector<1x10x16x64xbf16> to vector<10x16x64xbf16>
    %18 = tpu.concatenate %1, %3, %5, %7, %9, %11, %13, %15, %17 in 2 : vector<10x16x64xbf16>, vector<10x16x64xbf16>, vector<10x16x64xbf16>, vector<10x16x64xbf16>, vector<10x16x64xbf16>, vector<10x16x64xbf16>, vector<10x16x64xbf16>, vector<10x16x64xbf16>, vector<10x16x64xbf16> -> vector<10x16x576xbf16>
    %19 = vector.shape_cast %18 : vector<10x16x576xbf16> to vector<160x576xbf16>
    %c0_33 = arith.constant 0 : index
    %c0_34 = arith.constant 0 : index
    %20 = vector.load %arg4[%c0_33, %c0_34] : memref<576x64xbf16, #tpu.memory_space<vmem>>, vector<576x64xbf16>
    %cst = arith.constant dense<0.000000e+00> : vector<160x64xf32>
    %21 = tpu.matmul %19, %20, %cst {dimension_numbers = #tpu.dot_dimension_numbers<[1], [0], [0], [1], [0, 0, 1, 1], [], []>} : vector<160x576xbf16>, vector<576x64xbf16>, vector<160x64xf32> -> vector<160x64xf32>
    %c0_35 = arith.constant 0 : index
    %c0_36 = arith.constant 0 : index
    %c0_37 = arith.constant 0 : index
    %c0_38 = arith.constant 0 : index
    %22 = vector.load %arg3[%c0_35, %c0_36, %c0_37, %c0_38] : memref<1x12x18x64xbf16, #tpu.memory_space<vmem>>, vector<1x10x16x64xbf16>
    %23 = vector.shape_cast %22 : vector<1x10x16x64xbf16> to vector<10x16x64xbf16>
    %c0_39 = arith.constant 0 : index
    %c0_40 = arith.constant 0 : index
    %c1_41 = arith.constant 1 : index
    %c0_42 = arith.constant 0 : index
    %24 = vector.load %arg3[%c0_39, %c0_40, %c1_41, %c0_42] : memref<1x12x18x64xbf16, #tpu.memory_space<vmem>>, vector<1x10x16x64xbf16>
    %25 = vector.shape_cast %24 : vector<1x10x16x64xbf16> to vector<10x16x64xbf16>
    %c0_43 = arith.constant 0 : index
    %c0_44 = arith.constant 0 : index
    %c2_45 = arith.constant 2 : index
    %c0_46 = arith.constant 0 : index
    %26 = vector.load %arg3[%c0_43, %c0_44, %c2_45, %c0_46] : memref<1x12x18x64xbf16, #tpu.memory_space<vmem>>, vector<1x10x16x64xbf16>
    %27 = vector.shape_cast %26 : vector<1x10x16x64xbf16> to vector<10x16x64xbf16>
    %c0_47 = arith.constant 0 : index
    %c1_48 = arith.constant 1 : index
    %c0_49 = arith.constant 0 : index
    %c0_50 = arith.constant 0 : index
    %28 = vector.load %arg3[%c0_47, %c1_48, %c0_49, %c0_50] : memref<1x12x18x64xbf16, #tpu.memory_space<vmem>>, vector<1x10x16x64xbf16>
    %29 = vector.shape_cast %28 : vector<1x10x16x64xbf16> to vector<10x16x64xbf16>
    %c0_51 = arith.constant 0 : index
    %c1_52 = arith.constant 1 : index
    %c1_53 = arith.constant 1 : index
    %c0_54 = arith.constant 0 : index
    %30 = vector.load %arg3[%c0_51, %c1_52, %c1_53, %c0_54] : memref<1x12x18x64xbf16, #tpu.memory_space<vmem>>, vector<1x10x16x64xbf16>
    %31 = vector.shape_cast %30 : vector<1x10x16x64xbf16> to vector<10x16x64xbf16>
    %c0_55 = arith.constant 0 : index
    %c1_56 = arith.constant 1 : index
    %c2_57 = arith.constant 2 : index
    %c0_58 = arith.constant 0 : index
    %32 = vector.load %arg3[%c0_55, %c1_56, %c2_57, %c0_58] : memref<1x12x18x64xbf16, #tpu.memory_space<vmem>>, vector<1x10x16x64xbf16>
    %33 = vector.shape_cast %32 : vector<1x10x16x64xbf16> to vector<10x16x64xbf16>
    %c0_59 = arith.constant 0 : index
    %c2_60 = arith.constant 2 : index
    %c0_61 = arith.constant 0 : index
    %c0_62 = arith.constant 0 : index
    %34 = vector.load %arg3[%c0_59, %c2_60, %c0_61, %c0_62] : memref<1x12x18x64xbf16, #tpu.memory_space<vmem>>, vector<1x10x16x64xbf16>
    %35 = vector.shape_cast %34 : vector<1x10x16x64xbf16> to vector<10x16x64xbf16>
    %c0_63 = arith.constant 0 : index
    %c2_64 = arith.constant 2 : index
    %c1_65 = arith.constant 1 : index
    %c0_66 = arith.constant 0 : index
    %36 = vector.load %arg3[%c0_63, %c2_64, %c1_65, %c0_66] : memref<1x12x18x64xbf16, #tpu.memory_space<vmem>>, vector<1x10x16x64xbf16>
    %37 = vector.shape_cast %36 : vector<1x10x16x64xbf16> to vector<10x16x64xbf16>
    %c0_67 = arith.constant 0 : index
    %c2_68 = arith.constant 2 : index
    %c2_69 = arith.constant 2 : index
    %c0_70 = arith.constant 0 : index
    %38 = vector.load %arg3[%c0_67, %c2_68, %c2_69, %c0_70] : memref<1x12x18x64xbf16, #tpu.memory_space<vmem>>, vector<1x10x16x64xbf16>
    %39 = vector.shape_cast %38 : vector<1x10x16x64xbf16> to vector<10x16x64xbf16>
    %40 = tpu.concatenate %23, %25, %27, %29, %31, %33, %35, %37, %39 in 2 : vector<10x16x64xbf16>, vector<10x16x64xbf16>, vector<10x16x64xbf16>, vector<10x16x64xbf16>, vector<10x16x64xbf16>, vector<10x16x64xbf16>, vector<10x16x64xbf16>, vector<10x16x64xbf16>, vector<10x16x64xbf16> -> vector<10x16x576xbf16>
    %41 = vector.shape_cast %40 : vector<10x16x576xbf16> to vector<160x576xbf16>
    %c0_71 = arith.constant 0 : index
    %c0_72 = arith.constant 0 : index
    %42 = vector.load %arg5[%c0_71, %c0_72] : memref<576x64xbf16, #tpu.memory_space<vmem>>, vector<576x64xbf16>
    %cst_73 = arith.constant dense<0.000000e+00> : vector<160x64xf32>
    %43 = tpu.matmul %41, %42, %cst_73 {dimension_numbers = #tpu.dot_dimension_numbers<[1], [0], [0], [1], [0, 0, 1, 1], [], []>} : vector<160x576xbf16>, vector<576x64xbf16>, vector<160x64xf32> -> vector<160x64xf32>
    %44 = arith.addf %21, %43 : vector<160x64xf32>
    %c0_74 = arith.constant 0 : index
    %c0_75 = arith.constant 0 : index
    %45 = vector.load %arg6[%c0_74, %c0_75] : memref<1x64xf32, #tpu.memory_space<vmem>>, vector<1x64xf32>
    %46 = vector.broadcast %45 : vector<1x64xf32> to vector<160x64xf32>
    %47 = arith.addf %44, %46 : vector<160x64xf32>
    %cst_76 = arith.constant 0.000000e+00 : f32
    %48 = vector.broadcast %cst_76 : f32 to vector<160x64xf32>
    %49 = arith.maximumf %47, %48 : vector<160x64xf32>
    %50 = vector.shape_cast %49 : vector<160x64xf32> to vector<10x16x64xf32>
    %51 = tpu.iota {dimensions = array<i32: 0>} : vector<10x1x1xi32>
    %c0_i32 = arith.constant 0 : i32
    %52 = arith.cmpi eq, %arg1, %c0_i32 : i32
    %c0_i32_77 = arith.constant 0 : i32
    %53 = vector.broadcast %c0_i32_77 : i32 to vector<10x1x1xi32>
    %54 = arith.cmpi eq, %51, %53 : vector<10x1x1xi32>
    %55 = vector.broadcast %52 : i1 to vector<10x1x1xi1>
    %56 = arith.andi %55, %54 : vector<10x1x1xi1>
    %c1_i32 = arith.constant 1 : i32
    %57 = arith.cmpi eq, %arg1, %c1_i32 : i32
    %c9_i32 = arith.constant 9 : i32
    %58 = vector.broadcast %c9_i32 : i32 to vector<10x1x1xi32>
    %59 = arith.cmpi eq, %51, %58 : vector<10x1x1xi32>
    %60 = vector.broadcast %57 : i1 to vector<10x1x1xi1>
    %61 = arith.andi %60, %59 : vector<10x1x1xi1>
    %62 = arith.ori %56, %61 : vector<10x1x1xi1>
    %cst_78 = arith.constant 0.000000e+00 : f32
    %63 = vector.shape_cast %62 : vector<10x1x1xi1> to vector<10x1x1xi1>
    %64 = vector.broadcast %63 : vector<10x1x1xi1> to vector<10x16x64xi1>
    %65 = vector.broadcast %cst_78 : f32 to vector<10x16x64xf32>
    %66 = arith.select %64, %65, %50 : vector<10x16x64xi1>, vector<10x16x64xf32>
    %cst_79 = arith.constant 0.000000e+00 : bf16
    %67 = vector.broadcast %cst_79 : bf16 to vector<10x18x64xbf16>
    %c0_80 = arith.constant 0 : index
    %c0_81 = arith.constant 0 : index
    %c0_82 = arith.constant 0 : index
    %68 = vector.load %arg10[%c0_80, %c0_81, %c0_82] : memref<10x18x64xbf16, #tpu.memory_space<vmem>>, vector<10x18x64xbf16>
    tpu.vector_store %arg10[%c0_80, %c0_81, %c0_82], %67 {strides = array<i32>} : memref<10x18x64xbf16, #tpu.memory_space<vmem>>, vector<10x18x64xbf16>,
    %69 = arith.truncf %66 : vector<10x16x64xf32> to vector<10x16x64xbf16>
    %c0_83 = arith.constant 0 : index
    %c1_84 = arith.constant 1 : index
    %c0_85 = arith.constant 0 : index
    %70 = vector.load %arg10[%c0_83, %c1_84, %c0_85] : memref<10x18x64xbf16, #tpu.memory_space<vmem>>, vector<10x16x64xbf16>
    tpu.vector_store %arg10[%c0_83, %c1_84, %c0_85], %69 {strides = array<i32>} : memref<10x18x64xbf16, #tpu.memory_space<vmem>>, vector<10x16x64xbf16>,
    %c0_86 = arith.constant 0 : index
    %c0_87 = arith.constant 0 : index
    %c0_88 = arith.constant 0 : index
    %71 = vector.load %arg10[%c0_86, %c0_87, %c0_88] : memref<10x18x64xbf16, #tpu.memory_space<vmem>>, vector<8x16x64xbf16>
    %c0_89 = arith.constant 0 : index
    %c1_90 = arith.constant 1 : index
    %c0_91 = arith.constant 0 : index
    %72 = vector.load %arg10[%c0_89, %c1_90, %c0_91] : memref<10x18x64xbf16, #tpu.memory_space<vmem>>, vector<8x16x64xbf16>
    %c0_92 = arith.constant 0 : index
    %c2_93 = arith.constant 2 : index
    %c0_94 = arith.constant 0 : index
    %73 = vector.load %arg10[%c0_92, %c2_93, %c0_94] : memref<10x18x64xbf16, #tpu.memory_space<vmem>>, vector<8x16x64xbf16>
    %c1_95 = arith.constant 1 : index
    %c0_96 = arith.constant 0 : index
    %c0_97 = arith.constant 0 : index
    %74 = vector.load %arg10[%c1_95, %c0_96, %c0_97] : memref<10x18x64xbf16, #tpu.memory_space<vmem>>, vector<8x16x64xbf16>
    %c1_98 = arith.constant 1 : index
    %c1_99 = arith.constant 1 : index
    %c0_100 = arith.constant 0 : index
    %75 = vector.load %arg10[%c1_98, %c1_99, %c0_100] : memref<10x18x64xbf16, #tpu.memory_space<vmem>>, vector<8x16x64xbf16>
    %c1_101 = arith.constant 1 : index
    %c2_102 = arith.constant 2 : index
    %c0_103 = arith.constant 0 : index
    %76 = vector.load %arg10[%c1_101, %c2_102, %c0_103] : memref<10x18x64xbf16, #tpu.memory_space<vmem>>, vector<8x16x64xbf16>
    %c2_104 = arith.constant 2 : index
    %c0_105 = arith.constant 0 : index
    %c0_106 = arith.constant 0 : index
    %77 = vector.load %arg10[%c2_104, %c0_105, %c0_106] : memref<10x18x64xbf16, #tpu.memory_space<vmem>>, vector<8x16x64xbf16>
    %c2_107 = arith.constant 2 : index
    %c1_108 = arith.constant 1 : index
    %c0_109 = arith.constant 0 : index
    %78 = vector.load %arg10[%c2_107, %c1_108, %c0_109] : memref<10x18x64xbf16, #tpu.memory_space<vmem>>, vector<8x16x64xbf16>
    %c2_110 = arith.constant 2 : index
    %c2_111 = arith.constant 2 : index
    %c0_112 = arith.constant 0 : index
    %79 = vector.load %arg10[%c2_110, %c2_111, %c0_112] : memref<10x18x64xbf16, #tpu.memory_space<vmem>>, vector<8x16x64xbf16>
    %80 = tpu.concatenate %71, %72, %73, %74, %75, %76, %77, %78, %79 in 2 : vector<8x16x64xbf16>, vector<8x16x64xbf16>, vector<8x16x64xbf16>, vector<8x16x64xbf16>, vector<8x16x64xbf16>, vector<8x16x64xbf16>, vector<8x16x64xbf16>, vector<8x16x64xbf16>, vector<8x16x64xbf16> -> vector<8x16x576xbf16>
    %81 = vector.shape_cast %80 : vector<8x16x576xbf16> to vector<128x576xbf16>
    %c0_113 = arith.constant 0 : index
    %c0_114 = arith.constant 0 : index
    %82 = vector.load %arg7[%c0_113, %c0_114] : memref<576x64xbf16, #tpu.memory_space<vmem>>, vector<576x64xbf16>
    %cst_115 = arith.constant dense<0.000000e+00> : vector<128x64xf32>
    %83 = tpu.matmul %81, %82, %cst_115 {dimension_numbers = #tpu.dot_dimension_numbers<[1], [0], [0], [1], [0, 0, 1, 1], [], []>} : vector<128x576xbf16>, vector<576x64xbf16>, vector<128x64xf32> -> vector<128x64xf32>
    %c0_116 = arith.constant 0 : index
    %c0_117 = arith.constant 0 : index
    %84 = vector.load %arg8[%c0_116, %c0_117] : memref<1x64xf32, #tpu.memory_space<vmem>>, vector<1x64xf32>
    %85 = vector.broadcast %84 : vector<1x64xf32> to vector<128x64xf32>
    %86 = arith.addf %83, %85 : vector<128x64xf32>
    %cst_118 = arith.constant 0.000000e+00 : f32
    %87 = vector.broadcast %cst_118 : f32 to vector<128x64xf32>
    %88 = arith.maximumf %86, %87 : vector<128x64xf32>
    %89 = vector.shape_cast %88 : vector<128x64xf32> to vector<8x16x64xf32>
    %c0_119 = arith.constant 0 : index
    %c0_120 = arith.constant 0 : index
    %c0_121 = arith.constant 0 : index
    %c0_122 = arith.constant 0 : index
    %90 = vector.load %arg9[%c0_119, %c0_120, %c0_121, %c0_122] : memref<1x8x16x64xf32, #tpu.memory_space<vmem>>, vector<1x8x16x64xf32>
    %91 = vector.shape_cast %90 : vector<1x8x16x64xf32> to vector<8x16x64xf32>
    %92 = vector.shape_cast %89 : vector<8x16x64xf32> to vector<1x8x16x64xf32>
    tpu.vector_store %arg9[%c0_119, %c0_120, %c0_121, %c0_122], %92 {strides = array<i32>} : memref<1x8x16x64xf32, #tpu.memory_space<vmem>>, vector<1x8x16x64xf32>,
    return
  }
  func.func @transform_0(%arg0: i32, %arg1: i32) -> (i32, i32, i32, i32) {
    %c2_i32 = arith.constant 2 : i32
    %0 = arith.muli %arg0, %c2_i32 : i32
    %1 = arith.addi %0, %arg1 : i32
    %c0_i32 = arith.constant 0 : i32
    %c0_i32_0 = arith.constant 0 : i32
    %c0_i32_1 = arith.constant 0 : i32
    %c0_i32_2 = arith.constant 0 : i32
    return %1, %c0_i32, %c0_i32_0, %c0_i32_1 : i32, i32, i32, i32
  }
  func.func @transform_1(%arg0: i32, %arg1: i32) -> (i32, i32, i32, i32) {
    %c2_i32 = arith.constant 2 : i32
    %0 = arith.muli %arg0, %c2_i32 : i32
    %1 = arith.addi %0, %arg1 : i32
    %c0_i32 = arith.constant 0 : i32
    %c0_i32_0 = arith.constant 0 : i32
    %c0_i32_1 = arith.constant 0 : i32
    %c0_i32_2 = arith.constant 0 : i32
    return %1, %c0_i32, %c0_i32_0, %c0_i32_1 : i32, i32, i32, i32
  }
  func.func @transform_2(%arg0: i32, %arg1: i32) -> (i32, i32) {
    %c0_i32 = arith.constant 0 : i32
    %c0_i32_0 = arith.constant 0 : i32
    %c0_i32_1 = arith.constant 0 : i32
    return %c0_i32, %c0_i32_0 : i32, i32
  }
  func.func @transform_3(%arg0: i32, %arg1: i32) -> (i32, i32) {
    %c0_i32 = arith.constant 0 : i32
    %c0_i32_0 = arith.constant 0 : i32
    %c0_i32_1 = arith.constant 0 : i32
    return %c0_i32, %c0_i32_0 : i32, i32
  }
  func.func @transform_4(%arg0: i32, %arg1: i32) -> (i32, i32) {
    %c0_i32 = arith.constant 0 : i32
    %c0_i32_0 = arith.constant 0 : i32
    %c0_i32_1 = arith.constant 0 : i32
    return %c0_i32, %c0_i32_0 : i32, i32
  }
  func.func @transform_5(%arg0: i32, %arg1: i32) -> (i32, i32) {
    %c0_i32 = arith.constant 0 : i32
    %c0_i32_0 = arith.constant 0 : i32
    %c0_i32_1 = arith.constant 0 : i32
    return %c0_i32, %c0_i32_0 : i32, i32
  }
  func.func @transform_6(%arg0: i32, %arg1: i32) -> (i32, i32) {
    %c0_i32 = arith.constant 0 : i32
    %c0_i32_0 = arith.constant 0 : i32
    %c0_i32_1 = arith.constant 0 : i32
    return %c0_i32, %c0_i32_0 : i32, i32
  }
  func.func @transform_7(%arg0: i32, %arg1: i32) -> (i32, i32, i32, i32) {
    %c2_i32 = arith.constant 2 : i32
    %0 = arith.muli %arg0, %c2_i32 : i32
    %1 = arith.addi %0, %arg1 : i32
    %c0_i32 = arith.constant 0 : i32
    %c0_i32_0 = arith.constant 0 : i32
    %c0_i32_1 = arith.constant 0 : i32
    %c0_i32_2 = arith.constant 0 : i32
    return %1, %c0_i32, %c0_i32_0, %c0_i32_1 : i32, i32, i32, i32
  }
}

</mosaic_0001>

<bundles_post_ra>
// kernel: _lambda_.1
= control target key start
LH: loop header
LB: loop body
LE: loop exit
PB: predicated region body
PF: predicated region fallthrough
CT: control target
= control target key end

     0   :  { %12 = vsyncpa [#allocation4], 0  ;;  %s10945_s0 = inlined_call_operand.vmem [shape: bf16[4,12,18,64], index: 0, kind: input, shape index: {}]   ;;  %s10946_s1 = inlined_call_operand.vmem [shape: bf16[4,12,18,64], index: 1, kind: input, shape index: {}]   ;;  %s10947_s2 = inlined_call_operand.vmem [shape: bf16[576,64], index: 2, kind: input, shape index: {}]   ;;  %s10948_s3 = inlined_call_operand.vmem [shape: bf16[576,64], index: 3, kind: input, shape index: {}]   ;;  %s10949_s4 = inlined_call_operand.vmem [shape: f32[1,64], index: 4, kind: input, shape index: {}]   ;;  %s10950_s5 = inlined_call_operand.vmem [shape: bf16[576,64], index: 5, kind: input, shape index: {}]   ;;  %s10951_s6 = inlined_call_operand.vmem [shape: f32[1,64], index: 6, kind: input, shape index: {}]   ;;  %s10952_s7 = inlined_call_operand.hbm [shape: f32[4,8,16,64], index: 7, kind: output, shape index: {}]  }
   0x1   :  { %14 = vsyncpa [#allocation4 + $0x1], 0  ;;  %s7831_s24 = smov 0   ;;  %s7833_s25 = smov 0  }
   0x2   :  { %s7835_s26 = smov 0   ;;  %s7837_s27 = smov 0  }
   0x3   :  { %s7839_s28 = smov 0   ;;  %s7841_s29 = smov 0  }
   0x4   :  { %s7843_s30 = smov 0   ;;  %s7845_s8 = smov 0  }
   0x5 LB: > { %s5997_s9 = sadd.s32 4294967295, %s7784_s8   ;;  %s29_s10 = sadd.s32 1, %s7776_s29  ;;  %s7784_s8 = sphi %s7845_s8, %s20_s8   ;;  %s7780_s30 = sphi %s7843_s30, %s11265_s30   ;;  %s7776_s29 = sphi %s7841_s29, %s11264_s29   ;;  %s7772_s28 = sphi %s7839_s28, %s11263_s28   ;;  %s7768_s27 = sphi %s7837_s27, %s11262_s27   ;;  %s7764_s26 = sphi %s7835_s26, %s11261_s26   ;;  %s7760_s25 = sphi %s7833_s25, %s11260_s25   ;;  %s7756_s24 = sphi %s7831_s24, %s11259_s24  }
   0x6   : > { %s32_s11 = sadd.s32 1, %s7780_s30  ;;  %p30_p0 = scmp.ge.s32.totalorder %s29_s10, 2 }
   0x7   : > { %s6003_s12 = sshll.u32 %s7780_s30, 1  ;;  %s5998_s13 = sadd.s32 4294967294, %s7784_s8  }
   0x8   : > { %s202_s14 = sadd.s32 %s7776_s29, %s6003_s12  ;;  %s11267_s10 = smov (%p30_p0, %s29_s10), 0 }
   0x9   : > { %s11269_s11 = smov (!%p30_p0, %s32_s11), %s7780_s30  ;;  %p218_p1 = scmp.ne.s32.totalorder %s7764_s26, %s7760_s25 }
   0xa   : > { %p219_p2 = scmp.eq.s32.totalorder %s5997_s9, 3  ;;  %p34_p3 = scmp.ge.s32.totalorder %s11269_s11, 2 }
   0xb   : > { %p224_p4 = scmp.ne.s32.totalorder %s7760_s25, %s7756_s24  ;;  %p225_p6 = scmp.eq.s32.totalorder %s5998_s13, 3 }
   0xc   : > { %p7884_p5 = por %p219_p2, %p218_p1  ;;  %s11271_s11 = smov (%p34_p3, %s11269_s11), 0 }
   0xd   : > { %11039 = sst [smem:[#allocation6_spill]] %s11271_s11  ;;  %p7890_p7 = por %p225_p6, %p224_p4 }
   0xe   : > { %p6007_p8 = scmp.ge.s32.totalorder %s7784_s8, 1  ;;  %s6004_s17 = sshll.u32 %s11271_s11, 1 }
   0xf   : > { %p282_p9 = scmp.lt.s32.totalorder %s7784_s8, 5  ;;  %s204_s18 = sadd.s32 %s6004_s17, %s11267_s10 }
  0x10   : > { %s208_s19 = sadd.s32 1, %s7764_s26  ;;  %s205_s20 = ssub.s32 %s202_s14, %s204_s18 }
  0x11   : > { %p283_p10 = pnand %p6007_p8, %p282_p9  ;;  %p206_p11 = scmp.eq.s32.totalorder %s205_s20, 0 }
  0x13   : > { %s7900_s21 = scalar_select %p206_p11, %s7764_s26, %s208_s19  }
  0x14   : > { %286 = sbr.rel (%p283_p10) target bundleno = 1023 (0x3ff), region = 48 }
  0x19   : > { %s6009_s22 = sshll.u32 %s7772_s28, 1  ;;  %v7334_v0 = vld [vmem:[%s10948_s3 + $0xf8] sm:$0xff]   ;;  %v7340_v2 = vld [vmem:[%s10948_s3 + $0xf0] sm:$0xff]   ;;  %v7345_v4 = vld [vmem:[%s10948_s3 + $0xe8] sm:$0xff]   ;;  %vm546_vm0 = vsmask.f32 7424 }
  0x1a   : > { %s7907_s12 = sadd.s32 %s7768_s27, %s6009_s22  ;;  %6686 = vmatprep.subr.bf16.mxu1 %v7334_v0  ;;  %v7335_v1 = vld [vmem:[%s10948_s3 + $0xb8] sm:$0xff]   ;;  %v7341_v3 = vld [vmem:[%s10948_s3 + $0xb0] sm:$0xff]   ;;  %v7346_v5 = vld [vmem:[%s10948_s3 + $0xa8] sm:$0xff]   ;;  %vm717_vm1 = vcmask 1046528   ;;  %s7786_s13 = smov 64   ;;  %vm1328_vm2 = vcmask 523264  }
  0x1b   : > { %p325_p12 = scmp.lt.s32.totalorder %s7907_s12, 3  ;;  %6687 = vmatpush3.bf16.msra.mxu1 %v7335_v1  ;;  %v7351_v6 = vld [vmem:[%s10948_s3 + $0xe0] sm:$0xff]   ;;  %v7356_v15 = vld [vmem:[%s10948_s3 + $0xd8] sm:$0xff]   ;;  %v7358_v40 = vld [vmem:[%s10948_s3 + $0xd0] sm:$0xff]   ;;  %vm3984_vm3 = vcmask 519168   ;;  %vm3987_vm4 = vcmask 516096  }
  0x1c   : > { %6688 = vmatprep.subr.bf16.mxu1 %v7340_v2  ;;  %v7352_v12 = vld [vmem:[%s10948_s3 + $0xa0] sm:$0xff]   ;;  %v7357_v30 = vld [vmem:[%s10948_s3 + $0x98] sm:$0xff]   ;;  %v7359_v45 = vld [vmem:[%s10948_s3 + $0x90] sm:$0xff]   ;;  %p3952_p13 = scmp.eq.s32.totalorder %s7768_s27, 0  ;;  %p3956_p0 = scmp.eq.s32.totalorder %s7768_s27, 1 }
  0x1d   : > { %s7917_s19 = scalar_select %p325_p12, %s7907_s12, 3  ;;  %vm4280_vm6 = vsmask.f32 7938  ;;  %vm4076_vm7 = vsmask.f32 256 }
  0x1e   : > { %vm4077_vm8 = vsmask.f32 4368  ;;  %vm9918_vm9 = vmand %vm3984_vm3, %vm4280_vm6  ;;  %s320_s14 = sand.u32 1, %s7760_s25   ;;  %s6609_s17 = sshll.u32 %s7907_s12, 11 }
  0x1f   : > { %s7178_s9 = smul.u32 144, %s7917_s19  ;;  %6689 = vmatpush3.bf16.msra.mxu1 %v7341_v3  ;;  %vm9935_vm10 = vmor %vm4076_vm7, %vm4077_vm8  ;;  %s10884_s20 = scalar_lea.hbm %s10952_s7, %s6609_s17 }
  0x20   : > { %6690 = vmatprep.subr.bf16.mxu1 %v7345_v4  ;;  %s9863_s19 = scalar_select %p3956_p0, 1, 0  ;;  %vm9946_vm11 = vmand %vm3987_vm4, %vm4076_vm7 }
  0x21   : > { %s7934_s11 = scalar_lea.vmem %s10946_s1, %s7178_s9  ;;  %s8224_s28 = scalar_lea.vmem %s10945_s0, %s7178_s9 }
  0x22   : > { %v6223_v7 = vld [vmem:[%s7934_s11 + $0x18] sm:$0xf]  ;;  %v6224_v8 = vld [vmem:[%s7934_s11 + $0x1c] sm:$0xf]  ;;  %v6225_v11 = vld [vmem:[%s7934_s11 + $0x24] sm:$0xf] }
  0x23   : > { %v7941_v9 = vcombine.low %v6223_v7, %v6224_v8  ;;  %v7255_v10 = vld [vmem:[%s7934_s11 + $0x20] ss:$0 sps:$4 sm:$0x11]   ;;  %v6226_v13 = vld [vmem:[%s7934_s11 + $0x28] sm:$0xf]  ;;  %6691 = vmatpush3.bf16.msra.mxu1 %v7346_v5  ;;  %s10894_s12 = scalar_lea.sflag [#allocation4], %s320_s14 }
  0x24   : > { %v7950_v14 = vld [vmem:[%s7934_s11 + $0x10] sm:$0xf]  ;;  %v2331_v18 = vshll.u32 %v7255_v10, 16  ;;  %v7957_v19 = vcombine.low %v6225_v11, %v6226_v13  ;;  %v7960_v20 = vld [vmem:[%s7934_s11 + $0x2c] ss:$0 sps:$4 sm:$0x11]   ;;  %6692 = vmatprep.subr.bf16.mxu1 %v7351_v6 }
  0x25   : > { %v2324_v16 = vshrl.u32 %v7941_v9, 16  ;;  %v2326_v17 = vshll.u32 %v7941_v9, 16  ;;  %11041 = vst [vmem:[#allocation7_spill] sm:$0xff] %v7960_v20  ;;  %v6213_v21 = vld [vmem:[%s7934_s11 + $0xc] sm:$0xe]  ;;  %v2343_v27 = vshll.u32 %v7960_v20, 16 }
  0x26   : > { %v7964_v22 = vld [vmem:[%s7934_s11 + $0x1c] sm:$0xf]  ;;  %v2333_v24 = vrot.slane %v2331_v18, 1  ;;  %v2336_v25 = vshrl.u32 %v7957_v19, 16  ;;  %v2338_v26 = vshll.u32 %v7957_v19, 16  ;;  %v6313_v29 = vcombine.low %v6213_v21, %v7950_v14  ;;  %v7360_v5 = vld [vmem:[%s10948_s3 + $0xc8] sm:$0xff]  }
  0x27   : > { %v2328_v23 = vrot.slane %v2326_v17, 1  ;;  %v7970_v28 = vld [vmem:[%s7934_s11 + $0x14] ss:$0 sps:$4 sm:$0x11]   ;;  %v6214_v33 = vld [vmem:[%s7934_s11 + $0x18] sm:$0xe]  ;;  %6693 = vmatpush3.bf16.msra.mxu1 %v7352_v12 }
  0x28   : > { %v2340_v32 = vrot.slane %v2338_v26, 1  ;;  %v7978_v34 = vld [vmem:[%s7934_s11 + $0x20] ss:$0 sps:$4 sm:$0x11]   ;;  %v2345_v35 = vrot.slane %v2343_v27, 1  ;;  %v2193_v36 = vrot.slane %v6313_v29, 1  ;;  %v6314_v38 = vcombine.low %v6214_v33, %v7964_v22  ;;  %6694 = vmatprep.subr.bf16.mxu1 %v7356_v15 }
  0x29   : > { %v2329_v31 = vor.u32 %v2328_v23, %v2324_v16  ;;  %v2194_v37 = vrot.slane %v7970_v28, 1  ;;  %v6227_v39 = vld [vmem:[%s7934_s11 + $0x30] sm:$0xf]  ;;  %v2197_v43 = vrot.slane %v7978_v34, 1  ;;  %v6228_v44 = vld [vmem:[%s7934_s11 + $0x34] sm:$0xf] }
  0x2a   : > { %v2341_v42 = vor.u32 %v2340_v32, %v2336_v25  ;;  %v2196_v46 = vrot.slane %v6314_v38, 1  ;;  %v7993_v47 = vcombine.low %v6227_v39, %v6228_v44  ;;  %v7263_v48 = vld [vmem:[%s7934_s11 + $0x38] ss:$0 sps:$4 sm:$0x11]   ;;  %v7997_v49 = vld [vmem:[%s7934_s11 + $0x28] sm:$0xf] }
  0x2b   : > { %v2334_v41 = vsel %vm546_vm0, %v2329_v31, %v2333_v24  ;;  %v2195_v51 = vsel %vm717_vm1, %v2193_v36, %v2194_v37  ;;  %v6215_v52 = vld [vmem:[%s7934_s11 + $0x24] sm:$0xe]  ;;  %v6229_v53 = vld [vmem:[%s7934_s11 + $0x3c] sm:$0xf]  ;;  %6695 = vmatpush3.bf16.msra.mxu1 %v7357_v30  ;;  %v2355_v56 = vshll.u32 %v7263_v48, 16  ;;  %v7361_v29 = vld [vmem:[%s10948_s3 + $0x88] sm:$0xff]  }
  0x2c   : > { %2443 = vrot.lane.b32.xlu0 %v2334_v41, %s7786_s13  ;;  %v2346_v50 = vsel %vm546_vm0, %v2341_v42, %v2345_v35  ;;  %v2348_v54 = vshrl.u32 %v7993_v47, 16  ;;  %v2350_v55 = vshll.u32 %v7993_v47, 16  ;;  %v8007_v57 = vld [vmem:[%s7934_s11 + $0x2c] ss:$0 sps:$4 sm:$0x11]   ;;  %6696 = vmatprep.subr.bf16.mxu1 %v7358_v40  ;;  %v2198_v58 = vsel %vm717_vm1, %v2196_v46, %v2197_v43 }
  0x2d   : > { %2445 = vrot.lane.b32.xlu1 %v2346_v50, %s7786_s13  ;;  %v6315_v59 = vcombine.low %v6215_v52, %v7997_v49  ;;  %v6230_v60 = vld [vmem:[%s7934_s11 + $0x40] sm:$0xf]  ;;  %v8013_v61 = vld [vmem:[%s7934_s11 + $0x34] sm:$0xf]  ;;  %v2357_v63 = vrot.slane %v2355_v56, 1  ;;  %v2200_v0 = vrot.slane %v8007_v57, 1 }
  0x2e   : > { %v2352_v62 = vrot.slane %v2350_v55, 1  ;;  %v8017_v1 = vcombine.low %v6229_v53, %v6230_v60  ;;  %v7267_v2 = vld [vmem:[%s7934_s11 + $0x44] ss:$0 sps:$4 sm:$0x11]   ;;  %v6216_v4 = vld [vmem:[%s7934_s11 + $0x30] sm:$0xe] }
  0x2f   : > { %v2199_v3 = vrot.slane %v6315_v59, 1  ;;  %6697 = vmatpush3.bf16.msra.mxu1 %v7359_v45  ;;  %v2367_v10 = vshll.u32 %v7267_v2, 16  ;;  %v7268_v11 = vld [vmem:[%s7934_s11 + $0x38] ss:$0 sps:$4 sm:$0x11]   ;;  %v6316_v13 = vcombine.low %v6216_v4, %v8013_v61 }
  0x30   : > { %2223 = vrot.lane.b32.xlu0 %v2195_v51, %s7786_s13  ;;  %v2353_v6 = vor.u32 %v2352_v62, %v2348_v54  ;;  %v2360_v7 = vshrl.u32 %v8017_v1, 16  ;;  %v2362_v8 = vshll.u32 %v8017_v1, 16  ;;  %v6231_v15 = vld [vmem:[%s7934_s11 + $0x48] sm:$0xf]  ;;  %v6232_v16 = vld [vmem:[%s7934_s11 + $0x4c] sm:$0xf]  ;;  %6698 = vmatprep.subr.bf16.mxu1 %v7360_v5 }
  0x31   : > { %2225 = vrot.lane.b32.xlu1 %v2198_v58, %s7786_s13  ;;  %v2201_v12 = vsel %vm717_vm1, %v2199_v3, %v2200_v0  ;;  %v2369_v21 = vrot.slane %v2367_v10, 1  ;;  %v2203_v23 = vrot.slane %v7268_v11, 1  ;;  %v7271_v24 = vld [vmem:[%s7934_s11 + $0x50] ss:$0 sps:$4 sm:$0x11]   ;;  %v2202_v25 = vrot.slane %v6316_v13, 1 }
  0x32   : > { %v2358_v17 = vsel %vm546_vm0, %v2353_v6, %v2357_v63  ;;  %v2364_v18 = vrot.slane %v2362_v8, 1  ;;  %v8035_v26 = vcombine.low %v6231_v15, %v6232_v16  ;;  %v8038_v27 = vld [vmem:[%s7934_s11 + $0x40] sm:$0xf]  ;;  %v2379_v31 = vshll.u32 %v7271_v24, 16  ;;  %v6217_v32 = vld [vmem:[%s7934_s11 + $0x3c] sm:$0xe] }
  0x33   : > { %v7272_v33 = vld [vmem:[%s7934_s11 + $0x44] ss:$0 sps:$4 sm:$0x11]   ;;  %v2204_v35 = vsel %vm717_vm1, %v2202_v25, %v2203_v23  ;;  %v6317_v38 = vcombine.low %v6217_v32, %v8038_v27  ;;  %v6233_v39 = vld [vmem:[%s7934_s11 + $0x54] sm:$0xf]  ;;  %6699 = vmatpush3.bf16.msra.mxu1 %v7361_v29  ;;  %v7362_v51 = vld [vmem:[%s10948_s3 + $0x78] sm:$0xff]  }
  0x34   : > { %2447 = vrot.lane.b32.xlu0 %v2358_v17, %s7786_s13  ;;  %v2365_v30 = vor.u32 %v2364_v18, %v2360_v7  ;;  %v2372_v36 = vshrl.u32 %v8035_v26, 16  ;;  %v2374_v37 = vshll.u32 %v8035_v26, 16  ;;  %v6234_v40 = vld [vmem:[%s7934_s11 + $0x58] sm:$0xf]  ;;  %v2381_v42 = vrot.slane %v2379_v31, 1  ;;  %6610 = vmatprep.subr.bf16.mxu0 %v7362_v51 }
  0x35   : > { %2227 = vrot.lane.b32.xlu1 %v2201_v12, %s7786_s13  ;;  %v2206_v43 = vrot.slane %v7272_v33, 1  ;;  %v8053_v44 = vcombine.low %v6233_v39, %v6234_v40  ;;  %v8056_v45 = vld [vmem:[%s7934_s11 + $0x4c] sm:$0xf]  ;;  %v2205_v48 = vrot.slane %v6317_v38, 1  ;;  %v6218_v54 = vld [vmem:[%s7934_s11 + $0x48] sm:$0xe] }
  0x36   : > { %v2370_v41 = vsel %vm546_vm0, %v2365_v30, %v2369_v21  ;;  %v2376_v46 = vrot.slane %v2374_v37, 1  ;;  %v7275_v50 = vld [vmem:[%s7934_s11 + $0x5c] ss:$0 sps:$4 sm:$0x11]   ;;  %v6318_v60 = vcombine.low %v6218_v54, %v8056_v45  ;;  %v6235_v62 = vld [vmem:[%s7934_s11 + $0x60] sm:$0xf] }
  0x37   : > { %v2384_v52 = vshrl.u32 %v8053_v44, 16  ;;  %v2386_v53 = vshll.u32 %v8053_v44, 16  ;;  %v2207_v56 = vsel %vm717_vm1, %v2205_v48, %v2206_v43  ;;  %v2391_v58 = vshll.u32 %v7275_v50, 16  ;;  %v7276_v59 = vld [vmem:[%s7934_s11 + $0x50] ss:$0 sps:$4 sm:$0x11]  }
  0x38   : > { %2449 = vrot.lane.b32.xlu0 %v2370_v41, %s7786_s13  ;;  %v2377_v55 = vor.u32 %v2376_v46, %v2372_v36  ;;  %v6236_v0 = vld [vmem:[%s7934_s11 + $0x64] sm:$0xf]  ;;  %v7363_v2 = vld [vmem:[%s10948_s3 + $0x38] sm:$0xff]   ;;  %v2208_v5 = vrot.slane %v6318_v60, 1  ;;  %v2209_v6 = vrot.slane %v7276_v59, 1  ;;  %v2051_v12 = vshll.u32 %v7970_v28, 16 }
  0x39   : > { %2229 = vrot.lane.b32.xlu1 %v2204_v35, %s7786_s13  ;;  %v2388_v63 = vrot.slane %v2386_v53, 1  ;;  %v2393_v4 = vrot.slane %v2391_v58, 1  ;;  %v7279_v7 = vld [vmem:[%s7934_s11 + $0x68] ss:$0 sps:$4 sm:$0x11]   ;;  %v8079_v10 = vcombine.low %v6235_v62, %v6236_v0  ;;  %6611 = vmatpush3.bf16.msra.mxu0 %v7363_v2  ;;  %v7364_v39 = vld [vmem:[%s10948_s3 + $0xc0] sm:$0xff]  }
  0x3a   : > { %v2382_v3 = vsel %vm546_vm0, %v2377_v55, %v2381_v42  ;;  %v8082_v11 = vld [vmem:[%s7934_s11 + $0x58] sm:$0xf]  ;;  %v2210_v13 = vsel %vm717_vm1, %v2208_v5, %v2209_v6  ;;  %v2403_v15 = vshll.u32 %v7279_v7, 16  ;;  %v6219_v16 = vld [vmem:[%s7934_s11 + $0x54] sm:$0xe]  ;;  %6700 = vmatprep.subr.bf16.mxu1 %v7364_v39 }
  0x3b   : > { %v2389_v8 = vor.u32 %v2388_v63, %v2384_v52  ;;  %v7280_v17 = vld [vmem:[%s7934_s11 + $0x5c] ss:$0 sps:$4 sm:$0x11]   ;;  %v2396_v21 = vshrl.u32 %v8079_v10, 16  ;;  %v2398_v23 = vshll.u32 %v8079_v10, 16  ;;  %v6319_v24 = vcombine.low %v6219_v16, %v8082_v11  ;;  %v7366_v62 = vld [vmem:[%s10948_s3 + $0x70] sm:$0xff]  }
  0x3c   : > { %2451 = vrot.lane.b32.xlu0 %v2382_v3, %s7786_s13  ;;  %v6183_v25 = vld [vmem:[%s7934_s11 + $0xc] sm:$0xf]  ;;  %v1541_v29 = vld [vmem:[%s7934_s11] sm:$0xf]  ;;  %v2405_v30 = vrot.slane %v2403_v15, 1  ;;  %v2212_v31 = vrot.slane %v7280_v17, 1  ;;  %6612 = vmatprep.subr.bf16.mxu0 %v7366_v62 }
  0x3d   : > { %2231 = vrot.lane.b32.xlu1 %v2207_v56, %s7786_s13  ;;  %v2394_v18 = vsel %vm546_vm0, %v2389_v8, %v2393_v4  ;;  %v6293_v32 = vcombine.low %v6183_v25, %v7950_v14  ;;  %v1542_v33 = vld [vmem:[%s7934_s11 + $0x4] sm:$0xf]  ;;  %v2400_v35 = vrot.slane %v2398_v23, 1  ;;  %v2211_v36 = vrot.slane %v6319_v24, 1  ;;  %v6237_v42 = vld [vmem:[%s7934_s11 + $0x6c] sm:$0xf] }
  0x3e   : > { %v8098_v37 = vcombine.low %v1541_v29, %v1542_v33  ;;  %v7284_v38 = vld [vmem:[%s7934_s11 + $0x8] ss:$0 sps:$4 sm:$0x11]   ;;  %v6238_v14 = vld [vmem:[%s7934_s11 + $0x70] sm:$0xf]  ;;  %v7365_v56 = vld [vmem:[%s10948_s3 + $0x80] sm:$0xff]  }
  0x3f   : > { %v2044_v40 = vshrl.u32 %v6293_v32, 16  ;;  %v2046_v41 = vshll.u32 %v6293_v32, 16  ;;  %v2401_v43 = vor.u32 %v2400_v35, %v2396_v21  ;;  %v2213_v46 = vsel %vm717_vm1, %v2211_v36, %v2212_v31  ;;  %v8110_v51 = vld [vmem:[%s7934_s11 + $0x64] sm:$0xf]  ;;  %v6220_v60 = vld [vmem:[%s7934_s11 + $0x60] sm:$0xe]  ;;  %6701 = vmatpush3.bf16.msra.mxu1 %v7365_v56 }
  0x40   : > { %2453 = vrot.lane.b32.xlu0 %v2394_v18, %s7786_s13  ;;  %v1744_v48 = vshrl.u32 %v8098_v37, 16  ;;  %v1746_v50 = vshll.u32 %v8098_v37, 16  ;;  %v1751_v53 = vshll.u32 %v7284_v38, 16  ;;  %v8112_v54 = vcombine.low %v6237_v42, %v6238_v14  ;;  %v7286_v55 = vld [vmem:[%s7934_s11 + $0x74] ss:$0 sps:$4 sm:$0x11]  }
  0x41   : > { %2233 = vrot.lane.b32.xlu1 %v2210_v13, %s7786_s13  ;;  %v2048_v52 = vrot.slane %v2046_v41, 1  ;;  %v2406_v58 = vsel %vm546_vm0, %v2401_v43, %v2405_v30  ;;  %v2415_v3 = vshll.u32 %v7286_v55, 16  ;;  %v7287_v5 = vld [vmem:[%s7934_s11 + $0x68] ss:$0 sps:$4 sm:$0x11]   ;;  %v6320_v6 = vcombine.low %v6220_v60, %v8110_v51  ;;  %v7367_v8 = vld [vmem:[%s10948_s3 + $0x30] sm:$0xff]  }
  0x42   : > { %v1748_v59 = vrot.slane %v1746_v50, 1  ;;  %v1753_v63 = vrot.slane %v1751_v53, 1  ;;  %v2408_v0 = vshrl.u32 %v8112_v54, 16  ;;  %v2410_v2 = vshll.u32 %v8112_v54, 16  ;;  %v1543_v7 = vld [vmem:[%s7934_s11 + $0xc] sm:$0xf]  ;;  %6613 = vmatpush3.bf16.msra.mxu0 %v7367_v8 }
  0x43   : > { %v2417_v15 = vrot.slane %v2415_v3, 1  ;;  %v1544_v16 = vld [vmem:[%s7934_s11 + $0x10] sm:$0xf]  ;;  %v2214_v18 = vrot.slane %v6320_v6, 1  ;;  %v2215_v21 = vrot.slane %v7287_v5, 1  ;;  %v2049_v33 = vor.u32 %v2048_v52, %v2044_v40  ;;  %v7368_v28 = vld [vmem:[%s10947_s2 + $0x78] sm:$0xff]  }
  0x44   : > { %2455 = vrot.lane.b32.xlu0 %v2406_v58, %s7786_s13  ;;  %v1749_v4 = vor.u32 %v1748_v59, %v1744_v48  ;;  %v2412_v13 = vrot.slane %v2410_v2, 1  ;;  %v6185_v23 = vld [vmem:[%s7934_s11 + $0x18] sm:$0xf]  ;;  %v8137_v24 = vld [vmem:[%s7934_s11 + $0x14] ss:$0 sps:$4 sm:$0x11]   ;;  %v8141_v29 = vcombine.low %v1543_v7, %v1544_v16  ;;  %6776 = vmatprep.subr.bf16.mxu1 %v7368_v28 }
  0x45   : > { %2235 = vrot.lane.b32.xlu1 %v2213_v46, %s7786_s13  ;;  %v6239_v30 = vld [vmem:[%s7934_s11 + $0x78] sm:$0xf]  ;;  %v6240_v31 = vld [vmem:[%s7934_s11 + $0x7c] sm:$0xf]  ;;  %v2053_v35 = vrot.slane %v2051_v12, 1  ;;  %v2216_v36 = vsel %vm717_vm1, %v2214_v18, %v2215_v21  ;;  %v1763_v38 = vshll.u32 %v8137_v24, 16  ;;  %v8166_v50 = vcombine.low %v6185_v23, %v7964_v22 }
  0x46   : > { %v1754_v17 = vsel %vm546_vm0, %v1749_v4, %v1753_v63  ;;  %v2413_v25 = vor.u32 %v2412_v13, %v2408_v0  ;;  %v8149_v39 = vcombine.low %v6239_v30, %v6240_v31  ;;  %v1756_v42 = vshrl.u32 %v8141_v29, 16  ;;  %v8156_v43 = vld [vmem:[%s7934_s11 + $0x70] sm:$0xf]  ;;  %v6221_v53 = vld [vmem:[%s7934_s11 + $0x6c] sm:$0xe] }
  0x47   : > { %v1758_v14 = vshll.u32 %v8141_v29, 16  ;;  %v1765_v12 = vrot.slane %v1763_v38, 1  ;;  %v7294_v55 = vld [vmem:[%s7934_s11 + $0x74] ss:$0 sps:$4 sm:$0x11]   ;;  %v8171_v56 = vsel %vm546_vm0, %v2049_v33, %v2053_v35  ;;  %v6321_v60 = vcombine.low %v6221_v53, %v8156_v43 }
  0x48   : > { %1993 = vrot.lane.b32.xlu0 %v6293_v32, %s7786_s13  ;;  %v7293_v32 = vld [vmem:[%s7934_s11 + $0x80] ss:$0 sps:$4 sm:$0x11]   ;;  %v2418_v41 = vsel %vm546_vm0, %v2413_v25, %v2417_v15  ;;  %v2420_v40 = vshrl.u32 %v8149_v39, 16  ;;  %v2422_v46 = vshll.u32 %v8149_v39, 16  ;;  %v2063_v63 = vshll.u32 %v7978_v34, 16 }
  0x49   : > { %1863 = vrot.lane.b32.xlu1 %v1754_v17, %s7786_s13  ;;  %v2427_v48 = vshll.u32 %v7293_v32, 16  ;;  %v1760_v52 = vrot.slane %v1758_v14, 1  ;;  %v1545_v62 = vld [vmem:[%s7934_s11 + $0x18] sm:$0xf]  ;;  %v2058_v22 = vshll.u32 %v8166_v50, 16  ;;  %v2218_v2 = vrot.slane %v7294_v55, 1 }
  0x4a   : > { %v2424_v58 = vrot.slane %v2422_v46, 1  ;;  %v1546_v3 = vld [vmem:[%s7934_s11 + $0x1c] sm:$0xf]  ;;  %v2217_v5 = vrot.slane %v6321_v60, 1  ;;  %v6241_v8 = vld [vmem:[%s7934_s11 + $0x84] sm:$0xf] }
  0x4b   : > { %v2429_v59 = vrot.slane %v2427_v48, 1  ;;  %v1761_v0 = vor.u32 %v1760_v52, %v1756_v42  ;;  %v8178_v6 = vcombine.low %v1545_v62, %v1546_v3  ;;  %v7298_v7 = vld [vmem:[%s7934_s11 + $0x20] ss:$0 sps:$4 sm:$0x11]   ;;  %v6187_v15 = vld [vmem:[%s7934_s11 + $0x24] sm:$0xf] }
  0x4c   : > { %2457 = vrot.lane.b32.xlu0 %v2418_v41, %s7786_s13  ;;  %v2425_v4 = vor.u32 %v2424_v58, %v2420_v40  ;;  %v6242_v16 = vld [vmem:[%s7934_s11 + $0x88] sm:$0xf]  ;;  %v7300_v23 = vld [vmem:[%s7934_s11 + $0x8c] ss:$0 sps:$4 sm:$0x11]   ;;  %v2056_v30 = vshrl.u32 %v8166_v50, 16  ;;  %v2219_v31 = vsel %vm717_vm1, %v2217_v5, %v2218_v2  ;;  %v8203_v32 = vcombine.low %v6187_v15, %v7997_v49 }
  0x4d   : > { %2237 = vrot.lane.b32.xlu1 %v2216_v36, %s7786_s13  ;;  %v1766_v13 = vsel %vm546_vm0, %v1761_v0, %v1765_v12  ;;  %v1768_v18 = vshrl.u32 %v8178_v6, 16  ;;  %v1770_v21 = vshll.u32 %v8178_v6, 16  ;;  %v7370_v25 = vld [vmem:[%s10948_s3 + $0x68] sm:$0xff]   ;;  %v1775_v33 = vshll.u32 %v7298_v7, 16  ;;  %v8200_v36 = vld [vmem:[%s7934_s11 + $0x7c] sm:$0xf] }
  0x4e   : > { %v2430_v17 = vsel %vm546_vm0, %v2425_v4, %v2429_v59  ;;  %v8197_v35 = vcombine.low %v6241_v8, %v6242_v16  ;;  %v2060_v38 = vrot.slane %v2058_v22, 1  ;;  %v2439_v42 = vshll.u32 %v7300_v23, 16  ;;  %v6222_v14 = vld [vmem:[%s7934_s11 + $0x78] sm:$0xe]  ;;  %6614 = vmatprep.subr.bf16.mxu0 %v7370_v25  ;;  %v1547_v52 = vld [vmem:[%s7934_s11 + $0x24] sm:$0xf] }
  0x4f   : > { %v1772_v41 = vrot.slane %v1770_v21, 1  ;;  %v1777_v28 = vrot.slane %v1775_v33, 1  ;;  %v7301_v46 = vld [vmem:[%s7934_s11 + $0x80] ss:$0 sps:$4 sm:$0x11]   ;;  %v6322_v48 = vcombine.low %v6222_v14, %v8200_v36  ;;  %v7371_v55 = vld [vmem:[%s10948_s3 + $0x28] sm:$0xff]  }
  0x50   : > { %1995 = vrot.lane.b32.xlu0 %v8166_v50, %s7786_s13  ;;  %11042 = vst [vmem:[#allocation8_spill] sm:$0xff] %v8197_v35  ;;  %v2432_v12 = vshrl.u32 %v8197_v35, 16  ;;  %v2434_v40 = vshll.u32 %v8197_v35, 16  ;;  %v2441_v50 = vrot.slane %v2439_v42, 1  ;;  %v1548_v53 = vld [vmem:[%s7934_s11 + $0x28] sm:$0xf]  ;;  %6615 = vmatpush3.bf16.msra.mxu0 %v7371_v55  ;;  %v2061_v8 = vor.u32 %v2060_v38, %v2056_v30 }
  0x51   : > { %1865 = vrot.lane.b32.xlu1 %v1766_v13, %s7786_s13  ;;  %v1773_v49 = vor.u32 %v1772_v41, %v1768_v18  ;;  %v2220_v59 = vrot.slane %v6322_v48, 1  ;;  %v2221_v60 = vrot.slane %v7301_v46, 1  ;;  %v8217_v62 = vcombine.low %v1547_v52, %v1548_v53  ;;  %v7374_v22 = vld [vmem:[%s10948_s3 + $0x60] sm:$0xff]   ;;  %v7305_v2 = vld [vmem:[%s7934_s11 + $0x2c] ss:$0 sps:$4 sm:$0x11]  }
  0x52   : > { %v2436_v58 = vrot.slane %v2434_v40, 1  ;;  %v7377_v3 = vld [vmem:[%s10948_s3 + $0x20] sm:$0xff]   ;;  %6616 = vmatprep.subr.bf16.mxu0 %v7374_v22  ;;  %v6189_v13 = vld [vmem:[%s7934_s11 + $0x30] sm:$0xf]  ;;  %v1787_v15 = vshll.u32 %v7305_v2, 16  ;;  %v2065_v25 = vrot.slane %v2063_v63, 1 }
  0x53   : > { %v1778_v0 = vsel %vm546_vm0, %v1773_v49, %v1777_v28  ;;  %v1780_v5 = vshrl.u32 %v8217_v62, 16  ;;  %v1782_v7 = vshll.u32 %v8217_v62, 16  ;;  %v344_v16 = vld [vmem:[%s8224_s28] sm:$0xf]  ;;  %v2222_v18 = vsel %vm717_vm1, %v2220_v59, %v2221_v60  ;;  %v345_v23 = vld [vmem:[%s8224_s28 + $0x4] sm:$0xf] }
  0x54   : > { %2459 = vrot.lane.b32.xlu0 %v2430_v17, %s7786_s13  ;;  %v2437_v4 = vor.u32 %v2436_v58, %v2432_v12  ;;  %v6013_v33 = vld [vmem:[%s8224_s28 + $0xc] sm:$0xf]  ;;  %v8247_v30 = vcombine.low %v344_v16, %v345_v23  ;;  %v7309_v38 = vld [vmem:[%s8224_s28 + $0x8] ss:$0 sps:$4 sm:$0x11]   ;;  %6617 = vmatpush3.bf16.msra.mxu0 %v7377_v3  ;;  %v8252_v41 = vcombine.low %v6189_v13, %v8013_v61  ;;  %v7384_v13 = vld [vmem:[%s10948_s3 + $0x18] sm:$0xff]  }
  0x55   : > { %2239 = vrot.lane.b32.xlu1 %v2219_v31, %s7786_s13  ;;  %v1784_v21 = vrot.slane %v1782_v7, 1  ;;  %v1789_v31 = vrot.slane %v1787_v15, 1  ;;  %v8255_v14 = vld [vmem:[%s8224_s28 + $0x10] sm:$0xf]  ;;  %v1550_v12 = vld [vmem:[%s7934_s11 + $0x34] sm:$0xf]  ;;  %v8260_v34 = vsel %vm546_vm0, %v2061_v8, %v2065_v25 }
  0x56   : > { %v2442_v17 = vsel %vm546_vm0, %v2437_v4, %v2441_v50  ;;  %11043 = vst [vmem:[#allocation9_spill] sm:$0xff] %v8247_v30  ;;  %v1549_v28 = vld [vmem:[%s7934_s11 + $0x30] sm:$0xf]  ;;  %v548_v63 = vshrl.u32 %v8247_v30, 16  ;;  %v550_v40 = vshll.u32 %v8247_v30, 16  ;;  %v555_v46 = vshll.u32 %v7309_v38, 16 }
  0x57   : > { %v1785_v42 = vor.u32 %v1784_v21, %v1780_v5  ;;  %v8266_v48 = vcombine.low %v1549_v28, %v1550_v12  ;;  %v7312_v49 = vld [vmem:[%s7934_s11 + $0x38] ss:$0 sps:$4 sm:$0x11]   ;;  %v8275_v55 = vcombine.low %v6013_v33, %v8255_v14  ;;  %v6191_v58 = vld [vmem:[%s7934_s11 + $0x3c] sm:$0xf]  ;;  %v2068_v15 = vshrl.u32 %v8203_v32, 16 }
  0x58   : > { %1997 = vrot.lane.b32.xlu0 %v8203_v32, %s7786_s13  ;;  %v7380_v50 = vld [vmem:[%s10948_s3 + $0x58] sm:$0xff]   ;;  %v552_v52 = vrot.slane %v550_v40, 1  ;;  %v557_v53 = vrot.slane %v555_v46, 1  ;;  %v346_v22 = vld [vmem:[%s8224_s28 + $0xc] sm:$0xf]  ;;  %v1799_v3 = vshll.u32 %v7312_v49, 16 }
  0x59   : > { %1867 = vrot.lane.b32.xlu1 %v1778_v0, %s7786_s13  ;;  %v1790_v61 = vsel %vm546_vm0, %v1785_v42, %v1789_v31  ;;  %11044 = vst [vmem:[#allocation10_spill] sm:$0xff] %v8266_v48  ;;  %11045 = vst [vmem:[#allocation11_spill] sm:$0xff] %v8275_v55  ;;  %v1792_v59 = vshrl.u32 %v8266_v48, 16  ;;  %v1794_v60 = vshll.u32 %v8266_v48, 16  ;;  %6618 = vmatprep.subr.bf16.mxu0 %v7380_v50  ;;  %v2070_v0 = vshll.u32 %v8203_v32, 16  ;;  %v7391_v12 = vld [vmem:[%s10948_s3 + $0x10] sm:$0xff]  }
  0x5a   : > { %v553_v2 = vor.u32 %v552_v52, %v548_v63  ;;  %v347_v4 = vld [vmem:[%s8224_s28 + $0x10] sm:$0xf]  ;;  %v7316_v8 = vld [vmem:[%s8224_s28 + $0x14] ss:$0 sps:$4 sm:$0x11]   ;;  %6619 = vmatpush3.bf16.msra.mxu0 %v7384_v13  ;;  %v7394_v50 = vld [vmem:[%s10948_s3 + $0x48] sm:$0xff]  }
  0x5b   : > { %v1796_v5 = vrot.slane %v1794_v60, 1  ;;  %v8284_v7 = vcombine.low %v346_v22, %v347_v4  ;;  %v6015_v21 = vld [vmem:[%s8224_s28 + $0x18] sm:$0xf]  ;;  %v8297_v23 = vld [vmem:[%s8224_s28 + $0x1c] sm:$0xf]  ;;  %v567_v32 = vshll.u32 %v7316_v8, 16 }
  0x5c   : > { %2461 = vrot.lane.b32.xlu0 %v2442_v17, %s7786_s13  ;;  %v558_v16 = vsel %vm546_vm0, %v553_v2, %v557_v53  ;;  %v8293_v17 = vcombine.low %v6191_v58, %v8038_v27  ;;  %v1551_v38 = vld [vmem:[%s7934_s11 + $0x3c] sm:$0xf]  ;;  %v7388_v27 = vld [vmem:[%s10948_s3 + $0x50] sm:$0xff]   ;;  %v2072_v42 = vrot.slane %v2070_v0, 1  ;;  %v1552_v28 = vld [vmem:[%s7934_s11 + $0x40] sm:$0xf]  ;;  %v8320_v52 = vcombine.low %v6015_v21, %v8297_v23 }
  0x5d   : > { %2241 = vrot.lane.b32.xlu1 %v2222_v18, %s7786_s13  ;;  %11046 = vst [vmem:[#allocation12_spill] sm:$0xff] %v8284_v7  ;;  %v1801_v18 = vrot.slane %v1799_v3, 1  ;;  %v1797_v25 = vor.u32 %v1796_v5, %v1792_v59  ;;  %v560_v31 = vshrl.u32 %v8284_v7, 16  ;;  %v562_v33 = vshll.u32 %v8284_v7, 16  ;;  %6620 = vmatprep.subr.bf16.mxu0 %v7388_v27  ;;  %v6193_v58 = vld [vmem:[%s7934_s11 + $0x48] sm:$0xf] }
  0x5e   : > { %v569_v46 = vrot.slane %v567_v32, 1  ;;  %v7319_v49 = vld [vmem:[%s7934_s11 + $0x44] ss:$0 sps:$4 sm:$0x11]   ;;  %11048 = vst [vmem:[#allocation14_spill] sm:$0xff] %v8320_v52  ;;  %6621 = vmatpush3.bf16.msra.mxu0 %v7391_v12  ;;  %v7397_v0 = vld [vmem:[%s10948_s3 + $0x8] sm:$0xff]   ;;  %v2073_v4 = vor.u32 %v2072_v42, %v2068_v15  ;;  %v8345_v15 = vcombine.low %v6193_v58, %v8056_v45 }
  0x5f   : > { %v1802_v63 = vsel %vm546_vm0, %v1797_v25, %v1801_v18  ;;  %v564_v40 = vrot.slane %v562_v33, 1  ;;  %v1811_v22 = vshll.u32 %v7319_v49, 16  ;;  %v348_v2 = vld [vmem:[%s8224_s28 + $0x18] sm:$0xf]  ;;  %v349_v3 = vld [vmem:[%s8224_s28 + $0x1c] sm:$0xf]  ;;  %6622 = vmatprep.subr.bf16.mxu0 %v7394_v50 }
  0x60   : > { %1999 = vrot.lane.b32.xlu0 %v8252_v41, %s7786_s13  ;;  %v2075_v5 = vshll.u32 %v8007_v57, 16  ;;  %v6017_v18 = vld [vmem:[%s8224_s28 + $0x24] sm:$0xf]  ;;  %v8336_v21 = vcombine.low %v348_v2, %v349_v3  ;;  %v8339_v25 = vld [vmem:[%s8224_s28 + $0x28] sm:$0xf] }
  0x61   : > { %1869 = vrot.lane.b32.xlu1 %v1790_v61, %s7786_s13  ;;  %v8313_v61 = vcombine.low %v1551_v38, %v1552_v28  ;;  %v565_v53 = vor.u32 %v564_v40, %v560_v31  ;;  %v7323_v31 = vld [vmem:[%s8224_s28 + $0x20] ss:$0 sps:$4 sm:$0x11]   ;;  %v1553_v27 = vld [vmem:[%s7934_s11 + $0x48] sm:$0xf]  ;;  %v8361_v50 = vcombine.low %v6017_v18, %v8339_v25 }
  0x62   : > { %11049 = vst [vmem:[#allocation15_spill] sm:$0xff] %v8336_v21  ;;  %v2077_v33 = vrot.slane %v2075_v5, 1  ;;  %v572_v32 = vshrl.u32 %v8336_v21, 16  ;;  %v574_v38 = vshll.u32 %v8336_v21, 16  ;;  %v1554_v42 = vld [vmem:[%s7934_s11 + $0x4c] sm:$0xf]  ;;  %6623 = vmatpush3.bf16.msra.mxu0 %v7397_v0 }
  0x63   : > { %11047 = vst [vmem:[#allocation13_spill] sm:$0xff] %v8313_v61  ;;  %v1804_v59 = vshrl.u32 %v8313_v61, 16  ;;  %v1806_v60 = vshll.u32 %v8313_v61, 16  ;;  %v570_v8 = vsel %vm546_vm0, %v565_v53, %v569_v46  ;;  %v579_v28 = vshll.u32 %v7323_v31, 16  ;;  %11051 = vst [vmem:[#allocation17_spill] sm:$0xff] %v8361_v50 }
  0x64   : > { %798 = vrot.lane.b32.xlu0 %v8275_v55, %s7786_s13  ;;  %v8353_v40 = vcombine.low %v1553_v27, %v1554_v42  ;;  %v7326_v45 = vld [vmem:[%s7934_s11 + $0x50] ss:$0 sps:$4 sm:$0x11]   ;;  %v8357_v46 = vsel %vm546_vm0, %v2073_v4, %v2077_v33  ;;  %v6195_v58 = vld [vmem:[%s7934_s11 + $0x54] sm:$0xf]  ;;  %v2082_v4 = vshll.u32 %v8252_v41, 16 }
  0x65   : > { %667 = vrot.lane.b32.xlu1 %v558_v16, %s7786_s13  ;;  %v1808_v13 = vrot.slane %v1806_v60, 1  ;;  %v1813_v16 = vrot.slane %v1811_v22, 1  ;;  %v581_v53 = vrot.slane %v579_v28, 1  ;;  %v1823_v0 = vshll.u32 %v7326_v45, 16  ;;  %v350_v2 = vld [vmem:[%s8224_s28 + $0x24] sm:$0xf] }
  0x66   : > { %11050 = vst [vmem:[#allocation16_spill] sm:$0xff] %v8353_v40  ;;  %v1816_v60 = vshrl.u32 %v8353_v40, 16  ;;  %v1818_v22 = vshll.u32 %v8353_v40, 16  ;;  %v351_v5 = vld [vmem:[%s8224_s28 + $0x28] sm:$0xf]  ;;  %v8378_v33 = vcombine.low %v6195_v58, %v8082_v11  ;;  %v8390_v45 = vrot.slane %v2082_v4, 1 }
  0x67   : > { %v1809_v57 = vor.u32 %v1808_v13, %v1804_v59  ;;  %v8374_v18 = vcombine.low %v350_v2, %v351_v5  ;;  %v7330_v31 = vld [vmem:[%s8224_s28 + $0x2c] ss:$0 sps:$4 sm:$0x11]   ;;  %v8394_v11 = vld [vmem:[%s8224_s28 + $0x34] sm:$0xf]  ;;  %v2106_v55 = vshll.u32 %v8345_v15, 16 }
  0x68   : > { %2001 = vrot.lane.b32.xlu0 %v8293_v17, %s7786_s13  ;;  %v1820_v13 = vrot.slane %v1818_v22, 1  ;;  %v7333_v58 = vld [vmem:[%s7934_s11 + $0x5c] ss:$0 sps:$4 sm:$0x11]   ;;  %v6197_v4 = vld [vmem:[%s7934_s11 + $0x60] sm:$0xf] }
  0x69   : > { %1871 = vrot.lane.b32.xlu1 %v1802_v63, %s7786_s13  ;;  %v1814_v12 = vsel %vm546_vm0, %v1809_v57, %v1813_v16  ;;  %v576_v63 = vrot.slane %v574_v38, 1  ;;  %v1825_v16 = vrot.slane %v1823_v0, 1  ;;  %11052 = vst [vmem:[#allocation18_spill] sm:$0xff] %v8374_v18  ;;  %v6019_v57 = vld [vmem:[%s8224_s28 + $0x30] sm:$0xf]  ;;  %v584_v42 = vshrl.u32 %v8374_v18, 16 }
  0x6a   : > { %v1556_v38 = vld [vmem:[%s7934_s11 + $0x58] sm:$0xf]  ;;  %v1821_v27 = vor.u32 %v1820_v13, %v1816_v60  ;;  %v586_v28 = vshll.u32 %v8374_v18, 16  ;;  %v1835_v13 = vshll.u32 %v7333_v58, 16  ;;  %v7404_v58 = vld [vmem:[%s10948_s3] sm:$0xff]   ;;  %v8450_v18 = vrot.slane %v2106_v55, 1 }
  0x6b   : > { %v577_v59 = vor.u32 %v576_v63, %v572_v32  ;;  %v1555_v32 = vld [vmem:[%s7934_s11 + $0x54] sm:$0xf]  ;;  %v7402_v63 = vld [vmem:[%s10948_s3 + $0x40] sm:$0xff]   ;;  %v1560_v20 = vld [vmem:[%s7934_s11 + $0x70] sm:$0xf] }
  0x6c   : > { %800 = vrot.lane.b32.xlu0 %v8320_v52, %s7786_s13  ;;  %v1826_v60 = vsel %vm546_vm0, %v1821_v27, %v1825_v16  ;;  %v588_v22 = vrot.slane %v586_v28, 1  ;;  %6624 = vmatprep.subr.bf16.mxu0 %v7402_v63  ;;  %v863_v27 = vshll.u32 %v8320_v52, 16  ;;  %v7339_v63 = vld [vmem:[%s8224_s28 + $0x38] ss:$0 sps:$4 sm:$0x11]  }
  0x6d   : > { %669 = vrot.lane.b32.xlu1 %v570_v8, %s7786_s13  ;;  %v582_v8 = vsel %vm546_vm0, %v577_v59, %v581_v53  ;;  %v8396_v53 = vcombine.low %v1555_v32, %v1556_v38  ;;  %v2094_v59 = vshll.u32 %v8293_v17, 16  ;;  %v352_v32 = vld [vmem:[%s8224_s28 + $0x30] sm:$0xf]  ;;  %v353_v38 = vld [vmem:[%s8224_s28 + $0x34] sm:$0xf]  ;;  %6625 = vmatpush3.bf16.msra.mxu0 %v7404_v58 }
  0x6e   : > { %v589_v16 = vor.u32 %v588_v22, %v584_v42  ;;  %v1837_v22 = vrot.slane %v1835_v13, 1  ;;  %v1557_v2 = vld [vmem:[%s7934_s11 + $0x60] sm:$0xf]  ;;  %v1558_v3 = vld [vmem:[%s7934_s11 + $0x64] sm:$0xf]  ;;  %v8437_v13 = vrot.slane %v863_v27, 1 }
  0x6f   : > { %11053 = vst [vmem:[#allocation19_spill] sm:$0xff] %v8396_v53  ;;  %v1828_v5 = vshrl.u32 %v8396_v53, 16  ;;  %v8420_v49 = vrot.slane %v2094_v59, 1  ;;  %v8432_v59 = vcombine.low %v6197_v4, %v8110_v51  ;;  %v360_v30 = vld [vmem:[%s8224_s28 + $0x60] sm:$0xf] }
  0x70   : > { %2003 = vrot.lane.b32.xlu0 %v8345_v15, %s7786_s13  ;;  %11057 = vst [vmem:[#allocation23_spill] sm:$0xff] %v8437_v13  ;;  %v361_v40 = vld [vmem:[%s8224_s28 + $0x64] sm:$0xf]  ;;  %v6072_v48 = vld [vmem:[%s8224_s28 + $0x88] sm:$0xf] }
  0x71   : > { %1873 = vrot.lane.b32.xlu1 %v1814_v12, %s7786_s13  ;;  %v591_v12 = vshll.u32 %v7330_v31, 16  ;;  %v8408_v31 = vcombine.low %v6019_v57, %v8394_v11 }
  0x73   : > { %v593_v0 = vrot.slane %v591_v12, 1  ;;  %11054 = vst [vmem:[#allocation20_spill] sm:$0xff] %v8408_v31  ;;  %v8414_v12 = vcombine.low %v352_v32, %v353_v38  ;;  %v603_v38 = vshll.u32 %v7339_v63, 16 }
  0x74   : > { %802 = vrot.lane.b32.xlu0 %v8361_v50, %s7786_s13 }
  0x75   : > { %671 = vrot.lane.b32.xlu1 %v582_v8, %s7786_s13  ;;  %v1830_v8 = vshll.u32 %v8396_v53, 16  ;;  %11055 = vst [vmem:[#allocation21_spill] sm:$0xff] %v8414_v12  ;;  %v594_v42 = vsel %vm546_vm0, %v589_v16, %v593_v0  ;;  %v598_v32 = vshll.u32 %v8414_v12, 16  ;;  %v8434_v0 = vcombine.low %v1557_v2, %v1558_v3  ;;  %v6021_v16 = vld [vmem:[%s8224_s28 + $0x3c] sm:$0xf] }
  0x76   : > { %v605_v57 = vrot.slane %v603_v38, 1 }
  0x77   : > { %v1832_v28 = vrot.slane %v1830_v8, 1  ;;  %v596_v8 = vshrl.u32 %v8414_v12, 16  ;;  %11056 = vst [vmem:[#allocation22_spill] sm:$0xff] %v8434_v0  ;;  %v600_v63 = vrot.slane %v598_v32, 1  ;;  %v1840_v51 = vshrl.u32 %v8434_v0, 16 }
  0x78   : > { %2005 = vrot.lane.b32.xlu0 %v8378_v33, %s7786_s13  ;;  %v1842_v4 = vshll.u32 %v8434_v0, 16  ;;  %v354_v12 = vld [vmem:[%s8224_s28 + $0x3c] sm:$0xf] }
  0x79   : > { %1875 = vrot.lane.b32.xlu1 %v1826_v60, %s7786_s13  ;;  %v1833_v60 = vor.u32 %v1832_v28, %v1828_v5  ;;  %v7344_v5 = vld [vmem:[%s7934_s11 + $0x68] ss:$0 sps:$4 sm:$0x11]   ;;  %v8442_v28 = vld [vmem:[%s8224_s28 + $0x40] sm:$0xf]  ;;  %v601_v2 = vor.u32 %v600_v63, %v596_v8 }
  0x7a   : > { %v1847_v27 = vshll.u32 %v7344_v5, 16  ;;  %v6199_v8 = vld [vmem:[%s7934_s11 + $0x6c] sm:$0xf]  ;;  %v7350_v5 = vld [vmem:[%s8224_s28 + $0x44] ss:$0 sps:$4 sm:$0x11]  }
  0x7b   : > { %v1838_v58 = vsel %vm546_vm0, %v1833_v60, %v1837_v22  ;;  %v8455_v22 = vcombine.low %v6021_v16, %v8442_v28  ;;  %v1844_v60 = vrot.slane %v1842_v4, 1  ;;  %v606_v55 = vsel %vm546_vm0, %v601_v2, %v605_v57  ;;  %v1559_v16 = vld [vmem:[%s7934_s11 + $0x6c] sm:$0xf]  ;;  %v6023_v57 = vld [vmem:[%s8224_s28 + $0x48] sm:$0xf] }
  0x7c   : > { %804 = vrot.lane.b32.xlu0 %v8408_v31, %s7786_s13  ;;  %v1849_v38 = vrot.slane %v1847_v27, 1  ;;  %v615_v4 = vshll.u32 %v7350_v5, 16  ;;  %v7355_v2 = vld [vmem:[%s7934_s11 + $0x74] ss:$0 sps:$4 sm:$0x11]  }
  0x7d   : > { %673 = vrot.lane.b32.xlu1 %v594_v42, %s7786_s13  ;;  %v355_v42 = vld [vmem:[%s8224_s28 + $0x40] sm:$0xf]  ;;  %11058 = vst [vmem:[#allocation24_spill] sm:$0xff] %v8455_v22  ;;  %v1845_v63 = vor.u32 %v1844_v60, %v1840_v51  ;;  %v8479_v27 = vld [vmem:[%s8224_s28 + $0x4c] sm:$0xf] }
  0x7e   : > { %v8457_v32 = vcombine.low %v354_v12, %v355_v42  ;;  %v8468_v42 = vcombine.low %v1559_v16, %v1560_v20  ;;  %v617_v60 = vrot.slane %v615_v4, 1 }
  0x7f   : > { %v1850_v5 = vsel %vm546_vm0, %v1845_v63, %v1849_v38 }
  0x80   : > { %2007 = vrot.lane.b32.xlu0 %v8432_v59, %s7786_s13  ;;  %11059 = vst [vmem:[#allocation25_spill] sm:$0xff] %v8457_v32  ;;  %v608_v3 = vshrl.u32 %v8457_v32, 16  ;;  %v610_v0 = vshll.u32 %v8457_v32, 16  ;;  %11060 = vst [vmem:[#allocation26_spill] sm:$0xff] %v8468_v42  ;;  %v1854_v12 = vshll.u32 %v8468_v42, 16  ;;  %v1852_v16 = vshrl.u32 %v8468_v42, 16 }
  0x81   : > { %1877 = vrot.lane.b32.xlu1 %v1838_v58, %s7786_s13  ;;  %v8473_v58 = vcombine.low %v6199_v8, %v8156_v43  ;;  %v1859_v32 = vshll.u32 %v7355_v2, 16  ;;  %v875_v43 = vshll.u32 %v8361_v50, 16  ;;  %v6201_v8 = vld [vmem:[%s7934_s11 + $0x78] sm:$0xf]  ;;  %v356_v2 = vld [vmem:[%s8224_s28 + $0x48] sm:$0xf] }
  0x82   : > { %v612_v51 = vrot.slane %v610_v0, 1  ;;  %v1856_v21 = vrot.slane %v1854_v12, 1  ;;  %v2118_v0 = vshll.u32 %v8378_v33, 16  ;;  %v8497_v63 = vcombine.low %v6201_v8, %v8200_v36  ;;  %v8536_v42 = vld [vmem:[%s8224_s28 + $0x64] sm:$0xf] }
  0x83   : > { %v1861_v4 = vrot.slane %v1859_v32, 1  ;;  %v6025_v32 = vld [vmem:[%s8224_s28 + $0x54] sm:$0xf]  ;;  %v2142_v8 = vshll.u32 %v8473_v58, 16 }
  0x84   : > { %806 = vrot.lane.b32.xlu0 %v8455_v22, %s7786_s13  ;;  %v613_v20 = vor.u32 %v612_v51, %v608_v3  ;;  %v1857_v38 = vor.u32 %v1856_v21, %v1852_v16  ;;  %v2130_v51 = vshll.u32 %v8432_v59, 16  ;;  %v8508_v21 = vld [vmem:[%s8224_s28 + $0x58] sm:$0xf]  ;;  %v7376_v16 = vld [vmem:[%s8224_s28 + $0x50] ss:$0 sps:$4 sm:$0x11]  }
  0x85   : > { %675 = vrot.lane.b32.xlu1 %v606_v55, %s7786_s13  ;;  %v8490_v55 = vcombine.low %v6023_v57, %v8479_v27  ;;  %v887_v57 = vshll.u32 %v8408_v31, 16  ;;  %v8511_v36 = vcombine.low %v6025_v32, %v8508_v21  ;;  %v6027_v32 = vld [vmem:[%s8224_s28 + $0x60] sm:$0xf] }
  0x86   : > { %v618_v3 = vsel %vm546_vm0, %v613_v20, %v617_v60  ;;  %v1862_v12 = vsel %vm546_vm0, %v1857_v38, %v1861_v4  ;;  %v357_v60 = vld [vmem:[%s8224_s28 + $0x4c] sm:$0xf]  ;;  %v8521_v4 = vrot.slane %v2118_v0, 1  ;;  %v8532_v0 = vrot.slane %v2130_v51, 1  ;;  %v359_v51 = vld [vmem:[%s8224_s28 + $0x58] sm:$0xf] }
  0x87   : > { %11061 = vst [vmem:[#allocation27_spill] sm:$0xff] %v8490_v55  ;;  %11062 = vst [vmem:[#allocation28_spill] sm:$0xff] %v8511_v36  ;;  %v8517_v20 = vcombine.low %v356_v2, %v357_v60  ;;  %v8529_v2 = vrot.slane %v887_v57, 1  ;;  %v8539_v31 = vcombine.low %v6027_v32, %v8536_v42  ;;  %v8548_v60 = vrot.slane %v2142_v8, 1  ;;  %v7411_v22 = vld [vmem:[%s10947_s2 + $0x60] sm:$0xff]  }
  0x88   : > { %2009 = vrot.lane.b32.xlu0 %v8473_v58, %s7786_s13 }
  0x89   : > { %1879 = vrot.lane.b32.xlu1 %v1850_v5, %s7786_s13  ;;  %v8515_v5 = vrot.slane %v875_v43, 1  ;;  %11064 = vst [vmem:[#allocation30_spill] sm:$0xff] %v8517_v20  ;;  %v620_v38 = vshrl.u32 %v8517_v20, 16  ;;  %v627_v43 = vshll.u32 %v7376_v16, 16  ;;  %11065 = vst [vmem:[#allocation31_spill] sm:$0xff] %v8529_v2 }
  0x8a   : > { %11066 = vst [vmem:[#allocation32_spill] sm:$0xff] %v8539_v31  ;;  %v6043_v16 = vld [vmem:[%s8224_s28 + $0xc] sm:$0xe] }
  0x8b   : > { %11063 = vst [vmem:[#allocation29_spill] sm:$0xff] %v8515_v5 }
  0x8c   : > { %808 = vrot.lane.b32.xlu0 %v8490_v55, %s7786_s13 }
  0x8d   : > { %677 = vrot.lane.b32.xlu1 %v618_v3, %s7786_s13  ;;  %v629_v3 = vrot.slane %v627_v43, 1 }
  0x90   : > { %2011 = vrot.lane.b32.xlu0 %v8497_v63, %s7786_s13 }
  0x91   : > { %1881 = vrot.lane.b32.xlu1 %v1862_v12, %s7786_s13  ;;  %v622_v12 = vshll.u32 %v8517_v20, 16  ;;  %v358_v20 = vld [vmem:[%s8224_s28 + $0x54] sm:$0xf] }
  0x92   : > { %v8550_v5 = vcombine.low %v358_v20, %v359_v51  ;;  %v7369_v20 = vld [vmem:[%s10947_s2 + $0x38] sm:$0xff]  }
  0x93   : > { %v624_v7 = vrot.slane %v622_v12, 1  ;;  %v7383_v12 = vld [vmem:[%s8224_s28 + $0x5c] ss:$0 sps:$4 sm:$0x11]  }
  0x94   : > { %810 = vrot.lane.b32.xlu0 %v8511_v36, %s7786_s13  ;;  %11067 = vst [vmem:[#allocation33_spill] sm:$0xff] %v8550_v5  ;;  %v632_v8 = vshrl.u32 %v8550_v5, 16  ;;  %v639_v51 = vshll.u32 %v7383_v12, 16  ;;  %v6143_v12 = vcombine.low %v6043_v16, %v8255_v14  ;;  %v7385_v14 = vld [vmem:[%s10947_s2 + $0x30] sm:$0xff]   ;;  %v6051_v16 = vld [vmem:[%s8224_s28 + $0x6c] sm:$0xe] }
  0x95   : > { %v625_v2 = vor.u32 %v624_v7, %v620_v38  ;;  %v634_v38 = vshll.u32 %v8550_v5, 16  ;;  %v6044_v5 = vld [vmem:[%s8224_s28 + $0x18] sm:$0xe] }
  0x96   : > { %v641_v43 = vrot.slane %v639_v51, 1  ;;  %v8592_v51 = vld [vmem:[%s7934_s11 + $0x8] ss:$0 sps:$4 sm:$0x11]  }
  0x97   : > { %v630_v57 = vsel %vm546_vm0, %v625_v2, %v629_v3  ;;  %v8570_v2 = vld [vmem:[%s8224_s28 + $0x70] sm:$0xf]  ;;  %v636_v50 = vrot.slane %v634_v38, 1  ;;  %v7390_v38 = vld [vmem:[%s8224_s28 + $0x68] ss:$0 sps:$4 sm:$0x11]  }
  0x98   : > { %812 = vrot.lane.b32.xlu0 %v8539_v31, %s7786_s13  ;;  %679 = vrot.lane.b32.xlu1 %v630_v57, %s7786_s13  ;;  %v7614_v57 = vld [vmem:[%s7934_s11 + $0x38] ss:$0 sps:$4 sm:$0x11]  }
  0x99   : > { %v2087_v32 = vshll.u32 %v7614_v57, 16  ;;  %v637_v57 = vor.u32 %v636_v50, %v632_v8  ;;  %v651_v8 = vshll.u32 %v7390_v38, 16 }
  0x9b   : > { %v642_v50 = vsel %vm546_vm0, %v637_v57, %v641_v43  ;;  %v8603_v36 = vrot.slane %v2087_v32, 1  ;;  %v6052_v32 = vld [vmem:[%s8224_s28 + $0x78] sm:$0xe]  ;;  %v362_v57 = vld [vmem:[%s8224_s28 + $0x6c] sm:$0xf] }
  0x9c   : > { %681 = vrot.lane.b32.xlu1 %v642_v50, %s7786_s13  ;;  %v7396_v50 = vld [vmem:[%s8224_s28 + $0x74] ss:$0 sps:$4 sm:$0x11]  }
  0x9e   : > { %v2444_v53 = vpop.permute.xlu0 %2443 }
  0x9f   : > { %v2634_v7 = vsel %vm1328_vm2, %v7941_v9, %v2444_v53  ;;  %v2446_v3 = vpop.permute.xlu1 %2445  ;;  %v7381_v9 = vld [vmem:[%s10947_s2 + $0x70] sm:$0xff]   ;;  %v6029_v53 = vld [vmem:[%s8224_s28 + $0x6c] sm:$0xf] }
  0xa0   : > { %3126 = vmatprep.mubr.bf16.mxu1 %v2634_v7  ;;  %v8576_v13 = vcombine.low %v6029_v53, %v8570_v2  ;;  %v2637_v52 = vsel %vm1328_vm2, %v7957_v19, %v2446_v3  ;;  %v8595_v53 = vcombine.low %v360_v30, %v361_v40  ;;  %v8605_v19 = vrot.slane %v6143_v12, 1  ;;  %v363_v12 = vld [vmem:[%s8224_s28 + $0x70] sm:$0xf] }
  0xa1   : > { %v6144_v30 = vcombine.low %v6044_v5, %v8297_v23  ;;  %v653_v23 = vrot.slane %v651_v8, 1  ;;  %v7399_v5 = vld [vmem:[%s10947_s2 + $0x28] sm:$0xff]   ;;  %v7616_v8 = vld [vmem:[%s7934_s11 + $0x44] ss:$0 sps:$4 sm:$0x11]  }
  0xa2   : > { %11068 = vst [vmem:[#allocation34_spill] sm:$0xff] %v8576_v13  ;;  %v2224_v7 = vpop.permute.xlu0 %2223  ;;  %814 = vrot.lane.b32.xlu0 %v8576_v13, %s7786_s13  ;;  %11069 = vst [vmem:[#allocation35_spill] sm:$0xff] %v8595_v53  ;;  %v7398_v13 = vld [vmem:[%s10947_s2 + $0x68] sm:$0xff]   ;;  %v646_v40 = vshll.u32 %v8595_v53, 16 }
  0xa3   : > { %v2595_v31 = vsel %vm1328_vm2, %v8171_v56, %v2224_v7  ;;  %v2226_v3 = vpop.permute.xlu1 %2225  ;;  %v6031_v56 = vld [vmem:[%s8224_s28 + $0x78] sm:$0xf]  ;;  %v6032_v7 = vld [vmem:[%s8224_s28 + $0x7c] sm:$0xf]  ;;  %v8639_v61 = vrot.slane %v6144_v30, 1  ;;  %v7413_v30 = vld [vmem:[%s10947_s2 + $0x20] sm:$0xff]  }
  0xa4   : > { %3127 = vmatmul.mubr.bf16.vlgmr.msra.gmra.mxu1 %v2595_v31  ;;  %v8611_v31 = vcombine.low %v6031_v56, %v6032_v7  ;;  %v648_v55 = vrot.slane %v646_v40, 1  ;;  %v8626_v56 = vld [vmem:[%s10948_s3 + $0x118] sm:$0xff]   ;;  %v2099_v40 = vshll.u32 %v7616_v8, 16 }
  0xa5   : > { %6777 = vmatpush3.bf16.msra.mxu1 %v7369_v20  ;;  %3134 = vmatprep.mubr.bf16.mxu1 %v2637_v52  ;;  %v644_v52 = vshrl.u32 %v8595_v53, 16  ;;  %v6151_v20 = vcombine.low %v6051_v16, %v8570_v2  ;;  %v2599_v2 = vsel %vm1328_vm2, %v8260_v34, %v2226_v3  ;;  %v8630_v16 = vcombine.low %v362_v57, %v363_v12  ;;  %v6070_v57 = vld [vmem:[%s8224_s28 + $0x7c] sm:$0xf] }
  0xa6   : > { %6778 = vmatprep.subr.bf16.mxu1 %v7381_v9  ;;  %11070 = vst [vmem:[#allocation36_spill] sm:$0xff] %v8611_v31  ;;  %v2448_v43 = vpop.permute.xlu0 %2447  ;;  %816 = vrot.lane.b32.xlu0 %v8611_v31, %s7786_s13  ;;  %v6152_v9 = vcombine.low %v6052_v32, %v6032_v7  ;;  %v6069_v7 = vld [vmem:[%s8224_s28 + $0x78] sm:$0xf] }
  0xa7   : > { %v2228_v38 = vpop.permute.xlu1 %2227  ;;  %11071 = vst [vmem:[#allocation37_spill] sm:$0xff] %v8630_v16  ;;  %v649_v31 = vor.u32 %v648_v55, %v644_v52  ;;  %v2640_v53 = vsel %vm1328_vm2, %v7993_v47, %v2448_v43  ;;  %7082 = vmatprep.subr.bf16.mxu0 %v8626_v56  ;;  %v658_v3 = vshll.u32 %v8630_v16, 16  ;;  %v663_v55 = vshll.u32 %v7396_v50, 16 }
  0xa8   : > { %v1022_v52 = vrot.slane %v6151_v20, 1  ;;  %v7418_v20 = vld [vmem:[%s10947_s2 + $0x58] sm:$0xff]   ;;  %v8656_v12 = vcombine.low %v6069_v7, %v6070_v57  ;;  %v1571_v7 = vld [vmem:[%s7934_s11] sm:$0xe] }
  0xa9   : > { %6779 = vmatpush3.bf16.msra.mxu1 %v7385_v14  ;;  %v656_v14 = vshrl.u32 %v8630_v16, 16  ;;  %v660_v43 = vrot.slane %v658_v3, 1  ;;  %v665_v32 = vrot.slane %v663_v55, 1 }
  0xaa   : > { %6780 = vmatprep.subr.bf16.mxu1 %v7398_v13  ;;  %v2450_v34 = vpop.permute.xlu0 %2449  ;;  %v654_v13 = vsel %vm546_vm0, %v649_v31, %v653_v23  ;;  %11072 = vst [vmem:[#allocation38_spill] sm:$0xff] %v8656_v12  ;;  %v7401_v31 = vld [vmem:[%s8224_s28 + $0x80] ss:$0 sps:$4 sm:$0x11]   ;;  %v1025_v23 = vrot.slane %v6152_v9, 1  ;;  %v1225_v8 = vshrl.u32 %v8656_v12, 16  ;;  %v2603_v9 = vsel %vm1328_vm2, %v8357_v46, %v2228_v38 }
  0xab   : > { %v8644_v47 = vpop.permute.xlu1 %2229  ;;  %683 = vrot.lane.b32.xlu1 %v654_v13, %s7786_s13  ;;  %v1227_v3 = vshll.u32 %v8656_v12, 16  ;;  %v1232_v55 = vshll.u32 %v7401_v31, 16  ;;  %v7420_v13 = vld [vmem:[%s10947_s2 + $0x18] sm:$0xff]   ;;  %v6071_v31 = vld [vmem:[%s8224_s28 + $0x84] sm:$0xf] }
  0xac   : > { %3135 = vmatmul.mubr.bf16.gmra.mxu1 %v2599_v2  ;;  %v661_v2 = vor.u32 %v660_v43, %v656_v14  ;;  %v2643_v14 = vsel %vm1328_vm2, %v8017_v1, %v2450_v34  ;;  %v11073_v43 = vshrl.u32 %v8252_v41, 16  ;;  %v7617_v46 = vld [vmem:[%s7934_s11 + $0x4] sm:$0xf]  ;;  %v7425_v1 = vld [vmem:[%s10947_s2 + $0x50] sm:$0xff]   ;;  %v8685_v34 = vcombine.low %v6071_v31, %v6072_v48 }
  0xad   : > { %3142 = vmatprep.mubr.bf16.mxu1 %v2640_v53  ;;  %6781 = vmatpush3.bf16.msra.mxu1 %v7399_v5  ;;  %v7403_v5 = vld [vmem:[%s8224_s28 + $0x74] ss:$0 sps:$4 sm:$0x11]   ;;  %v1229_v12 = vrot.slane %v1227_v3, 1  ;;  %v1234_v16 = vrot.slane %v1232_v55, 1  ;;  %v6283_v38 = vcombine.low %v1571_v7, %v7617_v46 }
  0xae   : > { %6782 = vmatprep.subr.bf16.mxu1 %v7411_v22  ;;  %v8659_v50 = vpop.permute.xlu0 %2451  ;;  %v666_v22 = vsel %vm546_vm0, %v661_v2, %v665_v32  ;;  %v2085_v57 = vor.u32 %v8390_v45, %v11073_v43  ;;  %v1023_v35 = vrot.slane %v7403_v5, 1  ;;  %11074 = vst [vmem:[#allocation39_spill] sm:$0xff] %v8685_v34  ;;  %v7407_v41 = vld [vmem:[%s8224_s28 + $0x8c] ss:$0 sps:$4 sm:$0x11]   ;;  %v8688_v45 = vrot.slane %v2099_v40, 1 }
  0xaf   : > { %v8661_v53 = vpop.permute.xlu1 %2231  ;;  %685 = vrot.lane.b32.xlu1 %v666_v22, %s7786_s13  ;;  %v1230_v3 = vor.u32 %v1229_v12, %v1225_v8  ;;  %v7408_v55 = vld [vmem:[%s8224_s28 + $0x80] ss:$0 sps:$4 sm:$0x11]   ;;  %v8697_v5 = vld [vmem:[%s7934_s11 + $0x50] ss:$0 sps:$4 sm:$0x11]  }
  0xb0   : > { %v2111_v48 = vshll.u32 %v8697_v5, 16  ;;  %v2090_v40 = vsel %vm546_vm0, %v2085_v57, %v8603_v36  ;;  %v1239_v22 = vshll.u32 %v8685_v34, 16  ;;  %v1244_v7 = vshll.u32 %v7407_v41, 16  ;;  %v6053_v12 = vld [vmem:[%s8224_s28 + $0x18] sm:$0xf] }
  0xb1   : > { %6783 = vmatpush3.bf16.msra.mxu1 %v7413_v30  ;;  %v1024_v30 = vsel %vm717_vm1, %v1022_v52, %v1023_v35  ;;  %v7427_v35 = vld [vmem:[%s10947_s2 + $0x10] sm:$0xff]   ;;  %v1235_v52 = vsel %vm546_vm0, %v1230_v3, %v1234_v16  ;;  %v1913_v8 = vrot.slane %v6283_v38, 1  ;;  %v7410_v31 = vld [vmem:[%s8224_s28 + $0x20] ss:$0 sps:$4 sm:$0x11]   ;;  %v7432_v16 = vld [vmem:[%s10947_s2 + $0x48] sm:$0xff]  }
  0xb2   : > { %6784 = vmatprep.subr.bf16.mxu1 %v7418_v20  ;;  %v8690_v32 = vpop.permute.xlu0 %2453  ;;  %v1237_v20 = vshrl.u32 %v8685_v34, 16  ;;  %1264 = vrot.lane.b32.xlu0 %v1235_v52, %s7786_s13  ;;  %v1241_v36 = vrot.slane %v1239_v22, 1  ;;  %v1246_v43 = vrot.slane %v1244_v7, 1  ;;  %v8719_v46 = vld [vmem:[%s8224_s28 + $0x24] sm:$0xe]  ;;  %v7433_v3 = vld [vmem:[%s10947_s2 + $0x8] sm:$0xff]  }
  0xb3   : > { %v8692_v2 = vpop.permute.xlu1 %2233  ;;  %1044 = vrot.lane.b32.xlu1 %v1024_v30, %s7786_s13  ;;  %v1136_v7 = vshll.u32 %v7410_v31, 16  ;;  %v11076_v52 = vrot.slane %v8592_v51, 1  ;;  %v11115_v34 = vld [vmem:[#allocation31_spill] sm:$0xff] }
  0xb4   : > { %3143 = vmatmul.mubr.bf16.gmra.mxu1 %v2603_v9  ;;  %v1026_v9 = vrot.slane %v7408_v55, 1 }
  0xb5   : > { %3150 = vmatprep.mubr.bf16.mxu1 %v2643_v14  ;;  %v6054_v14 = vld [vmem:[%s8224_s28 + $0x1c] sm:$0xf]  ;;  %6785 = vmatpush3.bf16.msra.mxu1 %v7420_v13  ;;  %v2607_v13 = vsel %vm1328_vm2, %v2090_v40, %v8644_v47  ;;  %v1915_v47 = vsel %vm717_vm1, %v1913_v8, %v11076_v52  ;;  %v1572_v40 = vld [vmem:[%s7934_s11 + $0xc] sm:$0xe]  ;;  %v1138_v51 = vrot.slane %v1136_v7, 1 }
  0xb6   : > { %v8712_v57 = vcombine.low %v6053_v12, %v6054_v14  ;;  %6786 = vmatprep.subr.bf16.mxu1 %v7425_v1  ;;  %v1027_v41 = vsel %vm717_vm1, %v1025_v23, %v1026_v9  ;;  %v8729_v30 = vpop.permute.xlu0 %2455  ;;  %v1242_v1 = vor.u32 %v1241_v36, %v1237_v20  ;;  %v7412_v12 = vld [vmem:[%s8224_s28 + $0x14] ss:$0 sps:$4 sm:$0x11]   ;;  %v2646_v23 = vsel %vm1328_vm2, %v8035_v26, %v8659_v50  ;;  %v6055_v8 = vld [vmem:[%s8224_s28 + $0x24] sm:$0xf] }
  0xb7   : > { %v8721_v38 = vpop.permute.xlu1 %2235  ;;  %1046 = vrot.lane.b32.xlu1 %v1027_v41, %s7786_s13  ;;  %v11077_v20 = vshrl.u32 %v8293_v17, 16  ;;  %v999_v31 = vrot.slane %v7412_v12, 1  ;;  %v7440_v41 = vld [vmem:[%s10947_s2 + $0x40] sm:$0xff]   ;;  %v7619_v26 = vld [vmem:[%s7934_s11 + $0x10] sm:$0xf]  ;;  %v6145_v50 = vcombine.low %v8719_v46, %v8339_v25 }
  0xb8   : > { %11075 = vst [vmem:[#allocation40_spill] sm:$0xff] %v8712_v57  ;;  %v1129_v55 = vshrl.u32 %v8712_v57, 16  ;;  %v1131_v22 = vshll.u32 %v8712_v57, 16  ;;  %v1247_v14 = vsel %vm546_vm0, %v1242_v1, %v1246_v43  ;;  %v6284_v17 = vcombine.low %v1572_v40, %v7619_v26  ;;  %v7416_v7 = vld [vmem:[%s8224_s28 + $0x2c] ss:$0 sps:$4 sm:$0x11]  }
  0xb9   : > { %v2097_v9 = vor.u32 %v8420_v49, %v11077_v20  ;;  %6787 = vmatpush3.bf16.msra.mxu1 %v7427_v35  ;;  %1266 = vrot.lane.b32.xlu0 %v1247_v14, %s7786_s13  ;;  %v6056_v49 = vld [vmem:[%s8224_s28 + $0x28] sm:$0xf]  ;;  %v7442_v46 = vld [vmem:[%s10948_s3 + $0x110] sm:$0xff]   ;;  %v1573_v40 = vld [vmem:[%s7934_s11 + $0x18] sm:$0xe] }
  0xba   : > { %v1133_v36 = vrot.slane %v1131_v22, 1  ;;  %6788 = vmatprep.subr.bf16.mxu1 %v7432_v16  ;;  %v1994_v35 = vpop.permute.xlu0 %1993  ;;  %v1000_v22 = vsel %vm717_vm1, %v8605_v19, %v999_v31  ;;  %v8757_v16 = vcombine.low %v6055_v8, %v6056_v49  ;;  %v1916_v25 = vrot.slane %v6284_v17, 1  ;;  %v9211_v57 = vld [vmem:[%s7934_s11 + $0x44] ss:$0 sps:$4 sm:$0x11]  }
  0xbb   : > { %v1864_v43 = vpop.permute.xlu1 %1863  ;;  %v2555_v12 = vsel %vm1328_vm2, %v1915_v47, %v1994_v35  ;;  %1028 = vrot.lane.b32.xlu1 %v1000_v22, %s7786_s13  ;;  %v2102_v19 = vsel %vm546_vm0, %v2097_v9, %v8688_v45  ;;  %v7443_v45 = vld [vmem:[%s10947_s2] sm:$0xff]   ;;  %v7620_v9 = vld [vmem:[%s7934_s11 + $0x1c] sm:$0xf]  ;;  %v11079_v49 = vshrl.u32 %v8345_v15, 16  ;;  %v11081_v15 = vrot.slane %v8137_v24, 1 }
  0xbc   : > { %3151 = vmatmul.mubr.bf16.gmra.mxu1 %v2607_v13  ;;  %v1134_v1 = vor.u32 %v1133_v36, %v1129_v55  ;;  %11078 = vst [vmem:[#allocation41_spill] sm:$0xff] %v8757_v16  ;;  %v8761_v13 = vld [vmem:[%s8224_s28 + $0x20] ss:$0 sps:$4 sm:$0x11]   ;;  %v2524_v52 = vsel %vm1328_vm2, %v8098_v37, %v1864_v43  ;;  %3013 = vmatprep.mubr.bf16.mxu0 %v2555_v12  ;;  %v1141_v47 = vshrl.u32 %v8757_v16, 16  ;;  %v1143_v37 = vshll.u32 %v8757_v16, 16 }
  0xbd   : > { %3158 = vmatprep.mubr.bf16.mxu1 %v2646_v23  ;;  %6789 = vmatpush3.bf16.msra.mxu1 %v7433_v3  ;;  %v1148_v23 = vshll.u32 %v7416_v7, 16  ;;  %v8780_v3 = vld [vmem:[%s8224_s28 + $0x30] sm:$0xe]  ;;  %v1002_v20 = vrot.slane %v8761_v13, 1  ;;  %v6285_v14 = vcombine.low %v1573_v40, %v7620_v9  ;;  %v2109_v35 = vor.u32 %v8450_v18, %v11079_v49  ;;  %v8823_v24 = vld [vmem:[%s10947_s2 + $0xf8] sm:$0xff]  }
  0xbe   : > { %v1139_v55 = vsel %vm546_vm0, %v1134_v1, %v1138_v51  ;;  %6790 = vmatprep.subr.bf16.mxu1 %v7440_v41  ;;  %3014 = vmatmul.mubr.bf16.vlgmr.msra.gmra.mxu0 %v2524_v52  ;;  %v8786_v36 = vld [vmem:[%s7934_s11 + $0x20] ss:$0 sps:$4 sm:$0x11]   ;;  %v8789_v31 = vpop.permute.xlu0 %2457  ;;  %v2611_v41 = vsel %vm1328_vm2, %v2102_v19, %v8661_v53  ;;  %v1145_v26 = vrot.slane %v1143_v37, 1  ;;  %v6057_v43 = vld [vmem:[%s8224_s28 + $0x30] sm:$0xf]  ;;  %v2649_v7 = vsel %vm1328_vm2, %v8053_v44, %v8690_v32 }
  0xbf   : > { %1248 = vrot.lane.b32.xlu0 %v1139_v55, %s7786_s13  ;;  %v1920_v51 = vrot.slane %v8786_v36, 1  ;;  %v8791_v8 = vpop.permute.xlu1 %2237  ;;  %v1150_v17 = vrot.slane %v1148_v23, 1  ;;  %v6058_v1 = vld [vmem:[%s8224_s28 + $0x34] sm:$0xf]  ;;  %7083 = vmatpush3.bf16.msra.mxu0 %v8626_v56  ;;  %v1003_v22 = vsel %vm717_vm1, %v8639_v61, %v1002_v20  ;;  %v2113_v53 = vrot.slane %v2111_v48, 1 }
  0xc0   : > { %v8808_v12 = vcombine.low %v6057_v43, %v6058_v1  ;;  %v7422_v52 = vld [vmem:[%s8224_s28 + $0x38] ss:$0 sps:$4 sm:$0x11]   ;;  %7084 = vmatprep.subr.bf16.mxu0 %v7442_v46  ;;  %v1918_v18 = vsel %vm717_vm1, %v1916_v25, %v11081_v15  ;;  %v1146_v56 = vor.u32 %v1145_v26, %v1141_v47  ;;  %1030 = vrot.lane.b32.xlu1 %v1003_v22, %s7786_s13  ;;  %v8816_v61 = vld [vmem:[%s8224_s28 + $0x2c] ss:$0 sps:$4 sm:$0x11]  }
  0xc1   : > { %6791 = vmatpush3.bf16.msra.mxu1 %v7443_v45  ;;  %v1004_v19 = vrot.slane %v6145_v50, 1  ;;  %v1919_v44 = vrot.slane %v6285_v14, 1  ;;  %v1160_v48 = vshll.u32 %v7422_v52, 16  ;;  %v6146_v25 = vcombine.low %v8780_v3, %v8394_v11  ;;  %v7622_v37 = vld [vmem:[%s7934_s11 + $0x5c] ss:$0 sps:$4 sm:$0x11]  }
  0xc2   : > { %11080 = vst [vmem:[#allocation42_spill] sm:$0xff] %v8808_v12  ;;  %v1153_v32 = vshrl.u32 %v8808_v12, 16  ;;  %v1155_v5 = vshll.u32 %v8808_v12, 16  ;;  %v1996_v55 = vpop.permute.xlu0 %1995  ;;  %v1151_v47 = vsel %vm546_vm0, %v1146_v56, %v1150_v17  ;;  %v1005_v50 = vrot.slane %v8816_v61, 1  ;;  %7162 = vmatprep.subr.bf16.mxu1 %v8823_v24  ;;  %v6047_v9 = vld [vmem:[%s8224_s28 + $0x3c] sm:$0xe] }
  0xc3   : > { %v2123_v23 = vshll.u32 %v7622_v37, 16  ;;  %7085 = vmatpush3.bf16.msra.mxu0 %v7442_v46  ;;  %v1866_v40 = vpop.permute.xlu1 %1865  ;;  %v2559_v45 = vsel %vm1328_vm2, %v1918_v18, %v1996_v55  ;;  %1250 = vrot.lane.b32.xlu0 %v1151_v47, %s7786_s13  ;;  %v2114_v20 = vsel %vm546_vm0, %v2109_v35, %v2113_v53  ;;  %v1162_v3 = vrot.slane %v1160_v48, 1  ;;  %v1574_v36 = vld [vmem:[%s7934_s11 + $0x24] sm:$0xe]  ;;  %v6059_v26 = vld [vmem:[%s8224_s28 + $0x3c] sm:$0xf] }
  0xc4   : > { %3159 = vmatmul.mubr.bf16.gmra.mxu1 %v2611_v41  ;;  %v1157_v11 = vrot.slane %v1155_v5, 1  ;;  %3021 = vmatprep.mubr.bf16.mxu0 %v2559_v45  ;;  %v2527_v46 = vsel %vm1328_vm2, %v8141_v29, %v1866_v40  ;;  %v1006_v14 = vsel %vm717_vm1, %v1004_v19, %v1005_v50  ;;  %v8842_v17 = vld [vmem:[%s8224_s28 + $0x40] sm:$0xf]  ;;  %v2615_v35 = vsel %vm1328_vm2, %v2114_v20, %v8692_v2  ;;  %v8858_v53 = vld [vmem:[%s8224_s28 + $0x48] sm:$0xe] }
  0xc5   : > { %3166 = vmatprep.mubr.bf16.mxu1 %v2649_v7  ;;  %1032 = vrot.lane.b32.xlu1 %v1006_v14, %s7786_s13  ;;  %v11082_v43 = vshrl.u32 %v8378_v33, 16  ;;  %v2125_v1 = vrot.slane %v2123_v23, 1  ;;  %v8852_v22 = vcombine.low %v6059_v26, %v8842_v17  ;;  %v8855_v7 = vld [vmem:[%s8224_s28 + $0x44] ss:$0 sps:$4 sm:$0x11]   ;;  %v1921_v15 = vsel %vm717_vm1, %v1919_v44, %v1920_v51 }
  0xc6   : > { %3022 = vmatmul.mubr.bf16.gmra.mxu0 %v2527_v46  ;;  %v1158_v41 = vor.u32 %v1157_v11, %v1153_v32  ;;  %v8844_v49 = vpop.permute.xlu0 %2459  ;;  %v2652_v33 = vsel %vm1328_vm2, %v8079_v10, %v8729_v30  ;;  %v8868_v2 = vld [vmem:[%s8224_s28 + $0x38] ss:$0 sps:$4 sm:$0x11]   ;;  %v7623_v56 = vld [vmem:[%s7934_s11 + $0x28] sm:$0xf]  ;;  %v1172_v51 = vshll.u32 %v8855_v7, 16  ;;  %v6147_v44 = vcombine.low %v6047_v9, %v8442_v28 }
  0xc7   : > { %v2121_v29 = vor.u32 %v8521_v4, %v11082_v43  ;;  %11083 = vst [vmem:[#allocation43_spill] sm:$0xff] %v8852_v22  ;;  %v8860_v52 = vpop.permute.xlu1 %2239  ;;  %v1007_v4 = vrot.slane %v6146_v25, 1  ;;  %v6286_v19 = vcombine.low %v1574_v36, %v7623_v56  ;;  %v1165_v32 = vshrl.u32 %v8852_v22, 16  ;;  %v1575_v37 = vld [vmem:[%s7934_s11 + $0x30] sm:$0xe] }
  0xc8   : > { %v1163_v18 = vsel %vm546_vm0, %v1158_v41, %v1162_v3  ;;  %v1167_v5 = vshll.u32 %v8852_v22, 16  ;;  %v11084_v48 = vshll.u32 %v8497_v63, 16  ;;  %v1008_v30 = vrot.slane %v8868_v2, 1  ;;  %v7624_v20 = vld [vmem:[%s7934_s11 + $0x2c] ss:$0 sps:$4 sm:$0x11]  }
  0xc9   : > { %1252 = vrot.lane.b32.xlu0 %v1163_v18, %s7786_s13  ;;  %v2126_v55 = vsel %vm546_vm0, %v2121_v29, %v2125_v1  ;;  %v1174_v50 = vrot.slane %v1172_v51, 1  ;;  %v11085_v23 = vshrl.u32 %v8432_v59, 16  ;;  %v1923_v11 = vrot.slane %v7624_v20, 1  ;;  %v7625_v9 = vld [vmem:[%s7934_s11 + $0x68] ss:$0 sps:$4 sm:$0x11]  }
  0xca   : > { %v8878_v10 = vrot.slane %v11084_v48, 1  ;;  %v1998_v25 = vpop.permute.xlu0 %1997  ;;  %v1169_v47 = vrot.slane %v1167_v5, 1  ;;  %v1009_v3 = vsel %vm717_vm1, %v1007_v4, %v1008_v30  ;;  %v2135_v46 = vshll.u32 %v7625_v9, 16  ;;  %v6061_v14 = vld [vmem:[%s8224_s28 + $0x48] sm:$0xf] }
  0xcb   : > { %v2133_v28 = vor.u32 %v8532_v0, %v11085_v23  ;;  %v1868_v40 = vpop.permute.xlu1 %1867  ;;  %v2563_v45 = vsel %vm1328_vm2, %v1921_v15, %v1998_v25  ;;  %v8892_v36 = vld [vmem:[%s8224_s28 + $0x4c] sm:$0xf]  ;;  %v6148_v59 = vcombine.low %v8858_v53, %v8479_v27  ;;  %v1922_v41 = vrot.slane %v6286_v19, 1  ;;  %1034 = vrot.lane.b32.xlu1 %v1009_v3, %s7786_s13  ;;  %v7626_v18 = vld [vmem:[%s7934_s11 + $0x34] sm:$0xf] }
  0xcc   : > { %3167 = vmatmul.mubr.bf16.gmra.mxu1 %v2615_v35  ;;  %3029 = vmatprep.mubr.bf16.mxu0 %v2563_v45  ;;  %v2530_v0 = vsel %vm1328_vm2, %v8178_v6, %v1868_v40  ;;  %v1170_v26 = vor.u32 %v1169_v47, %v1165_v32  ;;  %v8900_v35 = vld [vmem:[%s8224_s28 + $0x50] ss:$0 sps:$4 sm:$0x11]   ;;  %v2619_v43 = vsel %vm1328_vm2, %v2126_v55, %v8721_v38  ;;  %v8911_v6 = vld [vmem:[%s8224_s28 + $0x44] ss:$0 sps:$4 sm:$0x11]  }
  0xcd   : > { %3174 = vmatprep.mubr.bf16.mxu1 %v2652_v33  ;;  %v2655_v27 = vsel %vm1328_vm2, %v8112_v54, %v8789_v31  ;;  %v8908_v29 = vcombine.low %v6061_v14, %v8892_v36  ;;  %v1010_v1 = vrot.slane %v6147_v44, 1  ;;  %v6287_v33 = vcombine.low %v1575_v37, %v7626_v18  ;;  %v8918_v4 = vld [vmem:[%s7934_s11 + $0x38] ss:$0 sps:$4 sm:$0x11]   ;;  %v6063_v31 = vld [vmem:[%s8224_s28 + $0x54] sm:$0xf] }
  0xce   : > { %3030 = vmatmul.mubr.bf16.gmra.mxu0 %v2530_v0  ;;  %v8913_v53 = vpop.permute.xlu0 %2461  ;;  %v1175_v15 = vsel %vm546_vm0, %v1170_v26, %v1174_v50  ;;  %v1926_v38 = vrot.slane %v8918_v4, 1  ;;  %v1184_v54 = vshll.u32 %v8900_v35, 16  ;;  %v6049_v56 = vld [vmem:[%s8224_s28 + $0x54] sm:$0xe]  ;;  %v2137_v32 = vrot.slane %v2135_v46, 1 }
  0xcf   : > { %11086 = vst [vmem:[#allocation44_spill] sm:$0xff] %v8908_v29  ;;  %v8924_v19 = vpop.permute.xlu1 %2241  ;;  %1254 = vrot.lane.b32.xlu0 %v1175_v15, %s7786_s13  ;;  %v1177_v5 = vshrl.u32 %v8908_v29, 16  ;;  %v1179_v51 = vshll.u32 %v8908_v29, 16  ;;  %v1011_v44 = vrot.slane %v8911_v6, 1  ;;  %v8931_v48 = vld [vmem:[%s8224_s28 + $0x58] sm:$0xf]  ;;  %v1924_v30 = vsel %vm717_vm1, %v1922_v41, %v1923_v11 }
  0xd0   : > { %v7628_v25 = vld [vmem:[%s7934_s11 + $0x74] ss:$0 sps:$4 sm:$0x11]   ;;  %v8936_v47 = vcombine.low %v6063_v31, %v8931_v48  ;;  %v8939_v50 = vld [vmem:[%s8224_s28 + $0x5c] ss:$0 sps:$4 sm:$0x11]   ;;  %v2138_v41 = vsel %vm546_vm0, %v2133_v28, %v2137_v32 }
  0xd1   : > { %v2147_v55 = vshll.u32 %v7628_v25, 16  ;;  %v1181_v37 = vrot.slane %v1179_v51, 1  ;;  %v1186_v23 = vrot.slane %v1184_v54, 1  ;;  %v1012_v40 = vsel %vm717_vm1, %v1010_v1, %v1011_v44  ;;  %v1576_v45 = vld [vmem:[%s7934_s11 + $0x3c] sm:$0xe] }
  0xd2   : > { %11087 = vst [vmem:[#allocation45_spill] sm:$0xff] %v8936_v47  ;;  %v2000_v20 = vpop.permute.xlu0 %1999  ;;  %v1925_v3 = vrot.slane %v6287_v33, 1  ;;  %1036 = vrot.lane.b32.xlu1 %v1012_v40, %s7786_s13  ;;  %v1189_v11 = vshrl.u32 %v8936_v47, 16  ;;  %v1191_v9 = vshll.u32 %v8936_v47, 16  ;;  %v1196_v46 = vshll.u32 %v8939_v50, 16 }
  0xd3   : > { %v1870_v14 = vpop.permute.xlu1 %1869  ;;  %v2567_v0 = vsel %vm1328_vm2, %v1924_v30, %v2000_v20  ;;  %v1182_v26 = vor.u32 %v1181_v37, %v1177_v5  ;;  %v6149_v1 = vcombine.low %v6049_v56, %v8508_v21  ;;  %v8956_v4 = vld [vmem:[%s8224_s28 + $0x60] sm:$0xe]  ;;  %v2149_v54 = vrot.slane %v2147_v55, 1  ;;  %v8971_v30 = vld [vmem:[%s8224_s28 + $0x64] sm:$0xf] }
  0xd4   : > { %3175 = vmatmul.mubr.bf16.gmra.mxu1 %v2619_v43  ;;  %v8950_v43 = vld [vmem:[%s8224_s28 + $0x50] ss:$0 sps:$4 sm:$0x11]   ;;  %3037 = vmatprep.mubr.bf16.mxu0 %v2567_v0  ;;  %v2533_v15 = vsel %vm1328_vm2, %v8217_v62, %v1870_v14  ;;  %v1193_v18 = vrot.slane %v1191_v9, 1  ;;  %v1198_v33 = vrot.slane %v1196_v46, 1  ;;  %v2623_v21 = vsel %vm1328_vm2, %v2138_v41, %v8791_v8 }
  0xd5   : > { %3182 = vmatprep.mubr.bf16.mxu1 %v2655_v27  ;;  %v1013_v27 = vrot.slane %v6148_v59, 1  ;;  %v1187_v28 = vsel %vm546_vm0, %v1182_v26, %v1186_v23  ;;  %v1014_v31 = vrot.slane %v8950_v43, 1  ;;  %v7629_v62 = vld [vmem:[%s7934_s11 + $0x40] sm:$0xf]  ;;  %v11088_v32 = vshrl.u32 %v8473_v58, 16 }
  0xd6   : > { %3038 = vmatmul.mubr.bf16.gmra.mxu0 %v2533_v15  ;;  %v8960_v59 = vpop.permute.xlu0 %798  ;;  %1256 = vrot.lane.b32.xlu0 %v1187_v28, %s7786_s13  ;;  %v6288_v56 = vcombine.low %v1576_v45, %v7629_v62  ;;  %v1194_v51 = vor.u32 %v1193_v18, %v1189_v11  ;;  %v6065_v44 = vld [vmem:[%s8224_s28 + $0x60] sm:$0xf]  ;;  %v2658_v8 = vsel %vm1328_vm2, %v8149_v39, %v8844_v49  ;;  %v7630_v55 = vld [vmem:[%s7934_s11 + $0x44] ss:$0 sps:$4 sm:$0x11]   ;;  %v1016_v11 = vrot.slane %v6149_v1, 1 }
  0xd7   : > { %v2145_v5 = vor.u32 %v8548_v60, %v11088_v32  ;;  %v8973_v25 = vpop.permute.xlu1 %667  ;;  %v1929_v37 = vrot.slane %v7630_v55, 1  ;;  %v1015_v23 = vsel %vm717_vm1, %v1013_v27, %v1014_v31  ;;  %v8981_v40 = vcombine.low %v6065_v44, %v8971_v30  ;;  %v8984_v58 = vld [vmem:[%s8224_s28 + $0x68] ss:$0 sps:$4 sm:$0x11]   ;;  %v374_v39 = vld [vmem:[%s8224_s28] sm:$0xe] }
  0xd8   : > { %v1927_v60 = vsel %vm717_vm1, %v1925_v3, %v1926_v38  ;;  %v1199_v45 = vsel %vm546_vm0, %v1194_v51, %v1198_v33  ;;  %1038 = vrot.lane.b32.xlu1 %v1015_v23, %s7786_s13  ;;  %v8990_v20 = vld [vmem:[%s8224_s28 + $0x5c] ss:$0 sps:$4 sm:$0x11]   ;;  %v6150_v49 = vcombine.low %v8956_v4, %v8536_v42  ;;  %v1208_v38 = vshll.u32 %v8984_v58, 16  ;;  %v7458_v3 = vld [vmem:[%s10948_s3 + $0x108] sm:$0xff]   ;;  %v11090_v31 = vld [vmem:[#allocation10_spill] sm:$0xff] }
  0xd9   : > { %11089 = vst [vmem:[#allocation46_spill] sm:$0xff] %v8981_v40  ;;  %v1201_v9 = vshrl.u32 %v8981_v40, 16  ;;  %v1203_v46 = vshll.u32 %v8981_v40, 16  ;;  %v1928_v0 = vrot.slane %v6288_v56, 1  ;;  %v2150_v41 = vsel %vm546_vm0, %v2145_v5, %v2149_v54  ;;  %v7632_v4 = vld [vmem:[%s8224_s28 + $0x4] sm:$0xf]  ;;  %7086 = vmatprep.subr.bf16.mxu0 %v7458_v3 }
  0xda   : > { %v2002_v14 = vpop.permute.xlu0 %2001  ;;  %1258 = vrot.lane.b32.xlu0 %v1199_v45, %s7786_s13  ;;  %v7631_v42 = vld [vmem:[%s7934_s11 + $0x80] ss:$0 sps:$4 sm:$0x11]   ;;  %v1017_v27 = vrot.slane %v8990_v20, 1  ;;  %v1210_v33 = vrot.slane %v1208_v38, 1  ;;  %v6113_v28 = vcombine.low %v374_v39, %v7632_v4  ;;  %7087 = vmatpush3.bf16.msra.mxu0 %v7458_v3  ;;  %v11092_v51 = vshrl.u32 %v8497_v63, 16 }
  0xdb   : > { %v2159_v26 = vshll.u32 %v7631_v42, 16  ;;  %v1872_v1 = vpop.permute.xlu1 %1871  ;;  %v2571_v15 = vsel %vm1328_vm2, %v1927_v60, %v2002_v14  ;;  %v1205_v18 = vrot.slane %v1203_v46, 1  ;;  %v6067_v56 = vld [vmem:[%s8224_s28 + $0x6c] sm:$0xf]  ;;  %v11091_v32 = vld [vmem:[#allocation8_spill] sm:$0xff]  ;;  %v1930_v60 = vsel %vm717_vm1, %v1928_v0, %v1929_v37 }
  0xdc   : > { %3183 = vmatmul.mubr.bf16.gmra.mxu1 %v2623_v21  ;;  %3045 = vmatprep.mubr.bf16.mxu0 %v2571_v15  ;;  %v2536_v54 = vsel %vm1328_vm2, %v11090_v31, %v1872_v1  ;;  %v1577_v21 = vld [vmem:[%s7934_s11 + $0x48] sm:$0xe]  ;;  %v1018_v62 = vsel %vm717_vm1, %v1016_v11, %v1017_v27  ;;  %v2661_v5 = vsel %vm1328_vm2, %v11091_v32, %v8913_v53  ;;  %v9020_v55 = vld [vmem:[%s8224_s28 + $0x70] sm:$0xf]  ;;  %v1019_v37 = vrot.slane %v6150_v49, 1  ;;  %v7464_v27 = vld [vmem:[%s10948_s3 + $0x100] sm:$0xff]  }
  0xdd   : > { %3190 = vmatprep.mubr.bf16.mxu1 %v2658_v8  ;;  %v2157_v44 = vor.u32 %v8878_v10, %v11092_v51  ;;  %v1206_v8 = vor.u32 %v1205_v18, %v1201_v9  ;;  %1040 = vrot.lane.b32.xlu1 %v1018_v62, %s7786_s13  ;;  %v2627_v45 = vsel %vm1328_vm2, %v2150_v41, %v8860_v52  ;;  %v2161_v11 = vrot.slane %v2159_v26, 1  ;;  %v9031_v53 = vld [vmem:[%s8224_s28 + $0x74] ss:$0 sps:$4 sm:$0x11]   ;;  %v7634_v14 = vld [vmem:[%s7934_s11 + $0x4c] sm:$0xf] }
  0xde   : > { %3046 = vmatmul.mubr.bf16.gmra.mxu0 %v2536_v54  ;;  %v9022_v23 = vpop.permute.xlu0 %800  ;;  %v9028_v63 = vcombine.low %v6067_v56, %v9020_v55  ;;  %v718_v9 = vrot.slane %v6113_v28, 1  ;;  %v7633_v46 = vld [vmem:[%s8224_s28 + $0x8] ss:$0 sps:$4 sm:$0x11]   ;;  %v6289_v52 = vcombine.low %v1577_v21, %v7634_v14  ;;  %v1220_v42 = vshll.u32 %v9031_v53, 16  ;;  %7088 = vmatprep.subr.bf16.mxu0 %v7464_v27  ;;  %v11097_v14 = vld [vmem:[#allocation27_spill] sm:$0xff] }
  0xdf   : > { %v9033_v10 = vpop.permute.xlu1 %669  ;;  %v1211_v39 = vsel %vm546_vm0, %v1206_v8, %v1210_v33  ;;  %v719_v38 = vrot.slane %v7633_v46, 1  ;;  %v9038_v3 = vld [vmem:[%s8224_s28 + $0x68] ss:$0 sps:$4 sm:$0x11]   ;;  %v375_v26 = vld [vmem:[%s8224_s28 + $0xc] sm:$0xe]  ;;  %v2162_v54 = vsel %vm546_vm0, %v2157_v44, %v2161_v11  ;;  %7089 = vmatpush3.bf16.msra.mxu0 %v7464_v27 }
  0xe0   : > { %11093 = vst [vmem:[#allocation10_spill] sm:$0xff] %v9028_v63  ;;  %1260 = vrot.lane.b32.xlu0 %v1211_v39, %s7786_s13  ;;  %v1213_v0 = vshrl.u32 %v9028_v63, 16  ;;  %v1215_v41 = vshll.u32 %v9028_v63, 16  ;;  %v7635_v1 = vld [vmem:[%s7934_s11 + $0x50] ss:$0 sps:$4 sm:$0x11]   ;;  %6852 = vmatprep.subr.bf16.mxu0 %v8823_v24 }
  0xe1   : > { %v1932_v15 = vrot.slane %v7635_v1, 1  ;;  %v1020_v49 = vrot.slane %v9038_v3, 1  ;;  %v1222_v4 = vrot.slane %v1220_v42, 1  ;;  %v720_v21 = vsel %vm717_vm1, %v718_v9, %v719_v38  ;;  %v11094_v56 = vld [vmem:[#allocation13_spill] sm:$0xff]  ;;  %v11095_v9 = vld [vmem:[#allocation24_spill] sm:$0xff] }
  0xe2   : > { %v2004_v18 = vpop.permute.xlu0 %2003  ;;  %v1217_v33 = vrot.slane %v1215_v41, 1  ;;  %v1931_v51 = vrot.slane %v6289_v52, 1  ;;  %v11096_v38 = vshll.u32 %v11095_v9, 16  ;;  %v1361_v41 = vsel %vm1328_vm2, %v720_v21, %v8960_v59  ;;  %v7637_v24 = vld [vmem:[%s7934_s11 + $0x58] sm:$0xf]  ;;  %v11106_v63 = vld [vmem:[#allocation17_spill] sm:$0xff] }
  0xe3   : > { %v1874_v28 = vpop.permute.xlu1 %1873  ;;  %v2575_v31 = vsel %vm1328_vm2, %v1930_v60, %v2004_v18  ;;  %v1021_v62 = vsel %vm717_vm1, %v1019_v37, %v1020_v49  ;;  %v2631_v60 = vsel %vm1328_vm2, %v2162_v54, %v8924_v19  ;;  %v7638_v27 = vld [vmem:[%s8224_s28 + $0x14] ss:$0 sps:$4 sm:$0x11]   ;;  %v11098_v49 = vshll.u32 %v11097_v14, 16  ;;  %v376_v59 = vld [vmem:[%s8224_s28 + $0x18] sm:$0xe] }
  0xe4   : > { %3191 = vmatmul.mubr.bf16.gmra.mxu1 %v2627_v45  ;;  %3053 = vmatprep.mubr.bf16.mxu0 %v2575_v31  ;;  %v2539_v32 = vsel %vm1328_vm2, %v11094_v56, %v1874_v28  ;;  %v1218_v8 = vor.u32 %v1217_v33, %v1213_v0  ;;  %v7636_v45 = vld [vmem:[%s8224_s28 + $0x10] sm:$0xf]  ;;  %v9069_v37 = vrot.slane %v11096_v38, 1  ;;  %v1933_v19 = vsel %vm717_vm1, %v1931_v51, %v1932_v15  ;;  %v11099_v33 = vld [vmem:[#allocation28_spill] sm:$0xff]  ;;  %v11108_v40 = vld [vmem:[#allocation29_spill] sm:$0xff] }
  0xe5   : > { %3198 = vmatprep.mubr.bf16.mxu1 %v2661_v5  ;;  %v1578_v5 = vld [vmem:[%s7934_s11 + $0x54] sm:$0xe]  ;;  %1042 = vrot.lane.b32.xlu1 %v1021_v62, %s7786_s13  ;;  %v6114_v39 = vcombine.low %v375_v26, %v7636_v45  ;;  %v722_v1 = vrot.slane %v7638_v27, 1  ;;  %v9082_v18 = vrot.slane %v11098_v49, 1  ;;  %v1579_v15 = vld [vmem:[%s7934_s11 + $0x60] sm:$0xe] }
  0xe6   : > { %3054 = vmatmul.mubr.bf16.gmra.mxu0 %v2539_v32  ;;  %v9060_v44 = vpop.permute.xlu0 %802  ;;  %v1223_v11 = vsel %vm546_vm0, %v1218_v8, %v1222_v4  ;;  %v6290_v42 = vcombine.low %v1578_v5, %v7637_v24  ;;  %v923_v31 = vshll.u32 %v11099_v33, 16  ;;  %v11100_v54 = vld [vmem:[#allocation32_spill] sm:$0xff]  ;;  %v7639_v32 = vld [vmem:[%s7934_s11 + $0x5c] ss:$0 sps:$4 sm:$0x11]   ;;  %v11102_v27 = vld [vmem:[#allocation9_spill] sm:$0xff] }
  0xe7   : > { %v9072_v0 = vpop.permute.xlu1 %671  ;;  %1262 = vrot.lane.b32.xlu0 %v1223_v11, %s7786_s13  ;;  %v721_v26 = vrot.slane %v6114_v39, 1  ;;  %v935_v21 = vshll.u32 %v11100_v54, 16  ;;  %v1935_v51 = vrot.slane %v7639_v32, 1  ;;  %v1580_v5 = vld [vmem:[%s7934_s11 + $0x6c] sm:$0xe]  ;;  %v11101_v8 = vld [vmem:[#allocation16_spill] sm:$0xff]  ;;  %v1330_v49 = vsel %vm1328_vm2, %v11102_v27, %v8973_v25 }
  0xe8   : > { %v1934_v39 = vrot.slane %v6290_v42, 1  ;;  %v7640_v11 = vld [vmem:[%s8224_s28 + $0x1c] sm:$0xf]  ;;  %v6254_v42 = vld [vmem:[%s7934_s11 + $0x24] sm:$0xe] }
  0xe9   : > { %v6115_v38 = vcombine.low %v376_v59, %v7640_v11  ;;  %v9109_v59 = vrot.slane %v935_v21, 1 }
  0xea   : > { %v2006_v28 = vpop.permute.xlu0 %2005 }
  0xeb   : > { %v1876_v62 = vpop.permute.xlu1 %1875  ;;  %v2579_v56 = vsel %vm1328_vm2, %v1933_v19, %v2006_v28  ;;  %v377_v19 = vld [vmem:[%s8224_s28 + $0x24] sm:$0xe]  ;;  %v724_v11 = vrot.slane %v6115_v38, 1 }
  0xec   : > { %3199 = vmatmul.mubr.bf16.gmra.mxu1 %v2631_v60  ;;  %3061 = vmatprep.mubr.bf16.mxu0 %v2579_v56  ;;  %v2542_v45 = vsel %vm1328_vm2, %v11101_v8, %v1876_v62  ;;  %v723_v60 = vsel %vm717_vm1, %v721_v26, %v722_v1  ;;  %v7642_v56 = vld [vmem:[%s7934_s11 + $0x70] sm:$0xf]  ;;  %v6253_v62 = vld [vmem:[%s7934_s11 + $0x18] sm:$0xe]  ;;  %v9106_v26 = vrot.slane %v923_v31, 1  ;;  %v1936_v8 = vsel %vm717_vm1, %v1934_v39, %v1935_v51 }
  0xed   : > { %3598 = vmatprep.mubr.bf16.mxu1 %v1361_v41  ;;  %v7641_v41 = vld [vmem:[%s7934_s11 + $0x64] sm:$0xf]  ;;  %v6292_v32 = vcombine.low %v1580_v5, %v7642_v56  ;;  %v1365_v25 = vsel %vm1328_vm2, %v723_v60, %v9022_v23  ;;  %v9119_v5 = vld [vmem:[%s10947_s2 + $0xb8] sm:$0xff]   ;;  %v7643_v31 = vld [vmem:[%s7934_s11 + $0x68] ss:$0 sps:$4 sm:$0x11]  }
  0xee   : > { %3062 = vmatmul.mubr.bf16.gmra.mxu0 %v2542_v45  ;;  %v6291_v24 = vcombine.low %v1579_v15, %v7641_v41  ;;  %v9101_v28 = vpop.permute.xlu0 %804  ;;  %v1938_v45 = vrot.slane %v7643_v31, 1  ;;  %v7644_v41 = vld [vmem:[%s8224_s28 + $0x20] ss:$0 sps:$4 sm:$0x11]   ;;  %v9126_v23 = vld [vmem:[%s10947_s2 + $0xf0] sm:$0xff]  }
  0xef   : > { %v9111_v15 = vpop.permute.xlu1 %673  ;;  %v725_v21 = vrot.slane %v7644_v41, 1  ;;  %v7645_v51 = vld [vmem:[%s8224_s28 + $0x28] sm:$0xf]  ;;  %v7646_v60 = vld [vmem:[%s7934_s11 + $0x1c] sm:$0xf] }
  0xf0   : > { %v1937_v27 = vrot.slane %v6291_v24, 1  ;;  %v6116_v39 = vcombine.low %v377_v19, %v7645_v51  ;;  %v6343_v56 = vcombine.low %v6253_v62, %v7646_v60  ;;  %v7647_v1 = vld [vmem:[%s7934_s11 + $0x28] sm:$0xf]  ;;  %v378_v31 = vld [vmem:[%s8224_s28 + $0x30] sm:$0xe]  ;;  %v1940_v24 = vrot.slane %v6292_v32, 1 }
  0xf1   : > { %v6344_v4 = vcombine.low %v6254_v42, %v7647_v1  ;;  %v6255_v19 = vld [vmem:[%s7934_s11 + $0x30] sm:$0xe]  ;;  %v6256_v62 = vld [vmem:[%s7934_s11 + $0x3c] sm:$0xe] }
  0xf2   : > { %v2008_v38 = vpop.permute.xlu0 %2007  ;;  %v11103_v51 = vld [vmem:[#allocation14_spill] sm:$0xff]  ;;  %v11105_v1 = vld [vmem:[#allocation23_spill] sm:$0xff] }
  0xf3   : > { %v1878_v52 = vpop.permute.xlu1 %1877  ;;  %v2583_v46 = vsel %vm1328_vm2, %v1936_v8, %v2008_v38  ;;  %v11104_v42 = vshrl.u32 %v11103_v51, 16  ;;  %v9153_v8 = vld [vmem:[%s10947_s2 + $0xb0] sm:$0xff]   ;;  %v726_v38 = vsel %vm717_vm1, %v724_v11, %v725_v21  ;;  %v9159_v51 = vld [vmem:[%s10947_s2 + $0xe8] sm:$0xff]   ;;  %v2496_v29 = vrot.slane %v6344_v4, 1  ;;  %v11111_v21 = vld [vmem:[#allocation12_spill] sm:$0xff] }
  0xf4   : > { %3599 = vmatmul.mubr.bf16.vlgmr.msra.gmra.mxu1 %v1330_v49  ;;  %v7648_v49 = vld [vmem:[%s7934_s11 + $0x74] ss:$0 sps:$4 sm:$0x11]   ;;  %3069 = vmatprep.mubr.bf16.mxu0 %v2583_v46  ;;  %11110 = vst [vmem:[#allocation8_spill] sm:$0xff] %v9159_v51  ;;  %v1333_v22 = vsel %vm1328_vm2, %v11111_v21, %v9033_v10  ;;  %v1939_v21 = vsel %vm717_vm1, %v1937_v27, %v1938_v45  ;;  %v11118_v45 = vshrl.u32 %v11097_v14, 16  ;;  %v11119_v14 = vld [vmem:[#allocation15_spill] sm:$0xff] }
  0xf5   : > { %7170 = vmatpush3.bf16.msra.mxu1 %v9119_v5  ;;  %3606 = vmatprep.mubr.bf16.mxu1 %v1365_v25  ;;  %v1941_v41 = vrot.slane %v7648_v49, 1  ;;  %v9141_v60 = vor.u32 %v11105_v1, %v11104_v42  ;;  %v11107_v25 = vshrl.u32 %v11106_v63, 16  ;;  %v11109_v49 = vld [vmem:[#allocation19_spill] sm:$0xff]  ;;  %v7649_v63 = vld [vmem:[%s8224_s28 + $0x2c] ss:$0 sps:$4 sm:$0x11]   ;;  %v1369_v16 = vsel %vm1328_vm2, %v726_v38, %v9060_v44 }
  0xf6   : > { %7163 = vmatprep.subr.bf16.mxu1 %v9126_v23  ;;  %v2545_v47 = vsel %vm1328_vm2, %v11109_v49, %v1878_v52  ;;  %v7650_v46 = vld [vmem:[%s8224_s28 + $0x34] sm:$0xf]  ;;  %v727_v52 = vrot.slane %v6116_v39, 1  ;;  %v2493_v1 = vrot.slane %v6343_v56, 1  ;;  %v9164_v11 = vpop.permute.xlu0 %806  ;;  %v7653_v56 = vld [vmem:[%s7934_s11 + $0x40] sm:$0xf]  ;;  %v9203_v27 = vor.u32 %v9082_v18, %v11118_v45 }
  0xf7   : > { %v9146_v32 = vor.u32 %v11108_v40, %v11107_v25  ;;  %v728_v40 = vrot.slane %v7649_v63, 1  ;;  %v6117_v42 = vcombine.low %v378_v31, %v7650_v46  ;;  %3070 = vmatmul.mubr.bf16.gmra.mxu0 %v2545_v47  ;;  %v7651_v25 = vld [vmem:[%s7934_s11 + $0x20] ss:$0 sps:$4 sm:$0x11]   ;;  %v9173_v63 = vld [vmem:[%s10947_s2 + $0xa8] sm:$0xff]   ;;  %v6346_v4 = vcombine.low %v6256_v62, %v7653_v56  ;;  %v9183_v10 = vpop.permute.xlu1 %675 }
  0xf8   : > { %v2494_v49 = vrot.slane %v7651_v25, 1  ;;  %11112 = vst [vmem:[#allocation13_spill] sm:$0xff] %v9173_v63  ;;  %v7652_v47 = vld [vmem:[%s7934_s11 + $0x34] sm:$0xf]  ;;  %v379_v31 = vld [vmem:[%s8224_s28 + $0x3c] sm:$0xe]  ;;  %v1336_v18 = vsel %vm1328_vm2, %v11119_v14, %v9072_v0 }
  0xf9   : > { %7171 = vmatpush3.bf16.msra.mxu1 %v9153_v8  ;;  %v6345_v39 = vcombine.low %v6255_v19, %v7652_v47  ;;  %v11113_v46 = vld [vmem:[#allocation20_spill] sm:$0xff]  ;;  %v6257_v62 = vld [vmem:[%s7934_s11 + $0x48] sm:$0xe]  ;;  %v730_v44 = vrot.slane %v6117_v42, 1  ;;  %v6258_v45 = vld [vmem:[%s7934_s11 + $0x54] sm:$0xe] }
  0xfa   : > { %v11114_v25 = vshrl.u32 %v11113_v46, 16  ;;  %7164 = vmatprep.subr.bf16.mxu1 %v9159_v51  ;;  %v9192_v19 = vld [vmem:[%s10947_s2 + $0xe0] sm:$0xff]   ;;  %v7654_v38 = vld [vmem:[%s8224_s28 + $0x38] ss:$0 sps:$4 sm:$0x11]   ;;  %v2010_v51 = vpop.permute.xlu0 %2009  ;;  %v9235_v0 = vrot.slane %v6346_v4, 1 }
  0xfb   : > { %11116 = vst [vmem:[#allocation24_spill] sm:$0xff] %v9192_v19  ;;  %v731_v56 = vrot.slane %v7654_v38, 1  ;;  %v9207_v46 = vld [vmem:[%s7934_s11 + $0x38] ss:$0 sps:$4 sm:$0x11]   ;;  %v11120_v38 = vshrl.u32 %v11099_v33, 16  ;;  %v1880_v14 = vpop.permute.xlu1 %1879 }
  0xfc   : > { %v9181_v12 = vor.u32 %v11115_v34, %v11114_v25  ;;  %v11117_v34 = vshrl.u32 %v11095_v9, 16  ;;  %3607 = vmatmul.mubr.bf16.gmra.mxu1 %v1333_v22  ;;  %v7657_v42 = vld [vmem:[%s8224_s28 + $0x40] sm:$0xf]  ;;  %v11121_v4 = vld [vmem:[#allocation7_spill] sm:$0xff] }
  0xfd   : > { %v9225_v25 = vor.u32 %v9106_v26, %v11120_v38  ;;  %3614 = vmatprep.mubr.bf16.mxu1 %v1369_v16  ;;  %7172 = vmatpush3.bf16.msra.mxu1 %v9173_v63  ;;  %v9231_v22 = vld [vmem:[%s10947_s2 + $0xa0] sm:$0xff]   ;;  %v7659_v26 = vld [vmem:[%s7934_s11 + $0x4c] sm:$0xf]  ;;  %v729_v38 = vsel %vm717_vm1, %v727_v52, %v728_v40  ;;  %v11122_v9 = vrot.slane %v11121_v4, 1  ;;  %v11124_v40 = vld [vmem:[#allocation22_spill] sm:$0xff]  ;;  %v9270_v4 = vsel %vm717_vm1, %v730_v44, %v731_v56 }
  0xfe   : > { %v9198_v47 = vor.u32 %v9069_v37, %v11117_v34  ;;  %v9215_v37 = vsel %vm717_vm1, %v1940_v24, %v1941_v41  ;;  %v6118_v34 = vcombine.low %v379_v31, %v7657_v42  ;;  %v9233_v24 = vrot.slane %v6345_v39, 1  ;;  %v9238_v41 = vld [vmem:[%s8224_s28 + $0x44] ss:$0 sps:$4 sm:$0x11]   ;;  %v380_v31 = vld [vmem:[%s8224_s28 + $0x48] sm:$0xe]  ;;  %7165 = vmatprep.subr.bf16.mxu1 %v9192_v19  ;;  %v9279_v19 = vpop.permute.xlu0 %808 }
  0xff   : > { %v6347_v16 = vcombine.low %v6257_v62, %v7659_v26  ;;  %v2587_v42 = vsel %vm1328_vm2, %v1939_v21, %v2010_v51  ;;  %v9246_v39 = vsel %vm717_vm1, %v2493_v1, %v2494_v49  ;;  %v9251_v63 = vsel %vm717_vm1, %v2496_v29, %v11122_v9  ;;  %v9257_v62 = vld [vmem:[%s10947_s2 + $0xd8] sm:$0xff]   ;;  %v6259_v51 = vld [vmem:[%s7934_s11 + $0x60] sm:$0xe]  ;;  %v9263_v1 = vld [vmem:[%s7934_s11 + $0x50] ss:$0 sps:$4 sm:$0x11]  }
 0x100   : > { %11123 = vst [vmem:[#allocation27_spill] sm:$0xff] %v9257_v62  ;;  %3077 = vmatprep.mubr.bf16.mxu0 %v2587_v42  ;;  %v2548_v52 = vsel %vm1328_vm2, %v11124_v40, %v1880_v14  ;;  %v7661_v29 = vld [vmem:[%s7934_s11 + $0x58] sm:$0xf]  ;;  %v6260_v9 = vld [vmem:[%s7934_s11 + $0x6c] sm:$0xe]  ;;  %v868_v26 = vshll.u32 %v8761_v13, 16 }
 0x101   : > { %v6348_v21 = vcombine.low %v6258_v45, %v7661_v29  ;;  %3078 = vmatmul.mubr.bf16.gmra.mxu0 %v2548_v52  ;;  %v9272_v33 = vrot.slane %v6118_v34, 1  ;;  %v7662_v42 = vld [vmem:[%s8224_s28 + $0x4c] sm:$0xf]  ;;  %v9276_v40 = vld [vmem:[%s8224_s28 + $0x54] sm:$0xe]  ;;  %v880_v49 = vshll.u32 %v8816_v61, 16  ;;  %v1373_v45 = vsel %vm1328_vm2, %v729_v38, %v9101_v28  ;;  %7173 = vmatpush3.bf16.msra.mxu1 %v9231_v22  ;;  %v9287_v52 = vpop.permute.xlu1 %677 }
 0x102   : > { %v6119_v14 = vcombine.low %v380_v31, %v7662_v42  ;;  %v9284_v13 = vrot.slane %v6347_v16, 1  ;;  %v7663_v44 = vld [vmem:[%s7934_s11 + $0x64] sm:$0xf]  ;;  %v870_v34 = vrot.slane %v868_v26, 1  ;;  %v11125_v31 = vld [vmem:[#allocation18_spill] sm:$0xff]  ;;  %7166 = vmatprep.subr.bf16.mxu1 %v9257_v62  ;;  %v9303_v26 = vld [vmem:[%s10947_s2 + $0x98] sm:$0xff]  }
 0x103   : > { %v6349_v56 = vcombine.low %v6259_v51, %v7663_v44  ;;  %v9292_v61 = vsel %vm1328_vm2, %v11125_v31, %v9111_v15  ;;  %v9296_v29 = vld [vmem:[%s7934_s11 + $0x5c] ss:$0 sps:$4 sm:$0x11]   ;;  %v7665_v16 = vld [vmem:[%s7934_s11 + $0x70] sm:$0xf]  ;;  %v882_v51 = vrot.slane %v880_v49, 1 }
 0x104   : > { %v6350_v38 = vcombine.low %v6260_v9, %v7665_v16  ;;  %11126 = vst [vmem:[#allocation28_spill] sm:$0xff] %v9303_v26  ;;  %v9305_v42 = vrot.slane %v6348_v21, 1  ;;  %v9308_v15 = vld [vmem:[%s8224_s28 + $0x50] ss:$0 sps:$4 sm:$0x11]   ;;  %v9313_v31 = vsel %vm546_vm0, %v9141_v60, %v870_v34  ;;  %v892_v28 = vshll.u32 %v8868_v2, 16  ;;  %3615 = vmatmul.mubr.bf16.gmra.mxu1 %v1336_v18  ;;  %v2012_v18 = vpop.permute.xlu0 %2011 }
 0x105   : > { %11127 = vst [vmem:[#allocation32_spill] sm:$0xff] %v9313_v31  ;;  %v9316_v49 = vrot.slane %v6119_v14, 1  ;;  %v9319_v9 = vld [vmem:[%s7934_s11 + $0x68] ss:$0 sps:$4 sm:$0x11]   ;;  %v9325_v16 = vld [vmem:[%s10947_s2 + $0xd0] sm:$0xff]   ;;  %v9334_v2 = vsel %vm546_vm0, %v9146_v32, %v882_v51  ;;  %3622 = vmatprep.mubr.bf16.mxu1 %v1373_v45  ;;  %7174 = vmatpush3.bf16.msra.mxu1 %v9303_v26 }
 0x106   : > { %11128 = vst [vmem:[#allocation16_spill] sm:$0xff] %v9325_v16  ;;  %v7668_v44 = vld [vmem:[%s8224_s28 + $0x58] sm:$0xf]  ;;  %11129 = vst [vmem:[#allocation9_spill] sm:$0xff] %v9334_v2  ;;  %v9337_v14 = vrot.slane %v6349_v56, 1  ;;  %v894_v32 = vrot.slane %v892_v28, 1  ;;  %v2591_v56 = vsel %vm1328_vm2, %v9215_v37, %v2012_v18  ;;  %7167 = vmatprep.subr.bf16.mxu1 %v9325_v16 }
 0x107   : > { %v6120_v62 = vcombine.low %v9276_v40, %v7668_v44  ;;  %v9330_v60 = vld [vmem:[%s7934_s11 + $0x78] sm:$0xe]  ;;  %v9340_v34 = vld [vmem:[%s7934_s11 + $0x74] ss:$0 sps:$4 sm:$0x11]   ;;  %v904_v51 = vshll.u32 %v8911_v6, 16  ;;  %v1882_v44 = vpop.permute.xlu1 %1881  ;;  %3085 = vmatprep.mubr.bf16.mxu0 %v2591_v56 }
 0x108   : > { %11130 = vst [vmem:[#allocation14_spill] sm:$0xff] %v9340_v34  ;;  %v9346_v40 = vld [vmem:[%s10947_s2 + $0x90] sm:$0xff]   ;;  %v6086_v45 = vld [vmem:[%s8224_s28 + $0x3c] sm:$0xe]  ;;  %v11131_v2 = vrot.slane %v9207_v46, 1  ;;  %v9358_v31 = vrot.slane %v6350_v38, 1 }
 0x109   : > { %v9362_v28 = vld [vmem:[%s8224_s28 + $0x5c] ss:$0 sps:$4 sm:$0x11]   ;;  %v9366_v34 = vld [vmem:[%s8224_s28 + $0x60] sm:$0xe]  ;;  %v11133_v37 = vld [vmem:[#allocation26_spill] sm:$0xff]  ;;  %7175 = vmatpush3.bf16.msra.mxu1 %v9346_v40 }
 0x10a   : > { %v9356_v21 = vsel %vm717_vm1, %v9233_v24, %v11131_v2  ;;  %11132 = vst [vmem:[#allocation23_spill] sm:$0xff] %v9358_v31  ;;  %v6087_v26 = vld [vmem:[%s8224_s28 + $0x48] sm:$0xe]  ;;  %v2551_v46 = vsel %vm1328_vm2, %v11133_v37, %v1882_v44  ;;  %v7671_v18 = vld [vmem:[%s7934_s11 + $0x7c] sm:$0xf]  ;;  %v9380_v2 = vsel %vm546_vm0, %v9181_v12, %v894_v32  ;;  %v906_v6 = vrot.slane %v904_v51, 1 }
 0x10b   : > { %v6351_v24 = vcombine.low %v9330_v60, %v7671_v18  ;;  %v9376_v38 = vld [vmem:[%s10947_s2 + $0xc8] sm:$0xff]   ;;  %v6088_v31 = vld [vmem:[%s8224_s28 + $0x54] sm:$0xe]  ;;  %v6089_v16 = vld [vmem:[%s8224_s28 + $0x60] sm:$0xe]  ;;  %3086 = vmatmul.mubr.bf16.gmra.mxu0 %v2551_v46  ;;  %v1377_v44 = vsel %vm1328_vm2, %v9270_v4, %v9164_v11  ;;  %v9387_v56 = vrot.slane %v6120_v62, 1  ;;  %v6176_v60 = vcombine.low %v6086_v45, %v8842_v17 }
 0x10c   : > { %v1308_v37 = vrot.slane %v8855_v7, 1  ;;  %v6090_v18 = vld [vmem:[%s8224_s28 + $0x6c] sm:$0xe]  ;;  %7090 = vmatprep.mubr.msk.bf16.mxu0 %vm1328_vm2, %v9246_v39  ;;  %v9402_v11 = vsel %vm546_vm0, %v9198_v47, %v906_v6  ;;  %v916_v62 = vshll.u32 %v8950_v43, 16  ;;  %v6177_v17 = vcombine.low %v6087_v26, %v8892_v36  ;;  %7168 = vmatprep.subr.bf16.mxu1 %v9376_v38  ;;  %v9413_v39 = vld [vmem:[%s10947_s2 + $0xc0] sm:$0xff]  }
 0x10d   : > { %v9398_v12 = vld [vmem:[%s10947_s2 + $0x88] sm:$0xff]   ;;  %v11134_v7 = vshrl.u32 %v11100_v54, 16  ;;  %v7672_v32 = vld [vmem:[%s8224_s28 + $0x64] sm:$0xf]  ;;  %v1307_v47 = vrot.slane %v6176_v60, 1  ;;  %v1311_v45 = vrot.slane %v8900_v35, 1  ;;  %v6178_v43 = vcombine.low %v6088_v31, %v8931_v48  ;;  %3623 = vmatmul.mubr.bf16.gmra.mxu1 %v9292_v61 }
 0x10e   : > { %v6121_v51 = vcombine.low %v9366_v34, %v7672_v32  ;;  %v918_v36 = vrot.slane %v916_v62, 1  ;;  %v1310_v26 = vrot.slane %v6177_v17, 1  ;;  %v1314_v54 = vrot.slane %v8939_v50, 1  ;;  %3630 = vmatprep.mubr.bf16.mxu1 %v1377_v44  ;;  %7176 = vmatpush3.bf16.msra.mxu1 %v9398_v12 }
 0x10f   : > { %v938_v4 = vor.u32 %v9109_v59, %v11134_v7  ;;  %v928_v59 = vshll.u32 %v8990_v20, 16  ;;  %v9423_v6 = vsel %vm717_vm1, %v1307_v47, %v1308_v37  ;;  %v1313_v46 = vrot.slane %v6178_v43, 1  ;;  %7169 = vmatprep.subr.bf16.mxu1 %v9413_v39  ;;  %v811_v37 = vpop.permute.xlu0 %810  ;;  %v11139_v43 = vld [vmem:[#allocation8_spill] sm:$0xff] }
 0x110   : > { %v6179_v7 = vcombine.low %v6089_v16, %v8971_v30  ;;  %v1317_v34 = vrot.slane %v8984_v58, 1  ;;  %v9430_v35 = vsel %vm546_vm0, %v9203_v27, %v918_v36  ;;  %v9433_v48 = vsel %vm717_vm1, %v1310_v26, %v1311_v45 }
 0x111   : > { %v930_v50 = vrot.slane %v928_v59, 1  ;;  %v6180_v20 = vcombine.low %v6090_v18, %v9020_v55  ;;  %v9438_v61 = vsel %vm717_vm1, %v1313_v46, %v1314_v54  ;;  %v1320_v58 = vrot.slane %v9031_v53, 1  ;;  %v9449_v55 = vld [vmem:[%s10947_s2 + $0x118] sm:$0xff]   ;;  %v9460_v53 = vld [vmem:[%s10947_s2 + $0x80] sm:$0xff]  }
 0x112   : > { %v1316_v30 = vrot.slane %v6179_v7, 1  ;;  %v940_v31 = vshll.u32 %v9038_v3, 16  ;;  %v11135_v27 = vrot.slane %v9238_v41, 1  ;;  %v7673_v18 = vld [vmem:[%s7934_s11 + $0x80] ss:$0 sps:$4 sm:$0x11]   ;;  %7177 = vmatpush3.bf16.msra.mxu1 %v9460_v53 }
 0x113   : > { %v9453_v44 = vsel %vm546_vm0, %v9225_v25, %v930_v50  ;;  %v1319_v60 = vrot.slane %v6180_v20, 1  ;;  %7091 = vmatmul.mubr.msk.bf16.vlgmr.msra.gmra.mxu0 %vm1328_vm2, %v9251_v63  ;;  %v11136_v25 = vld [vmem:[#allocation21_spill] sm:$0xff]  ;;  %v2517_v63 = vrot.slane %v6351_v24, 1  ;;  %v2518_v62 = vrot.slane %v7673_v18, 1  ;;  %7110 = vmatprep.subr.bf16.mxu1 %v9449_v55  ;;  %v11146_v7 = vld [vmem:[#allocation27_spill] sm:$0xff]  ;;  %v11149_v20 = vld [vmem:[#allocation28_spill] sm:$0xff] }
 0x114   : > { %v735_v16 = vsel %vm717_vm1, %v9272_v33, %v11135_v27  ;;  %v9463_v3 = vsel %vm717_vm1, %v1316_v30, %v1317_v34  ;;  %v942_v41 = vrot.slane %v940_v31, 1  ;;  %7094 = vmatprep.mubr.msk.bf16.mxu0 %vm1328_vm2, %v9356_v21  ;;  %v1342_v33 = vsel %vm1328_vm2, %v11136_v25, %v9183_v10  ;;  %6853 = vmatpush3.bf16.msra.mxu0 %v9119_v5  ;;  %v7674_v21 = vld [vmem:[%s8224_s28 + $0x68] ss:$0 sps:$4 sm:$0x11]   ;;  %v680_v5 = vpop.permute.xlu1 %679  ;;  %v383_v31 = vld [vmem:[%s8224_s28 + $0x6c] sm:$0xe] }
 0x115   : > { %v9473_v17 = vsel %vm717_vm1, %v1319_v60, %v1320_v58  ;;  %6854 = vmatprep.subr.bf16.mxu0 %v9126_v23  ;;  %v1381_v32 = vsel %vm1328_vm2, %v735_v16, %v9279_v19  ;;  %v742_v47 = vrot.slane %v6121_v51, 1  ;;  %v743_v45 = vrot.slane %v7674_v21, 1  ;;  %3631 = vmatmul.mubr.bf16.gmra.mxu1 %v1342_v33  ;;  %v11153_v16 = vld [vmem:[#allocation23_spill] sm:$0xff]  ;;  %v7676_v21 = vld [vmem:[%s8224_s28 + $0x70] sm:$0xf] }
 0x116   : > { %v9481_v10 = vsel %vm546_vm0, %v938_v4, %v942_v41  ;;  %v11137_v24 = vrot.slane %v9211_v57, 1  ;;  %3638 = vmatprep.mubr.bf16.mxu1 %v1381_v32  ;;  %v11138_v19 = vrot.slane %v9263_v1, 1  ;;  %v813_v4 = vpop.permute.xlu0 %812  ;;  %v11140_v36 = vrot.slane %v9308_v15, 1  ;;  %v11141_v57 = vld [vmem:[#allocation25_spill] sm:$0xff]  ;;  %v11154_v33 = vld [vmem:[#allocation11_spill] sm:$0xff] }
 0x117   : > { %v11144_v15 = vrot.slane %v9296_v29, 1  ;;  %v11147_v50 = vrot.slane %v9362_v28, 1  ;;  %v7675_v41 = vld [vmem:[%s7934_s11 + $0x88] sm:$0xf]  ;;  %v2519_v18 = vsel %vm717_vm1, %v2517_v63, %v2518_v62  ;;  %v744_v32 = vsel %vm717_vm1, %v742_v47, %v743_v45 }
 0x118   : > { %v2504_v23 = vsel %vm717_vm1, %v9235_v0, %v11137_v24  ;;  %6855 = vmatpush3.bf16.msra.mxu0 %v9153_v8  ;;  %v2507_v51 = vsel %vm717_vm1, %v9284_v13, %v11138_v19  ;;  %v738_v26 = vsel %vm717_vm1, %v9316_v49, %v11140_v36  ;;  %v1345_v8 = vsel %vm1328_vm2, %v11141_v57, %v9287_v52  ;;  %v11142_v0 = vld [vmem:[#allocation13_spill] sm:$0xff]  ;;  %v682_v1 = vpop.permute.xlu1 %681  ;;  %v11143_v13 = vld [vmem:[#allocation24_spill] sm:$0xff] }
 0x119   : > { %6856 = vmatprep.subr.bf16.mxu0 %v11139_v43  ;;  %v1385_v54 = vsel %vm1328_vm2, %v738_v26, %v811_v37  ;;  %v2510_v49 = vsel %vm717_vm1, %v9305_v42, %v11144_v15  ;;  %v11145_v52 = vrot.slane %v9319_v9, 1  ;;  %v741_v29 = vsel %vm717_vm1, %v9387_v56, %v11147_v50  ;;  %v6262_v42 = vld [vmem:[%s7934_s11 + $0x84] sm:$0xe]  ;;  %v11151_v56 = vld [vmem:[#allocation14_spill] sm:$0xff] }
 0x11a   : > { %v815_v59 = vpop.permute.xlu0 %814  ;;  %v1389_v30 = vsel %vm1328_vm2, %v741_v29, %v813_v4  ;;  %v11152_v27 = vrot.slane %v11151_v56, 1  ;;  %v6352_v25 = vcombine.low %v6262_v42, %v7675_v41  ;;  %v851_v37 = vshll.u32 %v11154_v33, 16  ;;  %v7677_v63 = vld [vmem:[%s7934_s11 + $0x8c] ss:$0 sps:$4 sm:$0x11]   ;;  %v11158_v50 = vld [vmem:[#allocation40_spill] sm:$0xff] }
 0x11b   : > { %7095 = vmatmul.mubr.msk.bf16.gmra.mxu0 %vm1328_vm2, %v2504_v23  ;;  %v2513_v46 = vsel %vm717_vm1, %v9337_v14, %v11145_v52  ;;  %v11150_v14 = vld [vmem:[#allocation16_spill] sm:$0xff]  ;;  %v11155_v23 = vld [vmem:[#allocation33_spill] sm:$0xff]  ;;  %v2521_v62 = vrot.slane %v7677_v63, 1  ;;  %v1393_v45 = vsel %vm1328_vm2, %v744_v32, %v815_v59  ;;  %v7678_v43 = vld [vmem:[%s8224_s28 + $0x14] ss:$0 sps:$4 sm:$0x11]  }
 0x11c   : > { %7098 = vmatprep.mubr.msk.bf16.mxu0 %vm1328_vm2, %v2507_v51  ;;  %6857 = vmatpush3.bf16.msra.mxu0 %v11142_v0  ;;  %v2516_v60 = vsel %vm717_vm1, %v11153_v16, %v11152_v27  ;;  %v1351_v19 = vsel %vm1328_vm2, %v11155_v23, %v682_v1  ;;  %v2520_v51 = vrot.slane %v6352_v25, 1  ;;  %v853_v47 = vrot.slane %v851_v37, 1  ;;  %v7679_v26 = vld [vmem:[%s8224_s28 + $0x74] ss:$0 sps:$4 sm:$0x11]   ;;  %v11160_v56 = vld [vmem:[#allocation41_spill] sm:$0xff] }
 0x11d   : > { %6858 = vmatprep.subr.bf16.mxu0 %v11143_v13  ;;  %3639 = vmatmul.mubr.bf16.gmra.mxu1 %v1345_v8  ;;  %v684_v34 = vpop.permute.xlu1 %683  ;;  %v856_v4 = vshll.u32 %v7678_v43, 16  ;;  %v746_v57 = vrot.slane %v7679_v26, 1  ;;  %v11161_v27 = vld [vmem:[#allocation36_spill] sm:$0xff]  ;;  %v11165_v43 = vld [vmem:[#allocation39_spill] sm:$0xff]  ;;  %s3953_s11 = scalar_select %p3952_p13, 1, 0 }
 0x11e   : > { %3646 = vmatprep.mubr.bf16.mxu1 %v1385_v54  ;;  %v817_v28 = vpop.permute.xlu0 %816  ;;  %v2522_v0 = vsel %vm717_vm1, %v2520_v51, %v2521_v62  ;;  %v11156_v54 = vld [vmem:[#allocation35_spill] sm:$0xff]  ;;  %v959_v16 = vshll.u32 %v11161_v27, 16  ;;  %v11163_v32 = vld [vmem:[#allocation32_spill] sm:$0xff] }
 0x11f   : > { %v858_v13 = vrot.slane %v856_v4, 1  ;;  %v1354_v15 = vsel %vm1328_vm2, %v11156_v54, %v684_v34  ;;  %v7680_v34 = vld [vmem:[%s8224_s28 + $0x74] ss:$0 sps:$4 sm:$0x11]  }
 0x120   : > { %6859 = vmatpush3.bf16.msra.mxu0 %v9231_v22  ;;  %v11148_v22 = vld [vmem:[#allocation30_spill] sm:$0xff]  ;;  %v7681_v63 = vld [vmem:[%s8224_s28 + $0x80] ss:$0 sps:$4 sm:$0x11]  }
 0x121   : > { %6860 = vmatprep.subr.bf16.mxu0 %v11146_v7  ;;  %v1348_v9 = vsel %vm1328_vm2, %v11148_v22, %v680_v5  ;;  %v686_v58 = vpop.permute.xlu1 %685  ;;  %v6122_v5 = vcombine.low %v383_v31, %v7676_v21  ;;  %v964_v62 = vshll.u32 %v7681_v63, 16  ;;  %v7688_v63 = vld [vmem:[%s8224_s28 + $0x7c] sm:$0xf] }
 0x123   : > { %7099 = vmatmul.mubr.msk.bf16.gmra.mxu0 %vm1328_vm2, %v2510_v49  ;;  %v745_v36 = vrot.slane %v6122_v5, 1  ;;  %v11157_v49 = vld [vmem:[#allocation34_spill] sm:$0xff]  ;;  %v961_v5 = vrot.slane %v959_v16, 1  ;;  %v966_v26 = vrot.slane %v964_v62, 1 }
 0x124   : > { %7102 = vmatprep.mubr.msk.bf16.mxu0 %vm1328_vm2, %v2513_v46  ;;  %6861 = vmatpush3.bf16.msra.mxu0 %v11149_v20  ;;  %v947_v59 = vshll.u32 %v11157_v49, 16  ;;  %v945_v22 = vshrl.u32 %v11157_v49, 16  ;;  %v952_v20 = vshll.u32 %v7680_v34, 16  ;;  %v7687_v16 = vld [vmem:[%s8224_s28 + $0x38] ss:$0 sps:$4 sm:$0x11]  }
 0x125   : > { %6862 = vmatprep.subr.bf16.mxu0 %v11150_v14  ;;  %3647 = vmatmul.mubr.bf16.gmra.mxu1 %v1348_v9  ;;  %v9541_v24 = vpop.permute.xlu1 %1044 }
 0x126   : > { %3654 = vmatprep.mubr.bf16.mxu1 %v1389_v30  ;;  %v949_v9 = vrot.slane %v947_v59, 1  ;;  %v11159_v30 = vld [vmem:[#allocation37_spill] sm:$0xff]  ;;  %v954_v41 = vrot.slane %v952_v20, 1  ;;  %v7683_v59 = vld [vmem:[%s8224_s28 + $0x20] ss:$0 sps:$4 sm:$0x11]  }
 0x127   : > { %v1357_v31 = vsel %vm1328_vm2, %v11159_v30, %v686_v58 }
 0x128   : > { %6863 = vmatpush3.bf16.msra.mxu0 %v9346_v40  ;;  %v1265_v40 = vpop.permute.xlu0 %1264 }
 0x129   : > { %6864 = vmatprep.subr.bf16.mxu0 %v9376_v38  ;;  %v849_v38 = vshrl.u32 %v11154_v33, 16  ;;  %v9553_v8 = vpop.permute.xlu1 %1046  ;;  %v11162_v33 = vld [vmem:[#allocation38_spill] sm:$0xff] }
 0x12a   : > { %v1464_v37 = vsel %vm1328_vm2, %v11162_v33, %v1265_v40 }
 0x12b   : > { %7103 = vmatmul.mubr.msk.bf16.gmra.mxu0 %vm1328_vm2, %v2516_v60  ;;  %v854_v1 = vor.u32 %v853_v47, %v849_v38  ;;  %v950_v60 = vor.u32 %v949_v9, %v945_v22  ;;  %v6083_v38 = vld [vmem:[%s8224_s28 + $0x18] sm:$0xe]  ;;  %v7685_v9 = vld [vmem:[%s8224_s28 + $0x34] sm:$0xf] }
 0x12c   : > { %7106 = vmatprep.mubr.msk.bf16.mxu0 %vm1328_vm2, %v2519_v18  ;;  %6865 = vmatpush3.bf16.msra.mxu0 %v9398_v12  ;;  %v1267_v12 = vpop.permute.xlu0 %1266  ;;  %v957_v18 = vshrl.u32 %v11161_v27, 16 }
 0x12d   : > { %6866 = vmatprep.subr.bf16.mxu0 %v9413_v39  ;;  %3655 = vmatmul.mubr.bf16.gmra.mxu1 %v1351_v19  ;;  %v747_v39 = vsel %vm717_vm1, %v745_v36, %v746_v57  ;;  %v859_v46 = vsel %vm546_vm0, %v854_v1, %v858_v13  ;;  %v1029_v7 = vpop.permute.xlu1 %1028  ;;  %v955_v23 = vsel %vm546_vm0, %v950_v60, %v954_v41  ;;  %v11164_v19 = vld [vmem:[#allocation42_spill] sm:$0xff]  ;;  %v7682_v57 = vld [vmem:[%s8224_s28 + $0x1c] sm:$0xf]  ;;  %v1305_v60 = vrot.slane %v7687_v16, 1 }
 0x12e   : > { %3662 = vmatprep.mubr.bf16.mxu1 %v1393_v45  ;;  %v1401_v42 = vsel %vm1328_vm2, %v859_v46, %v1029_v7  ;;  %v1433_v40 = vsel %vm1328_vm2, %v955_v23, %v9541_v24  ;;  %v7493_v45 = vld [vmem:[%s10947_s2 + $0x110] sm:$0xff]   ;;  %v1467_v4 = vsel %vm1328_vm2, %v11165_v43, %v1267_v12  ;;  %v962_v36 = vor.u32 %v961_v5, %v957_v18  ;;  %v11166_v24 = vld [vmem:[#allocation9_spill] sm:$0xff]  ;;  %v7689_v43 = vld [vmem:[%s8224_s28 + $0x80] ss:$0 sps:$4 sm:$0x11]  }
 0x12f   : > { %v7494_v12 = vld [vmem:[%s10947_s2 + $0x108] sm:$0xff]   ;;  %v6085_v46 = vld [vmem:[%s8224_s28 + $0x30] sm:$0xe] }
 0x130   : > { %6867 = vmatpush3.bf16.msra.mxu0 %v9460_v53  ;;  %v1397_v53 = vsel %vm1328_vm2, %v747_v39, %v817_v28  ;;  %v11167_v39 = vld [vmem:[#allocation43_spill] sm:$0xff]  ;;  %v6175_v34 = vcombine.low %v6085_v46, %v7685_v9  ;;  %v11169_v18 = vld [vmem:[#allocation45_spill] sm:$0xff]  ;;  %v11170_v23 = vld [vmem:[#allocation46_spill] sm:$0xff] }
 0x131   : > { %v1249_v52 = vpop.permute.xlu0 %1248 }
 0x132   : > { %v1440_v29 = vsel %vm1328_vm2, %v11158_v50, %v1249_v52  ;;  %v1031_v25 = vpop.permute.xlu1 %1030  ;;  %v1299_v52 = vrot.slane %v7683_v59, 1  ;;  %v1304_v27 = vrot.slane %v6175_v34, 1 }
 0x133   : > { %7107 = vmatmul.mubr.msk.bf16.gmra.mxu0 %vm1328_vm2, %v2522_v0  ;;  %v1405_v58 = vsel %vm1328_vm2, %v11163_v32, %v1031_v25  ;;  %v6173_v0 = vcombine.low %v6083_v38, %v7682_v57 }
 0x134   : > { %3711 = vmatprep.mubr.bf16.mxu0 %v1440_v29  ;;  %v1306_v33 = vsel %vm717_vm1, %v1304_v27, %v1305_v60 }
 0x135   : > { %3663 = vmatmul.mubr.bf16.gmra.mxu1 %v1354_v15  ;;  %v1251_v14 = vpop.permute.xlu0 %1250  ;;  %v967_v15 = vsel %vm546_vm0, %v962_v36, %v966_v26  ;;  %v1298_v49 = vrot.slane %v6173_v0, 1  ;;  %v6092_v36 = vld [vmem:[%s8224_s28 + $0x84] sm:$0xe] }
 0x136   : > { %3670 = vmatprep.mubr.bf16.mxu1 %v1397_v53  ;;  %v1443_v28 = vsel %vm1328_vm2, %v11160_v56, %v1251_v14  ;;  %v1437_v7 = vsel %vm1328_vm2, %v967_v15, %v9553_v8  ;;  %v7684_v53 = vld [vmem:[%s8224_s28 + $0x28] sm:$0xf]  ;;  %v7686_v14 = vld [vmem:[%s8224_s28 + $0x2c] ss:$0 sps:$4 sm:$0x11]   ;;  %v11168_v56 = vld [vmem:[#allocation44_spill] sm:$0xff] }
 0x137   : > { %v1033_v47 = vpop.permute.xlu1 %1032  ;;  %v1300_v22 = vsel %vm717_vm1, %v1298_v49, %v1299_v52  ;;  %v1302_v30 = vrot.slane %v7686_v14, 1 }
 0x138   : > { %v1409_v13 = vsel %vm1328_vm2, %v11166_v24, %v1033_v47 }
 0x13b   : > { %3712 = vmatmul.mubr.bf16.vlgmr.msra.gmra.mxu0 %v1401_v42  ;;  %v1253_v21 = vpop.permute.xlu0 %1252  ;;  %v7495_v42 = vld [vmem:[%s10947_s2 + $0x100] sm:$0xff]  }
 0x13c   : > { %3719 = vmatprep.mubr.bf16.mxu0 %v1443_v28  ;;  %v1446_v51 = vsel %vm1328_vm2, %v11164_v19, %v1253_v21  ;;  %v6091_v19 = vld [vmem:[%s8224_s28 + $0x78] sm:$0xe] }
 0x13d   : > { %3671 = vmatmul.mubr.bf16.gmra.mxu1 %v1357_v31  ;;  %v1035_v29 = vpop.permute.xlu1 %1034  ;;  %v6181_v62 = vcombine.low %v6091_v19, %v7688_v63 }
 0x13e   : > { %3775 = vmatprep.mubr.bf16.mxu1 %v1464_v37  ;;  %v1413_v8 = vsel %vm1328_vm2, %v9380_v2, %v1035_v29 }
 0x141   : > { %v1255_v1 = vpop.permute.xlu0 %1254 }
 0x142   : > { %v1449_v54 = vsel %vm1328_vm2, %v11167_v39, %v1255_v1  ;;  %v7691_v39 = vld [vmem:[%s8224_s28 + $0x8c] ss:$0 sps:$4 sm:$0x11]  }
 0x143   : > { %3720 = vmatmul.mubr.bf16.gmra.mxu0 %v1405_v58 }
 0x144   : > { %3727 = vmatprep.mubr.bf16.mxu0 %v1446_v51  ;;  %v1037_v25 = vpop.permute.xlu1 %1036 }
 0x145   : > { %3776 = vmatmul.mubr.bf16.vlgmr.msra.gmra.mxu1 %v1433_v40  ;;  %v1417_v37 = vsel %vm1328_vm2, %v9402_v11, %v1037_v25  ;;  %v11171_v40 = vld [vmem:[#allocation10_spill] sm:$0xff] }
 0x146   : > { %7111 = vmatpush3.bf16.msra.mxu1 %v9449_v55  ;;  %3783 = vmatprep.mubr.bf16.mxu1 %v1467_v4  ;;  %v6084_v55 = vld [vmem:[%s8224_s28 + $0x24] sm:$0xe]  ;;  %v1323_v4 = vrot.slane %v7689_v43, 1 }
 0x147   : > { %7112 = vmatprep.subr.bf16.mxu1 %v7493_v45  ;;  %v6174_v50 = vcombine.low %v6084_v55, %v7684_v53 }
 0x148   : > { %v1257_v20 = vpop.permute.xlu0 %1256 }
 0x149   : > { %v1301_v31 = vrot.slane %v6174_v50, 1  ;;  %v1452_v28 = vsel %vm1328_vm2, %v11168_v56, %v1257_v20 }
 0x14a   : > { %7113 = vmatpush3.bf16.msra.mxu1 %v7493_v45  ;;  %v1039_v58 = vpop.permute.xlu1 %1038  ;;  %v1322_v45 = vrot.slane %v6181_v62, 1 }
 0x14b   : > { %3728 = vmatmul.mubr.bf16.gmra.mxu0 %v1409_v13  ;;  %7114 = vmatprep.subr.bf16.mxu1 %v7494_v12  ;;  %v1303_v41 = vsel %vm717_vm1, %v1301_v31, %v1302_v30  ;;  %v1421_v5 = vsel %vm1328_vm2, %v9430_v35, %v1039_v58 }
 0x14c   : > { %3735 = vmatprep.mubr.bf16.mxu0 %v1449_v54  ;;  %v1259_v2 = vpop.permute.xlu0 %1258  ;;  %v1324_v24 = vsel %vm717_vm1, %v1322_v45, %v1323_v4  ;;  %v1326_v54 = vrot.slane %v7691_v39, 1 }
 0x14d   : > { %3784 = vmatmul.mubr.bf16.gmra.mxu1 %v1437_v7  ;;  %v1455_v32 = vsel %vm1328_vm2, %v11169_v18, %v1259_v2 }
 0x14e   : > { %7115 = vmatpush3.bf16.msra.mxu1 %v7494_v12  ;;  %7118 = vmatprep.mubr.msk.bf16.mxu1 %vm1328_vm2, %v1300_v22 }
 0x14f   : > { %7116 = vmatprep.subr.bf16.mxu1 %v7495_v42  ;;  %v1041_v51 = vpop.permute.xlu1 %1040 }
 0x150   : > { %v1425_v35 = vsel %vm1328_vm2, %v9453_v44, %v1041_v51 }
 0x152   : > { %7117 = vmatpush3.bf16.msra.mxu1 %v7495_v42  ;;  %v1261_v21 = vpop.permute.xlu0 %1260 }
 0x153   : > { %3736 = vmatmul.mubr.bf16.gmra.mxu0 %v1413_v8  ;;  %v1458_v11 = vsel %vm1328_vm2, %v11170_v23, %v1261_v21 }
 0x154   : > { %3743 = vmatprep.mubr.bf16.mxu0 %v1452_v28 }
 0x155   : > { %7119 = vmatmul.mubr.msk.bf16.vlgmr.msra.gmra.mxu1 %vm1328_vm2, %v1303_v41 }
 0x156   : > { %7122 = vmatprep.mubr.msk.bf16.mxu1 %vm1328_vm2, %v1306_v33 }
 0x157   : > { %v1043_v44 = vpop.permute.xlu1 %1042 }
 0x158   : > { %v1429_v13 = vsel %vm1328_vm2, %v9481_v10, %v1043_v44 }
 0x159   : > { %v1263_v38 = vpop.permute.xlu0 %1262 }
 0x15a   : > { %v1461_v47 = vsel %vm1328_vm2, %v11171_v40, %v1263_v38 }
 0x15b   : > { %3744 = vmatmul.mubr.bf16.gmra.mxu0 %v1417_v37 }
 0x15c   : > { %3751 = vmatprep.mubr.bf16.mxu0 %v1455_v32 }
 0x15d   : > { %7123 = vmatmul.mubr.msk.bf16.gmra.mxu1 %vm1328_vm2, %v9423_v6 }
 0x15e   : > { %7126 = vmatprep.mubr.msk.bf16.mxu1 %vm1328_vm2, %v9433_v48 }
 0x163   : > { %3752 = vmatmul.mubr.bf16.gmra.mxu0 %v1421_v5 }
 0x164   : > { %3759 = vmatprep.mubr.bf16.mxu0 %v1458_v11  ;;  %v6702_v6 = vpop.f32.mrf.mxu1 }
 0x165   : > { %7127 = vmatmul.mubr.msk.bf16.gmra.mxu1 %vm1328_vm2, %v9438_v61  ;;  %v7690_v61 = vld [vmem:[%s8224_s28 + $0x88] sm:$0xf] }
 0x166   : > { %7130 = vmatprep.mubr.msk.bf16.mxu1 %vm1328_vm2, %v9463_v3  ;;  %v6703_v48 = vpop.f32.mrf.mxu1  ;;  %v6182_v0 = vcombine.low %v6092_v36, %v7690_v61 }
 0x167   : > { %v6704_v26 = vadd.f32 %v6703_v48, %v6702_v6 }
 0x168   : > { %v6705_v57 = vpop.f32.mrf.mxu1  ;;  %v1325_v12 = vrot.slane %v6182_v0, 1 }
 0x16a   : > { %v6706_v1 = vpop.f32.mrf.mxu1  ;;  %v1327_v52 = vsel %vm717_vm1, %v1325_v12, %v1326_v54 }
 0x16b   : > { %3760 = vmatmul.mubr.bf16.gmra.mxu0 %v1425_v35  ;;  %v6707_v27 = vadd.f32 %v6706_v1, %v6705_v57 }
 0x16c   : > { %3767 = vmatprep.mubr.bf16.mxu0 %v1461_v47  ;;  %v6708_v3 = vpop.f32.mrf.mxu1 }
 0x16d   : > { %7131 = vmatmul.mubr.msk.bf16.gmra.mxu1 %vm1328_vm2, %v9473_v17 }
 0x16e   : > { %7134 = vmatprep.mubr.msk.bf16.mxu1 %vm1328_vm2, %v1324_v24  ;;  %v6709_v15 = vpop.f32.mrf.mxu1 }
 0x16f   : > { %v6710_v49 = vadd.f32 %v6709_v15, %v6708_v3  ;;  %v7787_v3 = vmov 0  }
 0x170   : > { %v6711_v59 = vpop.f32.mrf.mxu1  ;;  %3989 = vst.msk [vmem:[#allocation2 + $0xc] sm:$0xf] %vm3984_vm3, %v7787_v3  ;;  %3985 = vst.msk [vmem:[#allocation2] sm:$0xf] %vm3984_vm3, %v7787_v3 }
 0x171   : > { %3986 = vst.msk [vmem:[#allocation2 + $0x4] sm:$0xf] %vm3984_vm3, %v7787_v3  ;;  %3990 = vst.msk [vmem:[#allocation2 + $0x10] sm:$0xf] %vm3984_vm3, %v7787_v3 }
 0x172   : > { %v6712_v55 = vpop.f32.mrf.mxu1  ;;  %3992 = vst.msk [vmem:[#allocation2 + $0x18] sm:$0xf] %vm3984_vm3, %v7787_v3  ;;  %3993 = vst.msk [vmem:[#allocation2 + $0x1c] sm:$0xf] %vm3984_vm3, %v7787_v3 }
 0x173   : > { %3768 = vmatmul.mubr.bf16.gmra.mxu0 %v1429_v13  ;;  %v6713_v11 = vadd.f32 %v6712_v55, %v6711_v59  ;;  %3995 = vst.msk [vmem:[#allocation2 + $0x24] sm:$0xf] %vm3984_vm3, %v7787_v3  ;;  %3996 = vst.msk [vmem:[#allocation2 + $0x28] sm:$0xf] %vm3984_vm3, %v7787_v3 }
 0x174   : > { %v6714_v46 = vpop.f32.mrf.mxu1  ;;  %3998 = vst.msk [vmem:[#allocation2 + $0x30] sm:$0xf] %vm3984_vm3, %v7787_v3  ;;  %3999 = vst.msk [vmem:[#allocation2 + $0x34] sm:$0xf] %vm3984_vm3, %v7787_v3 }
 0x175   : > { %7135 = vmatmul.mubr.msk.bf16.gmra.mxu1 %vm1328_vm2, %v1327_v52  ;;  %4001 = vst.msk [vmem:[#allocation2 + $0x3c] sm:$0xf] %vm3984_vm3, %v7787_v3  ;;  %4002 = vst.msk [vmem:[#allocation2 + $0x40] sm:$0xf] %vm3984_vm3, %v7787_v3 }
 0x176   : > { %v6715_v7 = vpop.f32.mrf.mxu1  ;;  %4004 = vst.msk [vmem:[#allocation2 + $0x48] sm:$0xf] %vm3984_vm3, %v7787_v3  ;;  %4005 = vst.msk [vmem:[#allocation2 + $0x4c] sm:$0xf] %vm3984_vm3, %v7787_v3 }
 0x177   : > { %v6716_v17 = vadd.f32 %v6715_v7, %v6714_v46  ;;  %4007 = vst.msk [vmem:[#allocation2 + $0x54] sm:$0xf] %vm3984_vm3, %v7787_v3  ;;  %4008 = vst.msk [vmem:[#allocation2 + $0x58] sm:$0xf] %vm3984_vm3, %v7787_v3 }
 0x178   : > { %v6717_v53 = vpop.f32.mrf.mxu1  ;;  %4010 = vst.msk [vmem:[#allocation2 + $0x60] sm:$0xf] %vm3984_vm3, %v7787_v3  ;;  %4011 = vst.msk [vmem:[#allocation2 + $0x64] sm:$0xf] %vm3984_vm3, %v7787_v3 }
 0x179   : > { %4013 = vst.msk [vmem:[#allocation2 + $0x6c] sm:$0xf] %vm3984_vm3, %v7787_v3  ;;  %4014 = vst.msk [vmem:[#allocation2 + $0x70] sm:$0xf] %vm3984_vm3, %v7787_v3 }
 0x17a   : > { %v6718_v50 = vpop.f32.mrf.mxu1  ;;  %3991 = vst.msk [vmem:[#allocation2 + $0x14] sm:$0x1] %vm3987_vm4, %v7787_v3  ;;  %3988 = vst.msk [vmem:[#allocation2 + $0x8] sm:$0x1] %vm3987_vm4, %v7787_v3 }
 0x17b   : > { %v6719_v36 = vadd.f32 %v6718_v50, %v6717_v53  ;;  %3994 = vst.msk [vmem:[#allocation2 + $0x20] sm:$0x1] %vm3987_vm4, %v7787_v3  ;;  %3997 = vst.msk [vmem:[#allocation2 + $0x2c] sm:$0x1] %vm3987_vm4, %v7787_v3 }
 0x17c   : > { %v6720_v10 = vpop.f32.mrf.mxu1  ;;  %4000 = vst.msk [vmem:[#allocation2 + $0x38] sm:$0x1] %vm3987_vm4, %v7787_v3  ;;  %4003 = vst.msk [vmem:[#allocation2 + $0x44] sm:$0x1] %vm3987_vm4, %v7787_v3 }
 0x17d   : > { %4006 = vst.msk [vmem:[#allocation2 + $0x50] sm:$0x1] %vm3987_vm4, %v7787_v3  ;;  %4009 = vst.msk [vmem:[#allocation2 + $0x5c] sm:$0x1] %vm3987_vm4, %v7787_v3 }
 0x17e   : > { %v6721_v29 = vpop.f32.mrf.mxu1  ;;  %v6626_v22 = vpop.f32.mrf.mxu0  ;;  %4012 = vst.msk [vmem:[#allocation2 + $0x68] sm:$0x1] %vm3987_vm4, %v7787_v3  ;;  %4015 = vst.msk [vmem:[#allocation2 + $0x74] sm:$0x1] %vm3987_vm4, %v7787_v3 }
 0x17f   : > { %v9657_v42 = vadd.f32 %v6721_v29, %v6720_v10 }
 0x180   : > { %v9659_v9 = vpop.f32.mrf.mxu1  ;;  %v6627_v34 = vpop.f32.mrf.mxu0 }
 0x181   : > { %v6628_v14 = vadd.f32 %v6627_v34, %v6626_v22 }
 0x182   : > { %v9661_v20 = vpop.f32.mrf.mxu1  ;;  %v6629_v30 = vpop.f32.mrf.mxu0 }
 0x183   : > { %v9663_v31 = vadd.f32 %v6704_v26, %v6628_v14  ;;  %v6725_v59 = vadd.f32 %v9661_v20, %v9659_v9 }
 0x184   : > { %v6726_v8 = vpop.f32.mrf.mxu1  ;;  %v6630_v56 = vpop.f32.mrf.mxu0 }
 0x185   : > { %v6631_v16 = vadd.f32 %v6630_v56, %v6629_v30 }
 0x186   : > { %v6727_v28 = vpop.f32.mrf.mxu1  ;;  %v6632_v41 = vpop.f32.mrf.mxu0 }
 0x187   : > { %v9665_v60 = vadd.f32 %v6727_v28, %v6726_v8  ;;  %v9669_v33 = vadd.f32 %v6707_v27, %v6631_v16 }
 0x188   : > { %v9667_v25 = vpop.f32.mrf.mxu1  ;;  %v6633_v2 = vpop.f32.mrf.mxu0 }
 0x189   : > { %v6634_v18 = vadd.f32 %v6633_v2, %v6632_v41 }
 0x18a   : > { %v9671_v37 = vpop.f32.mrf.mxu1  ;;  %v6635_v32 = vpop.f32.mrf.mxu0 }
 0x18b   : > { %v9673_v21 = vadd.f32 %v6710_v49, %v6634_v18  ;;  %v6731_v14 = vadd.f32 %v9671_v37, %v9667_v25 }
 0x18c   : > { %v6732_v58 = vpop.f32.mrf.mxu1  ;;  %v6636_v5 = vpop.f32.mrf.mxu0 }
 0x18d   : > { %v6637_v19 = vadd.f32 %v6636_v5, %v6635_v32 }
 0x18e   : > { %v6733_v23 = vpop.f32.mrf.mxu1  ;;  %v6638_v63 = vpop.f32.mrf.mxu0 }
 0x18f   : > { %v9675_v51 = vadd.f32 %v6733_v23, %v6732_v58  ;;  %v9679_v38 = vadd.f32 %v6713_v11, %v6637_v19 }
 0x190   : > { %v9677_v62 = vpop.f32.mrf.mxu1  ;;  %v6639_v6 = vpop.f32.mrf.mxu0 }
 0x191   : > { %v6640_v48 = vadd.f32 %v6639_v6, %v6638_v63 }
 0x192   : > { %v9681_v35 = vpop.f32.mrf.mxu1  ;;  %v6641_v40 = vpop.f32.mrf.mxu0 }
 0x193   : > { %v9683_v45 = vadd.f32 %v6716_v17, %v6640_v48  ;;  %v6737_v25 = vadd.f32 %v9681_v35, %v9677_v62 }
 0x194   : > { %v6738_v47 = vpop.f32.mrf.mxu1  ;;  %v6642_v43 = vpop.f32.mrf.mxu0 }
 0x195   : > { %v6643_v26 = vadd.f32 %v6642_v43, %v6641_v40 }
 0x196   : > { %v6739_v4 = vpop.f32.mrf.mxu1  ;;  %v6644_v61 = vpop.f32.mrf.mxu0 }
 0x197   : > { %v9685_v57 = vadd.f32 %v6739_v4, %v6738_v47  ;;  %v9689_v1 = vadd.f32 %v6719_v36, %v6643_v26 }
 0x198   : > { %v9687_v0 = vpop.f32.mrf.mxu1  ;;  %v6645_v44 = vpop.f32.mrf.mxu0 }
 0x199   : > { %v6646_v13 = vadd.f32 %v6645_v44, %v6644_v61 }
 0x19a   : > { %v9691_v24 = vpop.f32.mrf.mxu1  ;;  %v6647_v12 = vpop.f32.mrf.mxu0 }
 0x19b   : > { %v9714_v54 = vadd.f32 %v9657_v42, %v6646_v13  ;;  %v6743_v62 = vadd.f32 %v9691_v24, %v9687_v0 }
 0x19c   : > { %v6744_v39 = vpop.f32.mrf.mxu1  ;;  %v6648_v15 = vpop.f32.mrf.mxu0 }
 0x19d   : > { %v6649_v52 = vadd.f32 %v6648_v15, %v6647_v12 }
 0x19e   : > { %v6745_v49 = vpop.f32.mrf.mxu1  ;;  %v6650_v46 = vpop.f32.mrf.mxu0 }
 0x19f   : > { %v9718_v55 = vadd.f32 %v6745_v49, %v6744_v39  ;;  %v9720_v17 = vadd.f32 %v6725_v59, %v6649_v52 }
 0x1a0   : > { %v6747_v7 = vpop.f32.mrf.mxu1  ;;  %v6651_v53 = vpop.f32.mrf.mxu0 }
 0x1a1   : > { %v6652_v10 = vadd.f32 %v6651_v53, %v6650_v46 }
 0x1a2   : > { %v6748_v50 = vpop.f32.mrf.mxu1  ;;  %v6653_v42 = vpop.f32.mrf.mxu0 }
 0x1a3   : > { %v6749_v29 = vadd.f32 %v6748_v50, %v6747_v7  ;;  %v9733_v9 = vadd.f32 %v9665_v60, %v6652_v10 }
 0x1a4   : > { %v6750_v22 = vpop.f32.mrf.mxu1  ;;  %v6654_v34 = vpop.f32.mrf.mxu0 }
 0x1a5   : > { %v6655_v30 = vadd.f32 %v6654_v34, %v6653_v42 }
 0x1a6   : > { %v6751_v20 = vpop.f32.mrf.mxu1  ;;  %v6656_v56 = vpop.f32.mrf.mxu0 }
 0x1a7   : > { %v6752_v8 = vadd.f32 %v6751_v20, %v6750_v22  ;;  %v9737_v27 = vadd.f32 %v6731_v14, %v6655_v30 }
 0x1a8   : > { %v6753_v28 = vpop.f32.mrf.mxu1  ;;  %v6657_v16 = vpop.f32.mrf.mxu0 }
 0x1a9   : > { %v6658_v2 = vadd.f32 %v6657_v16, %v6656_v56 }
 0x1aa   : > { %v6754_v41 = vpop.f32.mrf.mxu1  ;;  %v6659_v32 = vpop.f32.mrf.mxu0 }
 0x1ab   : > { %v6755_v18 = vadd.f32 %v6754_v41, %v6753_v28  ;;  %v9740_v60 = vadd.f32 %v9675_v51, %v6658_v2 }
 0x1ac   : > { %v6756_v58 = vpop.f32.mrf.mxu1  ;;  %v6660_v5 = vpop.f32.mrf.mxu0 }
 0x1ad   : > { %v6661_v37 = vadd.f32 %v6660_v5, %v6659_v32 }
 0x1ae   : > { %v6757_v23 = vpop.f32.mrf.mxu1  ;;  %v6662_v19 = vpop.f32.mrf.mxu0 }
 0x1af   : > { %v6758_v11 = vadd.f32 %v6757_v23, %v6756_v58  ;;  %v9744_v6 = vadd.f32 %v6737_v25, %v6661_v37 }
 0x1b0   : > { %v6759_v63 = vpop.f32.mrf.mxu1  ;;  %v6663_v48 = vpop.f32.mrf.mxu0 }
 0x1b1   : > { %v6664_v47 = vadd.f32 %v6663_v48, %v6662_v19 }
 0x1b2   : > { %v6760_v40 = vpop.f32.mrf.mxu1  ;;  %v6665_v4 = vpop.f32.mrf.mxu0 }
 0x1b3   : > { %v6761_v43 = vadd.f32 %v6760_v40, %v6759_v63  ;;  %v9747_v51 = vadd.f32 %v9685_v57, %v6664_v47 }
 0x1b4   : > { %v6792_v36 = vpop.f32.mrf.mxu1  ;;  %v6666_v26 = vpop.f32.mrf.mxu0 }
 0x1b5   : > { %v6667_v35 = vadd.f32 %v6666_v26, %v6665_v4 }
 0x1b6   : > { %v6793_v61 = vpop.f32.mrf.mxu1 }
 0x1b7   : > { %v6794_v44 = vadd.f32 %v6793_v61, %v6792_v36  ;;  %v6668_v3 = vpop.f32.mrf.mxu0  ;;  %v9751_v12 = vadd.f32 %v6743_v62, %v6667_v35 }
 0x1b8   : > { %v6795_v13 = vpop.f32.mrf.mxu1 }
 0x1b9   : > { %v6669_v39 = vpop.f32.mrf.mxu0 }
 0x1ba   : > { %v6796_v15 = vpop.f32.mrf.mxu1  ;;  %v6670_v49 = vadd.f32 %v6669_v39, %v6668_v3 }
 0x1bb   : > { %v6797_v59 = vadd.f32 %v6796_v15, %v6795_v13  ;;  %v6671_v52 = vpop.f32.mrf.mxu0 }
 0x1bc   : > { %v6798_v46 = vpop.f32.mrf.mxu1  ;;  %v9754_v57 = vadd.f32 %v9718_v55, %v6670_v49 }
 0x1bd   : > { %v6672_v7 = vpop.f32.mrf.mxu0 }
 0x1be   : > { %v6799_v53 = vpop.f32.mrf.mxu1  ;;  %v6673_v50 = vadd.f32 %v6672_v7, %v6671_v52 }
 0x1bf   : > { %v6800_v10 = vadd.f32 %v6799_v53, %v6798_v46 }
 0x1c0   : > { %v6801_v24 = vpop.f32.mrf.mxu1  ;;  %v9756_v42 = vadd.f32 %v6749_v29, %v6673_v50 }
 0x1c1   : > { %v6674_v0 = vpop.f32.mrf.mxu0 }
 0x1c2   : > { %v6802_v34 = vpop.f32.mrf.mxu1 }
 0x1c3   : > { %v6675_v22 = vpop.f32.mrf.mxu0  ;;  %v6803_v14 = vadd.f32 %v6802_v34, %v6801_v24 }
 0x1c4   : > { %v6676_v20 = vadd.f32 %v6675_v22, %v6674_v0  ;;  %v6804_v56 = vpop.f32.mrf.mxu1 }
 0x1c5   : > { %v6677_v30 = vpop.f32.mrf.mxu0 }
 0x1c6   : > { %v9758_v28 = vadd.f32 %v6752_v8, %v6676_v20  ;;  %v6805_v41 = vpop.f32.mrf.mxu1 }
 0x1c7   : > { %v6678_v16 = vpop.f32.mrf.mxu0  ;;  %v6806_v2 = vadd.f32 %v6805_v41, %v6804_v56 }
 0x1c8   : > { %v6679_v55 = vadd.f32 %v6678_v16, %v6677_v30  ;;  %v6807_v58 = vpop.f32.mrf.mxu1 }
 0x1ca   : > { %v9760_v5 = vadd.f32 %v6755_v18, %v6679_v55  ;;  %v6808_v25 = vpop.f32.mrf.mxu1 }
 0x1cb   : > { %v6680_v32 = vpop.f32.mrf.mxu0  ;;  %v6809_v37 = vadd.f32 %v6808_v25, %v6807_v58 }
 0x1cd   : > { %v6681_v23 = vpop.f32.mrf.mxu0  ;;  %v6810_v63 = vpop.f32.mrf.mxu1 }
 0x1ce   : > { %v6682_v29 = vadd.f32 %v6681_v23, %v6680_v32 }
 0x1cf   : > { %v6683_v19 = vpop.f32.mrf.mxu0  ;;  %v6811_v47 = vpop.f32.mrf.mxu1 }
 0x1d0   : > { %v9762_v48 = vadd.f32 %v6758_v11, %v6682_v29  ;;  %v6812_v4 = vadd.f32 %v6811_v47, %v6810_v63 }
 0x1d1   : > { %v6684_v40 = vpop.f32.mrf.mxu0  ;;  %v6813_v26 = vpop.f32.mrf.mxu1 }
 0x1d2   : > { %v6685_v8 = vadd.f32 %v6684_v40, %v6683_v19 }
 0x1d3   : > { %v7092_v36 = vpop.f32.mrf.mxu0  ;;  %v6814_v35 = vpop.f32.mrf.mxu1 }
 0x1d4   : > { %v3250_v61 = vadd.f32 %v7092_v36, %v9673_v21  ;;  %v9765_v62 = vadd.f32 %v6761_v43, %v6685_v8  ;;  %v6815_v39 = vadd.f32 %v6814_v35, %v6813_v26 }
 0x1d5   : > { %v3241_v18 = vpop.f32.mrf.mxu0  ;;  %v6816_v11 = vpop.f32.mrf.mxu1 }
 0x1d6   : > { %v9767_v3 = vadd.f32 %v6800_v10, %v3250_v61  ;;  %v3242_v13 = vadd.f32 %v3241_v18, %v9663_v31 }
 0x1d7   : > { %v7093_v15 = vpop.f32.mrf.mxu0  ;;  %v6817_v7 = vpop.f32.mrf.mxu1 }
 0x1d8   : > { %v9770_v49 = vadd.f32 %v6794_v44, %v3242_v13  ;;  %v3253_v52 = vadd.f32 %v7093_v15, %v9679_v38  ;;  %v6818_v43 = vadd.f32 %v6817_v7, %v6816_v11 }
 0x1d9   : > { %v3244_v46 = vpop.f32.mrf.mxu0  ;;  %v6819_v0 = vpop.f32.mrf.mxu1 }
 0x1da   : > { %v9773_v53 = vadd.f32 %v6803_v14, %v3253_v52  ;;  %v3245_v21 = vadd.f32 %v3244_v46, %v9669_v33 }
 0x1db   : > { %v7096_v50 = vpop.f32.mrf.mxu0  ;;  %v6820_v22 = vpop.f32.mrf.mxu1 }
 0x1dc   : > { %v9776_v10 = vadd.f32 %v6797_v59, %v3245_v21  ;;  %v3266_v31 = vadd.f32 %v7096_v50, %v9714_v54  ;;  %v6821_v38 = vadd.f32 %v6820_v22, %v6819_v0 }
 0x1dd   : > { %v3257_v24 = vpop.f32.mrf.mxu0  ;;  %v6822_v30 = vpop.f32.mrf.mxu1 }
 0x1de   : > { %v9779_v34 = vadd.f32 %v6812_v4, %v3266_v31  ;;  %v3258_v44 = vadd.f32 %v3257_v24, %v9683_v45 }
 0x1df   : > { %v7097_v20 = vpop.f32.mrf.mxu0  ;;  %v6823_v16 = vpop.f32.mrf.mxu1 }
 0x1e0   : > { %v9782_v14 = vadd.f32 %v6806_v2, %v3258_v44  ;;  %v3269_v33 = vadd.f32 %v7097_v20, %v9720_v17  ;;  %v6824_v54 = vadd.f32 %v6823_v16, %v6822_v30 }
 0x1e1   : > { %v3260_v56 = vpop.f32.mrf.mxu0  ;;  %v6825_v32 = vpop.f32.mrf.mxu1 }
 0x1e2   : > { %v9785_v41 = vadd.f32 %v6815_v39, %v3269_v33  ;;  %v3261_v59 = vadd.f32 %v3260_v56, %v9689_v1 }
 0x1e3   : > { %v7100_v55 = vpop.f32.mrf.mxu0  ;;  %v6826_v25 = vpop.f32.mrf.mxu1 }
 0x1e4   : > { %v9788_v58 = vadd.f32 %v6809_v37, %v3261_v59  ;;  %v3282_v45 = vadd.f32 %v7100_v55, %v9740_v60  ;;  %v6827_v17 = vadd.f32 %v6826_v25, %v6825_v32 }
 0x1e5   : > { %v3273_v23 = vpop.f32.mrf.mxu0  ;;  %v6828_v63 = vpop.f32.mrf.mxu1 }
 0x1e6   : > { %v9791_v29 = vadd.f32 %v6824_v54, %v3282_v45  ;;  %v3274_v2 = vadd.f32 %v3273_v23, %v9733_v9 }
 0x1e7   : > { %v7101_v19 = vpop.f32.mrf.mxu0  ;;  %v6829_v8 = vpop.f32.mrf.mxu1 }
 0x1e8   : > { %v9794_v40 = vadd.f32 %v6818_v43, %v3274_v2  ;;  %v3285_v1 = vadd.f32 %v7101_v19, %v9744_v6  ;;  %v6830_v60 = vadd.f32 %v6829_v8, %v6828_v63 }
 0x1e9   : > { %v3276_v47 = vpop.f32.mrf.mxu0  ;;  %v6831_v26 = vpop.f32.mrf.mxu1 }
 0x1ea   : > { %v9797_v4 = vadd.f32 %v6827_v17, %v3285_v1  ;;  %v3277_v37 = vadd.f32 %v3276_v47, %v9737_v27 }
 0x1eb   : > { %v7104_v36 = vpop.f32.mrf.mxu0  ;;  %v6832_v35 = vpop.f32.mrf.mxu1 }
 0x1ec   : > { %v9800_v61 = vadd.f32 %v6821_v38, %v3277_v37  ;;  %v3298_v9 = vadd.f32 %v7104_v36, %v9754_v57  ;;  %v6833_v39 = vadd.f32 %v6832_v35, %v6831_v26 }
 0x1ed   : > { %v3289_v18 = vpop.f32.mrf.mxu0  ;;  %v6834_v6 = vpop.f32.mrf.mxu1 }
 0x1ee   : > { %v3290_v13 = vadd.f32 %v3289_v18, %v9747_v51 }
 0x1ef   : > { %v7105_v15 = vpop.f32.mrf.mxu0  ;;  %v6835_v27 = vpop.f32.mrf.mxu1 }
 0x1f0   : > { %v9804_v11 = vadd.f32 %v6830_v60, %v3290_v13  ;;  %v3301_v52 = vadd.f32 %v7105_v15, %v9756_v42  ;;  %v6836_v21 = vadd.f32 %v6835_v27, %v6834_v6  ;;  %v7554_v15 = vld [vmem:[%s10950_s5 + $0x78] sm:$0xff]  }
 0x1f1   : > { %v3292_v46 = vpop.f32.mrf.mxu0  ;;  %v6837_v50 = vpop.f32.mrf.mxu1  ;;  %v7555_v6 = vld [vmem:[%s10950_s5 + $0x38] sm:$0xff]   ;;  %6942 = vmatprep.subr.bf16.mxu0 %v7554_v15 }
 0x1f2   : > { %v3293_v7 = vadd.f32 %v3292_v46, %v9751_v12  ;;  %v9813_v51 = vadd.f32 %v6836_v21, %v3298_v9  ;;  %6943 = vmatpush3.bf16.msra.mxu0 %v7555_v6 }
 0x1f3   : > { %v7108_v43 = vpop.f32.mrf.mxu0  ;;  %v6838_v24 = vpop.f32.mrf.mxu1 }
 0x1f4   : > { %v9808_v0 = vadd.f32 %v6833_v39, %v3293_v7  ;;  %v9811_v57 = vadd.f32 %v7108_v43, %v9762_v48  ;;  %v6839_v44 = vadd.f32 %v6838_v24, %v6837_v50  ;;  %v3954_v50 = vstv %s3953_s11  ;;  %s6008_s11 = sshll.u32 %s320_s14, 7 }
 0x1f5   : > { %v3305_v31 = vpop.f32.mrf.mxu0  ;;  %v6840_v38 = vpop.f32.mrf.mxu1  ;;  %vm9839_vm5 = vcmp.eq.s32.totalorder %v3954_v50, 1  ;;  %s10803_s9 = scalar_lea.vmem [#allocation3], %s6008_s11 }
 0x1f6   : > { %v3306_v22 = vadd.f32 %v3305_v31, %v9758_v28  ;;  %v9817_v12 = vadd.f32 %v6839_v44, %v3301_v52 }
 0x1f7   : > { %v7109_v42 = vpop.f32.mrf.mxu0  ;;  %v6841_v33 = vpop.f32.mrf.mxu1 }
 0x1f8   : > { %v3317_v20 = vadd.f32 %v7109_v42, %v9765_v62  ;;  %v6842_v16 = vadd.f32 %v6841_v33, %v6840_v38 }
 0x1f9   : > { %v3308_v30 = vpop.f32.mrf.mxu0  ;;  %v6843_v59 = vpop.f32.mrf.mxu1 }
 0x1fa   : > { %v3309_v56 = vadd.f32 %v3308_v30, %v9760_v5  ;;  %v9820_v54 = vadd.f32 %v6842_v16, %v3306_v22  ;;  %v7574_v16 = vld [vmem:[%s10950_s5 + $0x10] sm:$0xff]  }
 0x1fb   : > { %v6868_v48 = vpop.f32.mrf.mxu0  ;;  %v6844_v32 = vpop.f32.mrf.mxu1 }
 0x1fc   : > { %v6845_v45 = vadd.f32 %v6844_v32, %v6843_v59 }
 0x1fd   : > { %v6869_v55 = vpop.f32.mrf.mxu0  ;;  %v6846_v23 = vpop.f32.mrf.mxu1 }
 0x1fe   : > { %v9822_v25 = vadd.f32 %v6845_v45, %v3309_v56  ;;  %v6870_v43 = vadd.f32 %v6869_v55, %v6868_v48  ;;  %v9837_v56 = vld [vmem:[%s10949_s4] ss:$0 sm:$0xff]  ;;  %v7563_v48 = vld [vmem:[%s10950_s5 + $0x70] sm:$0xff]  }
 0x1ff   : > { %v6871_v28 = vpop.f32.mrf.mxu0  ;;  %v6847_v2 = vpop.f32.mrf.mxu1  ;;  %6944 = vmatprep.subr.bf16.mxu0 %v7563_v48 }
 0x200   : > { %v6848_v22 = vadd.f32 %v6847_v2, %v6846_v23  ;;  %v3714_v32 = vadd.f32 %v6870_v43, %v9770_v49  ;;  %v7567_v49 = vld [vmem:[%s10950_s5 + $0x68] sm:$0xff]   ;;  %v7570_v43 = vld [vmem:[%s10950_s5 + $0x20] sm:$0xff]  }
 0x201   : > { %v6872_v62 = vpop.f32.mrf.mxu0  ;;  %v6849_v19 = vpop.f32.mrf.mxu1 }
 0x202   : > { %v6873_v38 = vadd.f32 %v6872_v62, %v6871_v28 }
 0x203   : > { %v6874_v17 = vpop.f32.mrf.mxu0  ;;  %v6850_v1 = vpop.f32.mrf.mxu1 }
 0x204   : > { %v6851_v5 = vadd.f32 %v6850_v1, %v6849_v19  ;;  %v3673_v19 = vadd.f32 %v6848_v22, %v9811_v57  ;;  %v3717_v57 = vadd.f32 %v6873_v38, %v9776_v10  ;;  %v7571_v38 = vld [vmem:[%s10950_s5 + $0x58] sm:$0xff]  }
 0x205   : > { %v6875_v63 = vpop.f32.mrf.mxu0  ;;  %v6916_v8 = vpop.f32.mrf.mxu1 }
 0x206   : > { %v9824_v37 = vadd.f32 %v6851_v5, %v3317_v20  ;;  %v6876_v27 = vadd.f32 %v6875_v63, %v6874_v17 }
 0x207   : > { %v6877_v47 = vpop.f32.mrf.mxu0  ;;  %v6917_v36 = vpop.f32.mrf.mxu1 }
 0x208   : > { %v3722_v42 = vadd.f32 %v6876_v27, %v9767_v3  ;;  %v6918_v20 = vadd.f32 %v6917_v36, %v6916_v8  ;;  %v7564_v3 = vld [vmem:[%s10950_s5 + $0x30] sm:$0xff]   ;;  %v7577_v27 = vld [vmem:[%s10950_s5 + $0xf8] sm:$0xff]  }
 0x209   : > { %v6878_v60 = vpop.f32.mrf.mxu0  ;;  %v6919_v9 = vpop.f32.mrf.mxu1  ;;  %6945 = vmatpush3.bf16.msra.mxu0 %v7564_v3  ;;  %7006 = vmatprep.subr.bf16.mxu1 %v7577_v27 }
 0x20a   : > { %v6879_v44 = vadd.f32 %v6878_v60, %v6877_v47  ;;  %v7568_v47 = vld [vmem:[%s10950_s5 + $0x28] sm:$0xff]   ;;  %6946 = vmatprep.subr.bf16.mxu0 %v7567_v49 }
 0x20b   : > { %v6880_v26 = vpop.f32.mrf.mxu0  ;;  %v6920_v35 = vpop.f32.mrf.mxu1 }
 0x20c   : > { %v6921_v45 = vadd.f32 %v6920_v35, %v6919_v9  ;;  %v3725_v5 = vadd.f32 %v6879_v44, %v9773_v53  ;;  %v9866_v53 = vadd.f32 %v6918_v20, %v9820_v54  ;;  %v7569_v9 = vld [vmem:[%s10950_s5 + $0x60] sm:$0xff]   ;;  %v3958_v44 = vstv %s9863_s19  ;;  %s7788_s19 = smov [#allocation3]  }
 0x20d   : > { %v6881_v18 = vpop.f32.mrf.mxu0  ;;  %v6922_v39 = vpop.f32.mrf.mxu1  ;;  %6947 = vmatpush3.bf16.msra.mxu0 %v7568_v47  ;;  %vm10054_vm12 = vcmp.eq.s32.totalorder %v3958_v44, 1  ;;  %s7696_s22 = sshll.u32 %s7788_s19, 4  ;;  %s7697_s22 = int_to_ptr.vmem [resolvable:$false] %s7696_s22 }
 0x20e   : > { %v6882_v59 = vadd.f32 %v6881_v18, %v6880_v26  ;;  %6948 = vmatprep.subr.bf16.mxu0 %v7569_v9  ;;  %s7698_s23 = scalar_lea.vmem %s7697_s22, 4096 }
 0x20f   : > { %v6883_v13 = vpop.f32.mrf.mxu0  ;;  %v6923_v46 = vpop.f32.mrf.mxu1 }
 0x210   : > { %v6924_v23 = vadd.f32 %v6923_v46, %v6922_v39  ;;  %v3730_v39 = vadd.f32 %v6882_v59, %v9782_v14  ;;  %v9880_v46 = vadd.f32 %v6921_v45, %v9822_v25  ;;  %v7578_v14 = vld [vmem:[%s10950_s5 + $0xb8] sm:$0xff]   ;;  %v7579_v25 = vld [vmem:[%s10950_s5 + $0xf0] sm:$0xff]  }
 0x211   : > { %v6884_v52 = vpop.f32.mrf.mxu0  ;;  %v6925_v21 = vpop.f32.mrf.mxu1  ;;  %7007 = vmatpush3.bf16.msra.mxu1 %v7578_v14  ;;  %6949 = vmatpush3.bf16.msra.mxu0 %v7570_v43 }
 0x212   : > { %v6885_v28 = vadd.f32 %v6884_v52, %v6883_v13  ;;  %v9877_v54 = vadd.f32 %v6924_v23, %v3673_v19  ;;  %7008 = vmatprep.subr.bf16.mxu1 %v7579_v25  ;;  %v4291_v19 = vld [vmem:[#allocation2 + $0xc] sm:$0xf]  ;;  %6950 = vmatprep.subr.bf16.mxu0 %v7571_v38  ;;  %v4295_v25 = vld [vmem:[#allocation2 + $0x14] sm:$0x1] }
 0x213   : > { %v6886_v7 = vpop.f32.mrf.mxu0  ;;  %v6926_v24 = vpop.f32.mrf.mxu1 }
 0x214   : > { %v6927_v8 = vadd.f32 %v6926_v24, %v6925_v21  ;;  %v9875_v52 = vadd.f32 %v6885_v28, %v9788_v58 }
 0x215   : > { %v6887_v31 = vpop.f32.mrf.mxu0  ;;  %v7120_v33 = vpop.f32.mrf.mxu1 }
 0x216   : > { %v3835_v55 = vadd.f32 %v7120_v33, %v3722_v42  ;;  %v6888_v62 = vadd.f32 %v6887_v31, %v6886_v7  ;;  %v9900_v42 = vadd.f32 %v6927_v8, %v9824_v37  ;;  %v7573_v8 = vld [vmem:[%s10950_s5 + $0x50] sm:$0xff]  }
 0x217   : > { %v6889_v30 = vpop.f32.mrf.mxu0  ;;  %v3826_v17 = vpop.f32.mrf.mxu1 }
 0x218   : > { %v3914_v63 = vadd.f32 %v9837_v56, %v3835_v55  ;;  %v3827_v1 = vadd.f32 %v3826_v17, %v3714_v32  ;;  %v3738_v10 = vadd.f32 %v6888_v62, %v9779_v34  ;;  %v7591_v17 = vld [vmem:[%s10950_s5 + $0x98] sm:$0xff]  }
 0x219   : > { %v6890_v2 = vpop.f32.mrf.mxu0  ;;  %v7121_v26 = vpop.f32.mrf.mxu1 }
 0x21a   : > { %v6891_v60 = vadd.f32 %v6890_v2, %v6889_v30  ;;  %v3934_v18 = vmax.f32 %v3914_v63, 0.0  ;;  %v3912_v35 = vadd.f32 %v9837_v56, %v3827_v1  ;;  %v3838_v13 = vadd.f32 %v7121_v26, %v3725_v5  ;;  %v7572_v2 = vld [vmem:[%s10950_s5 + $0x18] sm:$0xff]  }
 0x21b   : > { %v6892_v36 = vpop.f32.mrf.mxu0  ;;  %v3829_v6 = vpop.f32.mrf.mxu1  ;;  %6951 = vmatpush3.bf16.msra.mxu0 %v7572_v2 }
 0x21c   : > { %v6591_v7 = vpack.c.bf16 %v3934_v18, %v3934_v18  ;;  %v3932_v21 = vmax.f32 %v3912_v35, 0.0  ;;  %v3915_v58 = vadd.f32 %v9837_v56, %v3838_v13  ;;  %v3830_v31 = vadd.f32 %v3829_v6, %v3717_v57  ;;  %6952 = vmatprep.subr.bf16.mxu0 %v7573_v8 }
 0x21d   : > { %v6893_v15 = vpop.f32.mrf.mxu0  ;;  %v7124_v24 = vpop.f32.mrf.mxu1  ;;  %v9896_v22 = vadd.f32 %v6891_v60, %v9785_v41 }
 0x21e   : > { %v6894_v34 = vadd.f32 %v6893_v15, %v6892_v36  ;;  %v4097_v20 = vshrl.u32 %v6591_v7, 16  ;;  %v4100_v30 = vshll.u32 %v6591_v7, 16  ;;  %v3964_v33 = vsel %vm9839_vm5, 0.0, %v3932_v21 }
 0x21f   : > { %v6895_v50 = vpop.f32.mrf.mxu0  ;;  %v3935_v48 = vmax.f32 %v3915_v58, 0.0  ;;  %v6589_v3 = vpack.c.bf16 %v3964_v33, %v3964_v33  ;;  %v3913_v41 = vadd.f32 %v9837_v56, %v3830_v31  ;;  %v3851_v55 = vadd.f32 %v7124_v24, %v3738_v10  ;;  %v3842_v37 = vpop.f32.mrf.mxu1  ;;  %v4282_v10 = vld [vmem:[#allocation2] sm:$0xf]  ;;  %6953 = vmatpush3.bf16.msra.mxu0 %v7574_v16 }
 0x220   : > { %v9909_v32 = vadd.f32 %v6894_v34, %v9794_v40  ;;  %v4099_v45 = vrot.slane %v4097_v20, 7  ;;  %v3843_v62 = vadd.f32 %v3842_v37, %v3730_v39  ;;  %v7575_v20 = vld [vmem:[%s10950_s5 + $0x48] sm:$0xff]  }
 0x221   : > { %v6896_v59 = vpop.f32.mrf.mxu0  ;;  %v6592_v28 = vpack.c.bf16 %v3935_v48, %v3935_v48  ;;  %v4080_v40 = vshrl.u32 %v6589_v3, 16  ;;  %v4083_v63 = vshll.u32 %v6589_v3, 16  ;;  %v3933_v1 = vmax.f32 %v3913_v41, 0.0  ;;  %v7125_v47 = vpop.f32.mrf.mxu1  ;;  %6954 = vmatprep.subr.bf16.mxu0 %v7575_v20 }
 0x222   : > { %v9911_v23 = vadd.f32 %v6896_v59, %v6895_v50  ;;  %v3918_v5 = vadd.f32 %v9837_v56, %v3851_v55  ;;  %v4102_v60 = vor.u32 %v4100_v30, %v4099_v45  ;;  %v4103_v36 = vrot.slane %v4099_v45, 4 }
 0x223   : > { %v6898_v49 = vpop.f32.mrf.mxu0  ;;  %v4105_v26 = vshrl.u32 %v6592_v28, 16  ;;  %v4108_v57 = vshll.u32 %v6592_v28, 16  ;;  %v9926_v9 = vrot.slane %v4080_v40, 7  ;;  %v3965_v18 = vsel %vm9839_vm5, 0.0, %v3933_v1  ;;  %v3845_v15 = vpop.f32.mrf.mxu1  ;;  %v4288_v1 = vld [vmem:[#allocation2 + $0x8] sm:$0x1] }
 0x224   : > { %v3938_v35 = vmax.f32 %v3918_v5, 0.0  ;;  %v3916_v13 = vadd.f32 %v9837_v56, %v3843_v62  ;;  %v4292_v6 = vsel %vm9918_vm9, %v4102_v60, %v4291_v19  ;;  %v6590_v7 = vpack.c.bf16 %v3965_v18, %v3965_v18 }
 0x225   : > { %v6899_v39 = vpop.f32.mrf.mxu0  ;;  %v4107_v14 = vrot.slane %v4105_v26, 7  ;;  %4293 = vst [vmem:[#allocation2 + $0xc] sm:$0xf] %v4292_v6  ;;  %v4085_v34 = vor.u32 %v4083_v63, %v9926_v9  ;;  %v4086_v58 = vrot.slane %v9926_v9, 4  ;;  %v7128_v38 = vpop.f32.mrf.mxu1  ;;  %v3854_v40 = vadd.f32 %v7125_v47, %v9896_v22  ;;  %v7576_v63 = vld [vmem:[%s10950_s5 + $0x8] sm:$0xff]  }
 0x226   : > { %v6900_v21 = vadd.f32 %v6899_v39, %v6898_v49  ;;  %v6595_v50 = vpack.c.bf16 %v3938_v35, %v3938_v35  ;;  %v3936_v31 = vmax.f32 %v3916_v13, 0.0  ;;  %v4088_v48 = vshrl.u32 %v6590_v7, 16  ;;  %v4305_v47 = vld [vmem:[#allocation2 + $0x24] sm:$0xf]  ;;  %6955 = vmatpush3.bf16.msra.mxu0 %v7576_v63 }
 0x227   : > { %v6901_v24 = vpop.f32.mrf.mxu0  ;;  %v4110_v30 = vor.u32 %v4108_v57, %v4107_v14  ;;  %v4112_v33 = vrot.slane %v4107_v14, 4  ;;  %v4091_v3 = vshll.u32 %v6590_v7, 16  ;;  %v4283_v41 = vsel %vm9918_vm9, %v4085_v34, %v4282_v10  ;;  %v3858_v28 = vpop.f32.mrf.mxu1  ;;  %v4298_v7 = vld [vmem:[#allocation2 + $0x18] sm:$0xf] }
 0x228   : > { %v4131_v59 = vshrl.u32 %v6595_v50, 16  ;;  %v4134_v55 = vshll.u32 %v6595_v50, 16  ;;  %v6593_v37 = vpack.c.bf16 %v3936_v31, %v3936_v31  ;;  %4284 = vst [vmem:[#allocation2] sm:$0xf] %v4283_v41  ;;  %v4090_v19 = vrot.slane %v4088_v48, 7 }
 0x229   : > { %v6902_v45 = vpop.f32.mrf.mxu0  ;;  %v4111_v62 = vsel %vm9935_vm10, %v4103_v36, %v4110_v30  ;;  %v4296_v2 = vsel %vm9946_vm11, %v4112_v33, %v4295_v25  ;;  %v3846_v60 = vadd.f32 %v3845_v15, %v9875_v52  ;;  %v7129_v26 = vpop.f32.mrf.mxu1  ;;  %v3919_v9 = vadd.f32 %v9837_v56, %v3854_v40  ;;  %v7580_v30 = vld [vmem:[%s10950_s5 + $0xb0] sm:$0xff]  }
 0x22a   : > { %4294 = vst.msk [vmem:[#allocation2 + $0x10] sm:$0xf] %vm3984_vm3, %v4111_v62  ;;  %4297 = vst [vmem:[#allocation2 + $0x14] sm:$0x1] %v4296_v2  ;;  %v9964_v5 = vrot.slane %v4131_v59, 7  ;;  %v4114_v49 = vshrl.u32 %v6593_v37, 16  ;;  %v4093_v57 = vor.u32 %v4091_v3, %v4090_v19  ;;  %v6903_v18 = vadd.f32 %v6902_v45, %v6901_v24  ;;  %7009 = vmatpush3.bf16.msra.mxu1 %v7580_v30 }
 0x22b   : > { %v4117_v8 = vshll.u32 %v6593_v37, 16  ;;  %v6904_v36 = vpop.f32.mrf.mxu0  ;;  %v4095_v22 = vrot.slane %v4090_v19, 4  ;;  %v3917_v6 = vadd.f32 %v9837_v56, %v3846_v60  ;;  %v3861_v14 = vpop.f32.mrf.mxu1  ;;  %v3939_v16 = vmax.f32 %v3919_v9, 0.0  ;;  %v7582_v62 = vld [vmem:[%s10950_s5 + $0x40] sm:$0xff]  }
 0x22c   : > { %v4136_v35 = vor.u32 %v4134_v55, %v9964_v5  ;;  %v4137_v13 = vrot.slane %v9964_v5, 4  ;;  %v9970_v39 = vrot.slane %v4114_v49, 7  ;;  %v4094_v52 = vsel %vm9935_vm10, %v4086_v58, %v4093_v57  ;;  %6956 = vmatprep.subr.bf16.mxu0 %v7582_v62  ;;  %v4319_v62 = vld [vmem:[#allocation2 + $0x3c] sm:$0xf] }
 0x22d   : > { %v6905_v10 = vpop.f32.mrf.mxu0  ;;  %v4289_v15 = vsel %vm9946_vm11, %v4095_v22, %v4288_v1  ;;  %v3754_v34 = vadd.f32 %v6900_v21, %v9791_v29  ;;  %4285 = vst.msk [vmem:[#allocation2 + $0x4] sm:$0xf] %vm3984_vm3, %v4094_v52  ;;  %v3937_v24 = vmax.f32 %v3917_v6, 0.0  ;;  %v9983_v20 = vpop.f32.mrf.mxu1  ;;  %v6596_v29 = vpack.c.bf16 %v3939_v16, %v3939_v16 }
 0x22e   : > { %4290 = vst [vmem:[#allocation2 + $0x8] sm:$0x1] %v4289_v15  ;;  %v4306_v25 = vsel %vm9918_vm9, %v4136_v35, %v4305_v47  ;;  %v4119_v50 = vor.u32 %v4117_v8, %v9970_v39  ;;  %v4120_v31 = vrot.slane %v9970_v39, 4  ;;  %v3859_v33 = vadd.f32 %v3858_v28, %v9909_v32  ;;  %v7585_v15 = vld [vmem:[%s10950_s5 + $0xa8] sm:$0xff]   ;;  %v7586_v39 = vld [vmem:[%s10950_s5 + $0xe0] sm:$0xff]  }
 0x22f   : > { %v6907_v58 = vpop.f32.mrf.mxu0  ;;  %4307 = vst [vmem:[#allocation2 + $0x24] sm:$0xf] %v4306_v25  ;;  %v3867_v21 = vadd.f32 %v7128_v38, %v3754_v34  ;;  %v6906_v48 = vadd.f32 %v6905_v10, %v6904_v36  ;;  %v6594_v41 = vpack.c.bf16 %v3937_v24, %v3937_v24  ;;  %v3757_v59 = vadd.f32 %v6903_v18, %v9797_v4  ;;  %v3874_v45 = vpop.f32.mrf.mxu1  ;;  %v4309_v36 = vld [vmem:[#allocation2 + $0x2c] sm:$0x1]  ;;  %v4302_v10 = vld [vmem:[#allocation2 + $0x20] sm:$0x1] }
 0x230   : > { %v4299_v3 = vsel %vm9918_vm9, %v4119_v50, %v4298_v7  ;;  %v3749_v55 = vadd.f32 %v9911_v23, %v9800_v61  ;;  %v4139_v38 = vshrl.u32 %v6596_v29, 16  ;;  %v4142_v32 = vshll.u32 %v6596_v29, 16  ;;  %v7584_v18 = vld [vmem:[%s10950_s5 + $0xe8] sm:$0xff]  }
 0x231   : > { %v6908_v37 = vpop.f32.mrf.mxu0  ;;  %4300 = vst [vmem:[#allocation2 + $0x18] sm:$0xf] %v4299_v3  ;;  %v3922_v28 = vadd.f32 %v9837_v56, %v3867_v21  ;;  %v3920_v2 = vadd.f32 %v9837_v56, %v3859_v33  ;;  %v4122_v19 = vshrl.u32 %v6594_v41, 16  ;;  %v4125_v40 = vshll.u32 %v6594_v41, 16  ;;  %v9999_v1 = vpop.f32.mrf.mxu1  ;;  %7010 = vmatprep.subr.bf16.mxu1 %v7584_v18  ;;  %v10019_v21 = vld [vmem:[#allocation2 + $0x10] sm:$0xf] }
 0x232   : > { %v3870_v4 = vadd.f32 %v7129_v26, %v3757_v59  ;;  %v3862_v63 = vadd.f32 %v3861_v14, %v3749_v55  ;;  %v4141_v61 = vrot.slane %v4139_v38, 7  ;;  %v6909_v8 = vadd.f32 %v6908_v37, %v6907_v58  ;;  %v7583_v26 = vld [vmem:[%s10950_s5] sm:$0xff]   ;;  %7011 = vmatpush3.bf16.msra.mxu1 %v7585_v15  ;;  %v4387_v37 = vld [vmem:[#allocation2 + $0xc] sm:$0xf] }
 0x233   : > { %v3942_v23 = vmax.f32 %v3922_v28, 0.0  ;;  %v3940_v49 = vmax.f32 %v3920_v2, 0.0  ;;  %v6910_v60 = vpop.f32.mrf.mxu0  ;;  %v4124_v57 = vrot.slane %v4122_v19, 7  ;;  %v3762_v9 = vadd.f32 %v6906_v48, %v9804_v11  ;;  %v3877_v25 = vpop.f32.mrf.mxu1  ;;  %6957 = vmatpush3.bf16.msra.mxu0 %v7583_v26  ;;  %v7587_v19 = vld [vmem:[%s10950_s5 + $0xa0] sm:$0xff]   ;;  %7012 = vmatprep.subr.bf16.mxu1 %v7586_v39 }
 0x234   : > { %v3923_v22 = vadd.f32 %v9837_v56, %v3870_v4  ;;  %v3921_v47 = vadd.f32 %v9837_v56, %v3862_v63  ;;  %v4144_v35 = vor.u32 %v4142_v32, %v4141_v61  ;;  %v4146_v6 = vrot.slane %v4141_v61, 4  ;;  %v4312_v4 = vld [vmem:[#allocation2 + $0x30] sm:$0xf]  ;;  %v4323_v18 = vld [vmem:[#allocation2 + $0x44] sm:$0x1] }
 0x235   : > { %v6599_v14 = vpack.c.bf16 %v3942_v23, %v3942_v23  ;;  %v6597_v52 = vpack.c.bf16 %v3940_v49, %v3940_v49  ;;  %v4127_v7 = vor.u32 %v4125_v40, %v4124_v57  ;;  %v4129_v16 = vrot.slane %v4124_v57, 4  ;;  %v6911_v29 = vpop.f32.mrf.mxu0  ;;  %v7136_v2 = vpop.f32.mrf.mxu1 }
 0x236   : > { %v3943_v11 = vmax.f32 %v3923_v22, 0.0  ;;  %v3941_v34 = vmax.f32 %v3921_v47, 0.0  ;;  %v4145_v50 = vsel %vm9935_vm10, %v4137_v13, %v4144_v35  ;;  %v4310_v24 = vsel %vm9946_vm11, %v4146_v6, %v4309_v36  ;;  %7013 = vmatpush3.bf16.msra.mxu1 %v7587_v19 }
 0x237   : > { %v4165_v58 = vshrl.u32 %v6599_v14, 16  ;;  %v4168_v30 = vshll.u32 %v6599_v14, 16  ;;  %4308 = vst.msk [vmem:[#allocation2 + $0x28] sm:$0xf] %vm3984_vm3, %v4145_v50  ;;  %4311 = vst [vmem:[#allocation2 + $0x2c] sm:$0x1] %v4310_v24  ;;  %v4128_v5 = vsel %vm9935_vm10, %v4120_v31, %v4127_v7  ;;  %v4303_v13 = vsel %vm9946_vm11, %v4129_v16, %v4302_v10  ;;  %v6913_v57 = vpop.f32.mrf.mxu0  ;;  %v3890_v14 = vpop.f32.mrf.mxu1 }
 0x238   : > { %v4148_v33 = vshrl.u32 %v6597_v52, 16  ;;  %v4151_v48 = vshll.u32 %v6597_v52, 16  ;;  %4301 = vst.msk [vmem:[#allocation2 + $0x1c] sm:$0xf] %vm3984_vm3, %v4128_v5  ;;  %4304 = vst [vmem:[#allocation2 + $0x20] sm:$0x1] %v4303_v13  ;;  %v6600_v41 = vpack.c.bf16 %v3943_v11, %v3943_v11  ;;  %v6598_v59 = vpack.c.bf16 %v3941_v34, %v3941_v34 }
 0x239   : > { %v4167_v3 = vrot.slane %v4165_v58, 7  ;;  %v3875_v55 = vadd.f32 %v3874_v45, %v3762_v9  ;;  %v6912_v31 = vadd.f32 %v6911_v29, %v6910_v60  ;;  %v3765_v32 = vadd.f32 %v6909_v8, %v9808_v0  ;;  %v10045_v9 = vld [vmem:[#allocation2 + $0xc] sm:$0xe]  ;;  %v4316_v7 = vld [vmem:[#allocation2 + $0x38] sm:$0x1]  ;;  %v6914_v58 = vpop.f32.mrf.mxu0 }
 0x23a   : > { %v4150_v38 = vrot.slane %v4148_v33, 7  ;;  %v10034_v28 = vcombine.low %v4387_v37, %v10019_v21  ;;  %v4173_v63 = vshrl.u32 %v6600_v41, 16  ;;  %v4176_v61 = vshll.u32 %v6600_v41, 16 }
 0x23b   : > { %v4170_v40 = vor.u32 %v4168_v30, %v4167_v3  ;;  %v4171_v45 = vrot.slane %v4167_v3, 4  ;;  %v4156_v36 = vshrl.u32 %v6598_v59, 16  ;;  %v4159_v60 = vshll.u32 %v6598_v59, 16  ;;  %v7137_v3 = vpop.f32.mrf.mxu1 }
 0x23c   : > { %v4153_v23 = vor.u32 %v4151_v48, %v4150_v38  ;;  %v4154_v49 = vrot.slane %v4150_v38, 4  ;;  %4716 = vrot.lane.b32.xlu0 %v10034_v28, %s7786_s13  ;;  %v4175_v8 = vrot.slane %v4173_v63, 7  ;;  %v3924_v22 = vadd.f32 %v9837_v56, %v3875_v55 }
 0x23d   : > { %v4320_v0 = vsel %vm9918_vm9, %v4170_v40, %v4319_v62  ;;  %v3770_v47 = vadd.f32 %v6912_v31, %v9813_v51  ;;  %v4158_v35 = vrot.slane %v4156_v36, 7  ;;  %v3878_v6 = vadd.f32 %v3877_v25, %v3765_v32  ;;  %v3893_v36 = vpop.f32.mrf.mxu1 }
 0x23e   : > { %4321 = vst [vmem:[#allocation2 + $0x3c] sm:$0xf] %v4320_v0  ;;  %v4313_v26 = vsel %vm9918_vm9, %v4153_v23, %v4312_v4  ;;  %v6506_v10 = vcombine.low %v10045_v9, %v10019_v21  ;;  %v4178_v52 = vor.u32 %v4176_v61, %v4175_v8  ;;  %v4180_v15 = vrot.slane %v4175_v8, 4  ;;  %v4326_v4 = vld [vmem:[#allocation2 + $0x48] sm:$0xf] }
 0x23f   : > { %4314 = vst [vmem:[#allocation2 + $0x30] sm:$0xf] %v4313_v26  ;;  %v3944_v16 = vmax.f32 %v3924_v22, 0.0  ;;  %v3883_v51 = vadd.f32 %v9983_v20, %v3770_v47  ;;  %v4161_v34 = vor.u32 %v4159_v60, %v4158_v35  ;;  %v4163_v50 = vrot.slane %v4158_v35, 4  ;;  %v4330_v47 = vld [vmem:[#allocation2 + $0x50] sm:$0x1] }
 0x240   : > { %v3925_v25 = vadd.f32 %v9837_v56, %v3878_v6  ;;  %v4179_v30 = vsel %vm9935_vm10, %v4171_v45, %v4178_v52  ;;  %v4324_v29 = vsel %vm9946_vm11, %v4180_v15, %v4323_v18  ;;  %v4759_v48 = vshll.u32 %v10034_v28, 16  ;;  %v4333_v35 = vld [vmem:[#allocation2 + $0x54] sm:$0xf] }
 0x241   : > { %v6601_v5 = vpack.c.bf16 %v3944_v16, %v3944_v16  ;;  %v3926_v20 = vadd.f32 %v9837_v56, %v3883_v51  ;;  %4322 = vst.msk [vmem:[#allocation2 + $0x40] sm:$0xf] %vm3984_vm3, %v4179_v30  ;;  %4325 = vst [vmem:[#allocation2 + $0x44] sm:$0x1] %v4324_v29  ;;  %v4162_v44 = vsel %vm9935_vm10, %v4154_v49, %v4161_v34  ;;  %v10092_v34 = vld [vmem:[#allocation2 + $0x4] sm:$0xf] }
 0x242   : > { %v4317_v13 = vsel %vm9946_vm11, %v4163_v50, %v4316_v7  ;;  %v3945_v33 = vmax.f32 %v3925_v25, 0.0  ;;  %4315 = vst.msk [vmem:[#allocation2 + $0x34] sm:$0xf] %vm3984_vm3, %v4162_v44  ;;  %v6915_v37 = vadd.f32 %v6914_v58, %v6913_v57  ;;  %v10072_v62 = vrot.slane %v4759_v48, 1 }
 0x243   : > { %4318 = vst [vmem:[#allocation2 + $0x38] sm:$0x1] %v4317_v13  ;;  %v4182_v41 = vshrl.u32 %v6601_v5, 16  ;;  %v4185_v59 = vshll.u32 %v6601_v5, 16  ;;  %v3946_v55 = vmax.f32 %v3926_v20, 0.0  ;;  %v3899_v38 = vadd.f32 %v7136_v2, %v9877_v54  ;;  %v10106_v13 = vld [vmem:[%s10950_s5 + $0x118] sm:$0xff]  }
 0x244   : > { %v6602_v39 = vpack.c.bf16 %v3945_v33, %v3945_v33  ;;  %v3891_v31 = vadd.f32 %v3890_v14, %v9866_v53  ;;  %v3773_v40 = vadd.f32 %v6915_v37, %v9817_v12  ;;  %v3902_v45 = vadd.f32 %v7137_v3, %v9900_v42  ;;  %v10098_v30 = vld [vmem:[#allocation2 + $0x8] ss:$0 sps:$4 sm:$0x11]   ;;  %11182 = vst [vmem:[#allocation17_spill] sm:$0xff] %v10106_v13 }
 0x245   : > { %v4184_v32 = vrot.slane %v4182_v41, 7  ;;  %v6603_v19 = vpack.c.bf16 %v3946_v55, %v3946_v55  ;;  %v3930_v23 = vadd.f32 %v9837_v56, %v3899_v38  ;;  %v3894_v18 = vadd.f32 %v3893_v36, %v9880_v46  ;;  %v7589_v55 = vld [vmem:[%s10950_s5 + $0xd8] sm:$0xff]   ;;  %7138 = vmatprep.subr.bf16.mxu0 %v10106_v13 }
 0x246   : > { %v4190_v63 = vshrl.u32 %v6602_v39, 16  ;;  %v4193_v61 = vshll.u32 %v6602_v39, 16  ;;  %v3928_v49 = vadd.f32 %v9837_v56, %v3891_v31  ;;  %v3886_v53 = vadd.f32 %v9999_v1, %v3773_v40  ;;  %v4347_v39 = vld [vmem:[#allocation2 + $0x6c] sm:$0xf]  ;;  %v4340_v31 = vld [vmem:[#allocation2 + $0x60] sm:$0xf]  ;;  %7014 = vmatprep.subr.bf16.mxu1 %v7589_v55 }
 0x247   : > { %v4187_v60 = vor.u32 %v4185_v59, %v4184_v32  ;;  %v4188_v57 = vrot.slane %v4184_v32, 4  ;;  %v4199_v0 = vshrl.u32 %v6603_v19, 16  ;;  %v4202_v54 = vshll.u32 %v6603_v19, 16  ;;  %v4354_v59 = vld [vmem:[#allocation2] sm:$0xf]  ;;  %7015 = vmatpush3.bf16.msra.mxu1 %v7591_v17  ;;  %v7596_v17 = vld [vmem:[%s10950_s5 + $0x88] sm:$0xff]  }
 0x248   : > { %v4192_v2 = vrot.slane %v4190_v63, 7  ;;  %v3950_v8 = vmax.f32 %v3930_v23, 0.0  ;;  %v3948_v22 = vmax.f32 %v3928_v49, 0.0  ;;  %v3931_v26 = vadd.f32 %v9837_v56, %v3902_v45  ;;  %v4364_v24 = vld [vmem:[#allocation2 + $0x3c] sm:$0xf] }
 0x249   : > { %v4327_v12 = vsel %vm9918_vm9, %v4187_v60, %v4326_v4  ;;  %v10083_v42 = vrot.slane %v4199_v0, 7  ;;  %v3927_v52 = vadd.f32 %v9837_v56, %v3886_v53  ;;  %v3929_v41 = vadd.f32 %v9837_v56, %v3894_v18  ;;  %v4337_v4 = vld [vmem:[#allocation2 + $0x5c] sm:$0x1] }
 0x24a   : > { %4328 = vst [vmem:[#allocation2 + $0x48] sm:$0xf] %v4327_v12  ;;  %v4195_v6 = vor.u32 %v4193_v61, %v4192_v2  ;;  %v4197_v14 = vrot.slane %v4192_v2, 4  ;;  %v3982_v1 = vsel %vm10054_vm12, 0.0, %v3950_v8  ;;  %v6605_v51 = vpack.c.bf16 %v3948_v22, %v3948_v22  ;;  %v4351_v8 = vld [vmem:[#allocation2 + $0x74] sm:$0x1] }
 0x24b   : > { %v4204_v15 = vor.u32 %v4202_v54, %v10083_v42  ;;  %v4205_v7 = vrot.slane %v10083_v42, 4  ;;  %v6607_v16 = vpack.c.bf16 %v3982_v1, %v3982_v1  ;;  %v3947_v25 = vmax.f32 %v3927_v52, 0.0  ;;  %v10127_v54 = vld [vmem:[#allocation2 + $0x1c] sm:$0xf]  ;;  %v4389_v52 = vld [vmem:[#allocation2 + $0x18] sm:$0xf] }
 0x24c   : > { %v4196_v46 = vsel %vm9935_vm10, %v4188_v57, %v4195_v6  ;;  %v4331_v50 = vsel %vm9946_vm11, %v4197_v14, %v4330_v47  ;;  %v3951_v58 = vmax.f32 %v3931_v26, 0.0  ;;  %v4216_v44 = vshrl.u32 %v6605_v51, 16  ;;  %v10135_v47 = vld [vmem:[#allocation2 + $0x10] sm:$0xf] }
 0x24d   : > { %v4334_v29 = vsel %vm9918_vm9, %v4204_v15, %v4333_v35  ;;  %4329 = vst.msk [vmem:[#allocation2 + $0x4c] sm:$0xf] %vm3984_vm3, %v4196_v46  ;;  %4332 = vst [vmem:[#allocation2 + $0x50] sm:$0x1] %v4331_v50  ;;  %v4233_v5 = vshrl.u32 %v6607_v16, 16  ;;  %v4236_v20 = vshll.u32 %v6607_v16, 16  ;;  %v6604_v33 = vpack.c.bf16 %v3947_v25, %v3947_v25 }
 0x24e   : > { %4335 = vst [vmem:[#allocation2 + $0x54] sm:$0xf] %v4334_v29  ;;  %v4219_v48 = vshll.u32 %v6605_v51, 16  ;;  %v3983_v3 = vsel %vm10054_vm12, 0.0, %v3951_v58  ;;  %v10116_v38 = vrot.slane %v4216_v44, 7  ;;  %v10119_v19 = vcombine.low %v4354_v59, %v10092_v34  ;;  %v7592_v50 = vld [vmem:[%s10950_s5 + $0xd0] sm:$0xff]  }
 0x24f   : > { %v10114_v37 = vrot.slane %v4233_v5, 7  ;;  %v6608_v32 = vpack.c.bf16 %v3983_v3, %v3983_v3  ;;  %v4207_v11 = vshrl.u32 %v6604_v33, 16  ;;  %v4210_v40 = vshll.u32 %v6604_v33, 16  ;;  %v10137_v26 = vld [vmem:[#allocation2 + $0x14] ss:$0 sps:$4 sm:$0x11]   ;;  %7016 = vmatprep.subr.bf16.mxu1 %v7592_v50 }
 0x250   : > { %11183 = vst [vmem:[#allocation29_spill] sm:$0xff] %v10119_v19  ;;  %v3949_v56 = vmax.f32 %v3929_v41, 0.0  ;;  %v4524_v45 = vshll.u32 %v10098_v30, 16  ;;  %v4221_v23 = vor.u32 %v4219_v48, %v10116_v38  ;;  %v4222_v49 = vrot.slane %v10116_v38, 4  ;;  %v4356_v46 = vld [vmem:[#allocation2 + $0xc] sm:$0xf] }
 0x251   : > { %v4238_v63 = vor.u32 %v4236_v20, %v10114_v37  ;;  %v4239_v61 = vrot.slane %v10114_v37, 4  ;;  %v4209_v36 = vrot.slane %v4207_v11, 7  ;;  %v4241_v60 = vshrl.u32 %v6608_v32, 16  ;;  %v4344_v20 = vld [vmem:[#allocation2 + $0x68] sm:$0x1]  ;;  %v7593_v59 = vld [vmem:[%s10950_s5 + $0x90] sm:$0xff]  }
 0x252   : > { %v4244_v57 = vshll.u32 %v6608_v32, 16  ;;  %v6606_v0 = vpack.c.bf16 %v3949_v56, %v3949_v56  ;;  %v4341_v53 = vsel %vm9918_vm9, %v4221_v23, %v4340_v31  ;;  %v4517_v22 = vshrl.u32 %v10119_v19, 16  ;;  %v10154_v44 = vld [vmem:[#allocation2 + $0x18] sm:$0xe]  ;;  %v4391_v3 = vld [vmem:[#allocation2 + $0x24] sm:$0xf]  ;;  %7017 = vmatpush3.bf16.msra.mxu1 %v7593_v59 }
 0x253   : > { %v4348_v2 = vsel %vm9918_vm9, %v4238_v63, %v4347_v39  ;;  %v4519_v12 = vshll.u32 %v10119_v19, 16  ;;  %v4212_v18 = vor.u32 %v4210_v40, %v4209_v36  ;;  %v4214_v35 = vrot.slane %v4209_v36, 4  ;;  %4342 = vst [vmem:[#allocation2 + $0x60] sm:$0xf] %v4341_v53  ;;  %v10162_v41 = vld [vmem:[#allocation2 + $0x28] sm:$0xf] }
 0x254   : > { %4349 = vst [vmem:[#allocation2 + $0x6c] sm:$0xf] %v4348_v2  ;;  %v4243_v6 = vrot.slane %v4241_v60, 7  ;;  %v4224_v14 = vshrl.u32 %v6606_v0, 16  ;;  %v4227_v1 = vshll.u32 %v6606_v0, 16  ;;  %v4526_v16 = vrot.slane %v4524_v45, 1 }
 0x255   : > { %v4521_v15 = vrot.slane %v4519_v12, 1  ;;  %v10143_v51 = vcombine.low %v4389_v52, %v10127_v54  ;;  %v4213_v25 = vsel %vm9935_vm10, %v4205_v7, %v4212_v18  ;;  %v4338_v58 = vsel %vm9946_vm11, %v4214_v35, %v4337_v4  ;;  %v10175_v32 = vld [vmem:[#allocation2 + $0x24] sm:$0xe]  ;;  %v10177_v11 = vld [vmem:[#allocation2 + $0x20] ss:$0 sps:$4 sm:$0x11]  }
 0x256   : > { %v4246_v29 = vor.u32 %v4244_v57, %v4243_v6  ;;  %v4248_v5 = vrot.slane %v4243_v6, 4  ;;  %4336 = vst.msk [vmem:[#allocation2 + $0x58] sm:$0xf] %vm3984_vm3, %v4213_v25  ;;  %4339 = vst [vmem:[#allocation2 + $0x5c] sm:$0x1] %v4338_v58  ;;  %v4226_v33 = vrot.slane %v4224_v14, 7  ;;  %v6507_v42 = vcombine.low %v10154_v44, %v10127_v54 }
 0x257   : > { %v4522_v48 = vor.u32 %v4521_v15, %v4517_v22  ;;  %4718 = vrot.lane.b32.xlu0 %v10143_v51, %s7786_s13  ;;  %v4771_v39 = vshll.u32 %v10143_v51, 16  ;;  %v10173_v31 = vcombine.low %v4356_v46, %v10135_v47  ;;  %v10179_v40 = vld [vmem:[#allocation2 + $0x28] sm:$0xf]  ;;  %v4358_v23 = vld [vmem:[#allocation2 + $0x18] sm:$0xf]  ;;  %v10195_v2 = vcombine.low %v4391_v3, %v10162_v41  ;;  %v7597_v15 = vld [vmem:[%s10950_s5 + $0xc0] sm:$0xff]  }
 0x258   : > { %v4247_v55 = vsel %vm9935_vm10, %v4239_v61, %v4246_v29  ;;  %v4352_v37 = vsel %vm9946_vm11, %v4248_v5, %v4351_v8  ;;  %v7594_v56 = vld [vmem:[%s10950_s5 + $0xc8] sm:$0xff]   ;;  %v4229_v45 = vor.u32 %v4227_v1, %v4226_v33  ;;  %v4231_v4 = vrot.slane %v4226_v33, 4  ;;  %v10187_v36 = vld [vmem:[#allocation2 + $0x1c] sm:$0xf]  ;;  %v4394_v53 = vld [vmem:[#allocation2 + $0x34] sm:$0xf] }
 0x259   : > { %11184 = vst [vmem:[#allocation19_spill] sm:$0xff] %v10173_v31  ;;  %4350 = vst.msk [vmem:[#allocation2 + $0x70] sm:$0xf] %vm3984_vm3, %v4247_v55  ;;  %v4527_v63 = vsel %vm546_vm0, %v4522_v48, %v4526_v16  ;;  %v4536_v61 = vshll.u32 %v10137_v26, 16  ;;  %v10190_v60 = vrot.slane %v4771_v39, 1  ;;  %v4529_v57 = vshrl.u32 %v10173_v31, 16  ;;  %7018 = vmatprep.subr.bf16.mxu1 %v7594_v56 }
 0x25a   : > { %4353 = vst [vmem:[#allocation2 + $0x74] sm:$0x1] %v4352_v37  ;;  %4612 = vrot.lane.b32.xlu1 %v4527_v63, %s7786_s13  ;;  %v4531_v0 = vshll.u32 %v10173_v31, 16  ;;  %v4360_v8 = vld [vmem:[#allocation2 + $0x24] sm:$0xf]  ;;  %v4230_v22 = vsel %vm9935_vm10, %v4222_v49, %v4229_v45  ;;  %v4345_v12 = vsel %vm9946_vm11, %v4231_v4, %v4344_v20  ;;  %v4783_v38 = vshll.u32 %v10195_v2, 16  ;;  %7019 = vmatpush3.bf16.msra.mxu1 %v7596_v17 }
 0x25b   : > { %v4538_v18 = vrot.slane %v4536_v61, 1  ;;  %v4393_v6 = vld [vmem:[#allocation2 + $0x30] sm:$0xf]  ;;  %v10205_v52 = vld [vmem:[#allocation2 + $0x2c] ss:$0 sps:$4 sm:$0x11]   ;;  %4720 = vrot.lane.b32.xlu0 %v10195_v2, %s7786_s13  ;;  %v10216_v49 = vcombine.low %v4358_v23, %v10187_v36  ;;  %v10227_v25 = vcombine.low %v4360_v8, %v10179_v40  ;;  %7020 = vmatprep.subr.bf16.mxu1 %v7597_v15 }
 0x25c   : > { %v4414_v14 = vld [vmem:[#allocation2 + $0x30] sm:$0xe]  ;;  %4343 = vst.msk [vmem:[#allocation2 + $0x64] sm:$0xf] %vm3984_vm3, %v4230_v22  ;;  %4346 = vst [vmem:[#allocation2 + $0x68] sm:$0x1] %v4345_v12  ;;  %v10224_v46 = vcombine.low %v4393_v6, %v4394_v53 }
 0x25d   : > { %v4533_v27 = vrot.slane %v4531_v0, 1  ;;  %11185 = vst [vmem:[#allocation12_spill] sm:$0xff] %v10216_v49  ;;  %v10218_v1 = vld [vmem:[#allocation2 + $0x14] ss:$0 sps:$4 sm:$0x11]   ;;  %v4548_v16 = vshll.u32 %v10177_v11, 16  ;;  %v6509_v50 = vcombine.low %v4414_v14, %v4394_v53 }
 0x25e   : > { %11186 = vst [vmem:[#allocation20_spill] sm:$0xff] %v10227_v25  ;;  %v10229_v58 = vld [vmem:[#allocation2 + $0x20] ss:$0 sps:$4 sm:$0x11]   ;;  %v10231_v5 = vrot.slane %v4783_v38, 1  ;;  %v4541_v20 = vshrl.u32 %v10216_v49, 16 }
 0x25f   : > { %11187 = vst [vmem:[#allocation31_spill] sm:$0xff] %v10229_v58  ;;  %v4534_v29 = vor.u32 %v4533_v27, %v4529_v57  ;;  %v4543_v33 = vshll.u32 %v10216_v49, 16  ;;  %v10235_v48 = vld [vmem:[#allocation2 + $0x1c] sm:$0xf]  ;;  %v7598_v3 = vld [vmem:[%s10950_s5 + $0x80] sm:$0xff]   ;;  %v4550_v59 = vrot.slane %v4548_v16, 1  ;;  %4722 = vrot.lane.b32.xlu0 %v10224_v46, %s7786_s13 }
 0x260   : > { %11188 = vst [vmem:[#allocation15_spill] sm:$0xff] %v10235_v48  ;;  %v10240_v55 = vrot.slane %v6509_v50, 1  ;;  %v4795_v39 = vshll.u32 %v10224_v46, 16  ;;  %v4420_v56 = vld [vmem:[#allocation2 + $0x18] sm:$0xf]  ;;  %v4553_v63 = vshrl.u32 %v10227_v25, 16  ;;  %7021 = vmatpush3.bf16.msra.mxu1 %v7598_v3 }
 0x261   : > { %v4539_v45 = vsel %vm546_vm0, %v4534_v29, %v4538_v18  ;;  %v4545_v4 = vrot.slane %v4543_v33, 1  ;;  %v4555_v61 = vshll.u32 %v10227_v25, 16  ;;  %v4396_v23 = vld [vmem:[#allocation2 + $0x40] sm:$0xf]  ;;  %v4560_v0 = vshll.u32 %v10205_v52, 16 }
 0x262   : > { %4614 = vrot.lane.b32.xlu1 %v4539_v45, %s7786_s13  ;;  %v10250_v57 = vrot.slane %v4795_v39, 1  ;;  %v10254_v53 = vcombine.low %v4420_v56, %v10235_v48  ;;  %v4988_v8 = vshll.u32 %v10229_v58, 16  ;;  %v4395_v22 = vld [vmem:[#allocation2 + $0x3c] sm:$0xf]  ;;  %v4876_v14 = vrot.slane %v6506_v10, 1 }
 0x263   : > { %v10257_v12 = vld [vmem:[#allocation2 + $0x38] ss:$0 sps:$4 sm:$0x11]   ;;  %v4546_v18 = vor.u32 %v4545_v4, %v4541_v20  ;;  %v4557_v6 = vrot.slane %v4555_v61, 1  ;;  %v4877_v17 = vrot.slane %v10218_v1, 1  ;;  %v4562_v16 = vrot.slane %v4560_v0, 1 }
 0x264   : > { %11189 = vst [vmem:[#allocation7_spill] sm:$0xff] %v10254_v53  ;;  %v4415_v27 = vld [vmem:[#allocation2 + $0x3c] sm:$0xe]  ;;  %v4362_v38 = vld [vmem:[#allocation2 + $0x30] sm:$0xf]  ;;  %v4981_v50 = vshrl.u32 %v10254_v53, 16  ;;  %v10269_v9 = vcombine.low %v4395_v22, %v4396_v23 }
 0x265   : > { %v10263_v15 = vld [vmem:[#allocation2 + $0x34] sm:$0xf]  ;;  %v4983_v29 = vshll.u32 %v10254_v53, 16  ;;  %v4990_v33 = vrot.slane %v4988_v8, 1  ;;  %v4422_v39 = vld [vmem:[#allocation2 + $0x24] sm:$0xf]  ;;  %v4551_v56 = vsel %vm546_vm0, %v4546_v18, %v4550_v59  ;;  %v4558_v45 = vor.u32 %v4557_v6, %v4553_v63 }
 0x266   : > { %v4423_v20 = vld [vmem:[#allocation2 + $0x28] sm:$0xf]  ;;  %v4878_v21 = vsel %vm717_vm1, %v4876_v14, %v4877_v17  ;;  %v10271_v10 = vld [vmem:[#allocation2 + $0x2c] ss:$0 sps:$4 sm:$0x11]   ;;  %4616 = vrot.lane.b32.xlu1 %v4551_v56, %s7786_s13  ;;  %v6510_v4 = vcombine.low %v4415_v27, %v4396_v23  ;;  %v10275_v61 = vcombine.low %v4362_v38, %v10263_v15  ;;  %v4572_v0 = vshll.u32 %v10257_v12, 16 }
 0x267   : > { %11190 = vst [vmem:[#allocation22_spill] sm:$0xff] %v10271_v10  ;;  %v4985_v3 = vrot.slane %v4983_v29, 1  ;;  %v10278_v8 = vld [vmem:[#allocation2 + $0x20] ss:$0 sps:$4 sm:$0x11]   ;;  %v4563_v59 = vsel %vm546_vm0, %v4558_v45, %v4562_v16  ;;  %v4807_v22 = vshll.u32 %v10269_v9, 16  ;;  %v10283_v6 = vcombine.low %v4422_v39, %v4423_v20 }
 0x268   : > { %11191 = vst [vmem:[#allocation18_spill] sm:$0xff] %v10275_v61  ;;  %v4445_v18 = vld [vmem:[#allocation2 + $0x24] sm:$0xe]  ;;  %v10285_v17 = vrot.slane %v6510_v4, 1  ;;  %v4565_v23 = vshrl.u32 %v10275_v61, 16  ;;  %v4567_v27 = vshll.u32 %v10275_v61, 16 }
 0x269   : > { %11192 = vst [vmem:[#allocation26_spill] sm:$0xff] %v10283_v6  ;;  %v4986_v14 = vor.u32 %v4985_v3, %v4981_v50  ;;  %v10289_v38 = vld [vmem:[#allocation2 + $0x40] sm:$0xf]  ;;  %v10291_v29 = vld [vmem:[#allocation2 + $0x44] ss:$0 sps:$4 sm:$0x11]   ;;  %v6531_v43 = vcombine.low %v4445_v18, %v4423_v20 }
 0x26a   : > { %v10293_v56 = vrot.slane %v4807_v22, 1  ;;  %v4574_v16 = vrot.slane %v4572_v0, 1  ;;  %v4993_v45 = vshrl.u32 %v10283_v6, 16  ;;  %v4995_v63 = vshll.u32 %v10283_v6, 16  ;;  %v4397_v39 = vld [vmem:[#allocation2 + $0x48] sm:$0xf]  ;;  %4618 = vrot.lane.b32.xlu1 %v4563_v59, %s7786_s13 }
 0x26b   : > { %v4398_v37 = vld [vmem:[#allocation2 + $0x4c] sm:$0xf]  ;;  %v4991_v50 = vsel %vm546_vm0, %v4986_v14, %v4990_v33  ;;  %v4569_v3 = vrot.slane %v4567_v27, 1  ;;  %v5000_v4 = vshll.u32 %v10271_v10, 16  ;;  %v4416_v7 = vld [vmem:[#allocation2 + $0x48] sm:$0xe]  ;;  %v10318_v6 = vcombine.low %v4364_v24, %v10289_v38 }
 0x26c   : > { %11193 = vst [vmem:[#allocation21_spill] sm:$0xff] %v10293_v56  ;;  %v10300_v35 = vld [vmem:[#allocation2 + $0x38] ss:$0 sps:$4 sm:$0x11]   ;;  %5076 = vrot.lane.b32.xlu0 %v4991_v50, %s7786_s13  ;;  %v4997_v0 = vrot.slane %v4995_v63, 1  ;;  %v4879_v61 = vrot.slane %v6507_v42, 1  ;;  %v10312_v18 = vcombine.low %v4397_v39, %v4398_v37  ;;  %v6511_v22 = vcombine.low %v4416_v7, %v4398_v37 }
 0x26d   : > { %11194 = vst [vmem:[#allocation8_spill] sm:$0xff] %v10300_v35  ;;  %v4880_v59 = vrot.slane %v10278_v8, 1  ;;  %v10308_v33 = vld [vmem:[#allocation2 + $0x34] sm:$0xf]  ;;  %v4570_v14 = vor.u32 %v4569_v3, %v4565_v23  ;;  %v5002_v27 = vrot.slane %v5000_v4, 1  ;;  %v10310_v20 = vrot.slane %v6531_v43, 1 }
 0x26e   : > { %11195 = vst [vmem:[#allocation25_spill] sm:$0xff] %v10308_v33  ;;  %11197 = vst [vmem:[#allocation24_spill] sm:$0xff] %v10312_v18  ;;  %v10314_v25 = vld [vmem:[#allocation2 + $0x2c] ss:$0 sps:$4 sm:$0x11]   ;;  %v4998_v50 = vor.u32 %v4997_v0, %v4993_v45  ;;  %4900 = vrot.lane.b32.xlu1 %v4878_v21, %s7786_s13  ;;  %v4819_v45 = vshll.u32 %v10312_v18, 16 }
 0x26f   : > { %11196 = vst [vmem:[#allocation13_spill] sm:$0xff] %v10310_v20  ;;  %v4881_v63 = vsel %vm717_vm1, %v4879_v61, %v4880_v59  ;;  %11198 = vst [vmem:[#allocation27_spill] sm:$0xff] %v10318_v6  ;;  %v4424_v54 = vld [vmem:[#allocation2 + $0x30] sm:$0xf]  ;;  %v10320_v44 = vld [vmem:[#allocation2 + $0x58] sm:$0xf]  ;;  %v4575_v43 = vsel %vm546_vm0, %v4570_v14, %v4574_v16 }
 0x270   : > { %v10322_v42 = vld [vmem:[#allocation2 + $0x4c] sm:$0xf]  ;;  %v10324_v23 = vld [vmem:[#allocation2 + $0x50] ss:$0 sps:$4 sm:$0x11]   ;;  %v4584_v7 = vshll.u32 %v10291_v29, 16  ;;  %4724 = vrot.lane.b32.xlu0 %v10269_v9, %s7786_s13  ;;  %v5003_v61 = vsel %vm546_vm0, %v4998_v50, %v5002_v27  ;;  %v10345_v39 = vcombine.low %v4424_v54, %v10308_v33 }
 0x271   : > { %v4399_v37 = vld [vmem:[#allocation2 + $0x54] sm:$0xf]  ;;  %v10331_v24 = vld [vmem:[#allocation2 + $0x40] sm:$0xf]  ;;  %v10336_v3 = vrot.slane %v6511_v22, 1  ;;  %v4577_v21 = vshrl.u32 %v10318_v6, 16  ;;  %v11203_v22 = vcombine.low %v10175_v32, %v10162_v41 }
 0x272   : > { %11199 = vst [vmem:[#allocation30_spill] sm:$0xff] %v10331_v24  ;;  %v4579_v16 = vshll.u32 %v10318_v6, 16  ;;  %v4366_v4 = vld [vmem:[#allocation2 + $0x48] sm:$0xf]  ;;  %v10342_v59 = vrot.slane %v4819_v45, 1  ;;  %v4586_v14 = vrot.slane %v4584_v7, 1  ;;  %v10353_v6 = vcombine.low %v4399_v37, %v10320_v44  ;;  %4620 = vrot.lane.b32.xlu1 %v4575_v43, %s7786_s13 }
 0x273   : > { %v10340_v0 = vld [vmem:[#allocation2 + $0x44] ss:$0 sps:$4 sm:$0x11]   ;;  %11202 = vst [vmem:[#allocation14_spill] sm:$0xff] %v10345_v39  ;;  %v5012_v49 = vshll.u32 %v10300_v35, 16  ;;  %v4882_v27 = vrot.slane %v11203_v22, 1 }
 0x274   : > { %11200 = vst [vmem:[#allocation28_spill] sm:$0xff] %v10340_v0  ;;  %11201 = vst [vmem:[#allocation16_spill] sm:$0xff] %v10342_v59  ;;  %v4426_v53 = vld [vmem:[#allocation2 + $0x3c] sm:$0xf]  ;;  %v4581_v31 = vrot.slane %v4579_v16, 1  ;;  %v4883_v50 = vrot.slane %v10314_v25, 1  ;;  %v10361_v16 = vcombine.low %v4366_v4, %v10322_v42  ;;  %5078 = vrot.lane.b32.xlu0 %v5003_v61, %s7786_s13 }
 0x275   : > { %11204 = vst [vmem:[#allocation23_spill] sm:$0xff] %v10353_v6  ;;  %v10355_v13 = vld [vmem:[#allocation2 + $0x38] ss:$0 sps:$4 sm:$0x11]   ;;  %v5005_v54 = vshrl.u32 %v10345_v39, 16  ;;  %v5007_v45 = vshll.u32 %v10345_v39, 16  ;;  %v10373_v35 = vcombine.low %v4426_v53, %v10331_v24 }
 0x276   : > { %v5014_v7 = vrot.slane %v5012_v49, 1  ;;  %11205 = vst [vmem:[#allocation11_spill] sm:$0xff] %v10361_v16  ;;  %v10363_v19 = vld [vmem:[#allocation2 + $0x64] sm:$0xf]  ;;  %v10365_v41 = vld [vmem:[#allocation2 + $0x4c] sm:$0xf]  ;;  %v4582_v37 = vor.u32 %v4581_v31, %v4577_v21  ;;  %v4884_v22 = vsel %vm717_vm1, %v4882_v27, %v4883_v50  ;;  %4902 = vrot.lane.b32.xlu1 %v4881_v63, %s7786_s13 }
 0x277   : > { %11206 = vst [vmem:[#allocation33_spill] sm:$0xff] %v10365_v41  ;;  %v10367_v32 = vld [vmem:[#allocation2 + $0x50] ss:$0 sps:$4 sm:$0x11]   ;;  %v4596_v43 = vshll.u32 %v10324_v23, 16  ;;  %11208 = vst [vmem:[#allocation34_spill] sm:$0xff] %v10373_v35 }
 0x278   : > { %11207 = vst [vmem:[#allocation35_spill] sm:$0xff] %v10367_v32  ;;  %v10375_v49 = vld [vmem:[#allocation2 + $0x58] sm:$0xf]  ;;  %v5009_v4 = vrot.slane %v5007_v45, 1  ;;  %v4589_v39 = vshrl.u32 %v10361_v16, 16  ;;  %v4591_v33 = vshll.u32 %v10361_v16, 16  ;;  %v4587_v31 = vsel %vm546_vm0, %v4582_v37, %v4586_v14  ;;  %4726 = vrot.lane.b32.xlu0 %v10312_v18, %s7786_s13 }
 0x279   : > { %v5024_v20 = vshll.u32 %v10340_v0, 16  ;;  %v4401_v10 = vld [vmem:[#allocation2 + $0x60] sm:$0xf]  ;;  %v4428_v58 = vld [vmem:[#allocation2 + $0x48] sm:$0xf]  ;;  %v4598_v61 = vrot.slane %v4596_v43, 1 }
 0x27a   : > { %v5017_v21 = vshrl.u32 %v10373_v35, 16  ;;  %v5019_v27 = vshll.u32 %v10373_v35, 16  ;;  %v4368_v53 = vld [vmem:[#allocation2 + $0x54] sm:$0xf]  ;;  %v5010_v45 = vor.u32 %v5009_v4, %v5005_v54  ;;  %v4593_v24 = vrot.slane %v4591_v33, 1  ;;  %4622 = vrot.lane.b32.xlu1 %v4587_v31, %s7786_s13 }
 0x27b   : > { %v10383_v50 = vld [vmem:[#allocation2 + $0x5c] ss:$0 sps:$4 sm:$0x11]   ;;  %v5026_v48 = vrot.slane %v5024_v20, 1  ;;  %v4886_v16 = vrot.slane %v10355_v13, 1  ;;  %v10392_v37 = vcombine.low %v4401_v10, %v10363_v19  ;;  %v10395_v43 = vcombine.low %v4428_v58, %v10365_v41 }
 0x27c   : > { %11209 = vst [vmem:[#allocation40_spill] sm:$0xff] %v10383_v50  ;;  %v10387_v0 = vld [vmem:[#allocation2 + $0x58] sm:$0xf]  ;;  %v5021_v14 = vrot.slane %v5019_v27, 1  ;;  %v5036_v35 = vshll.u32 %v10367_v32, 16  ;;  %v5015_v33 = vsel %vm546_vm0, %v5010_v45, %v5014_v7  ;;  %v4594_v20 = vor.u32 %v4593_v24, %v4589_v39 }
 0x27d   : > { %11210 = vst [vmem:[#allocation37_spill] sm:$0xff] %v10387_v0  ;;  %11211 = vst [vmem:[#allocation41_spill] sm:$0xff] %v10395_v43  ;;  %v10398_v63 = vld [vmem:[#allocation2 + $0x5c] ss:$0 sps:$4 sm:$0x11]   ;;  %v10403_v54 = vsel %vm717_vm1, %v10240_v55, %v4886_v16  ;;  %v10406_v4 = vcombine.low %v4368_v53, %v10375_v49  ;;  %v5029_v58 = vshrl.u32 %v10395_v43, 16  ;;  %5080 = vrot.lane.b32.xlu0 %v5015_v33, %s7786_s13 }
 0x27e   : > { %11212 = vst [vmem:[#allocation36_spill] sm:$0xff] %v10398_v63  ;;  %v4430_v27 = vld [vmem:[#allocation2 + $0x54] sm:$0xf]  ;;  %v10408_v10 = vld [vmem:[#allocation2 + $0x44] ss:$0 sps:$4 sm:$0x11]   ;;  %v5022_v59 = vor.u32 %v5021_v14, %v5017_v21  ;;  %v4599_v55 = vsel %vm546_vm0, %v4594_v20, %v4598_v61  ;;  %4904 = vrot.lane.b32.xlu1 %v4884_v22, %s7786_s13 }
 0x27f   : > { %11213 = vst [vmem:[#allocation38_spill] sm:$0xff] %v10406_v4  ;;  %v5031_v32 = vshll.u32 %v10395_v43, 16  ;;  %v5038_v41 = vrot.slane %v5036_v35, 1  ;;  %v4432_v18 = vld [vmem:[#allocation2 + $0x60] sm:$0xf]  ;;  %v4601_v39 = vshrl.u32 %v10406_v4, 16  ;;  %v10424_v53 = vcombine.low %v4430_v27, %v10387_v0 }
 0x280   : > { %v10412_v56 = vld [vmem:[#allocation2 + $0x64] sm:$0xf]  ;;  %v4603_v24 = vshll.u32 %v10406_v4, 16  ;;  %v4608_v7 = vshll.u32 %v10383_v50, 16  ;;  %v5027_v21 = vsel %vm546_vm0, %v5022_v59, %v5026_v48  ;;  %v5048_v31 = vshll.u32 %v10398_v63, 16 }
 0x281   : > { %11214 = vst [vmem:[#allocation32_spill] sm:$0xff] %v10412_v56  ;;  %v10419_v16 = vld [vmem:[#allocation2 + $0x68] ss:$0 sps:$4 sm:$0x11]   ;;  %v5033_v35 = vrot.slane %v5031_v32, 1  ;;  %11215 = vst [vmem:[#allocation42_spill] sm:$0xff] %v10424_v53  ;;  %v10431_v4 = vcombine.low %v4432_v18, %v10412_v56  ;;  %4728 = vrot.lane.b32.xlu0 %v10353_v6, %s7786_s13 }
 0x282   : > { %v10427_v45 = vld [vmem:[#allocation2 + $0x50] ss:$0 sps:$4 sm:$0x11]   ;;  %v4605_v61 = vrot.slane %v4603_v24, 1  ;;  %v4610_v14 = vrot.slane %v4608_v7, 1  ;;  %v4889_v20 = vrot.slane %v10408_v10, 1  ;;  %4624 = vrot.lane.b32.xlu1 %v4599_v55, %s7786_s13 }
 0x283   : > { %11216 = vst [vmem:[#allocation39_spill] sm:$0xff] %v10431_v4  ;;  %v10433_v43 = vld [vmem:[#allocation2 + $0x74] ss:$0 sps:$4 sm:$0x11]   ;;  %v5034_v33 = vor.u32 %v5033_v35, %v5029_v58  ;;  %v5041_v48 = vshrl.u32 %v10424_v53, 16  ;;  %v5043_v59 = vshll.u32 %v10424_v53, 16 }
 0x284   : > { %v5050_v32 = vrot.slane %v5048_v31, 1  ;;  %v10437_v27 = vld [vmem:[#allocation2 + $0x70] sm:$0xf]  ;;  %v4606_v63 = vor.u32 %v4605_v61, %v4601_v39  ;;  %v10442_v24 = vsel %vm717_vm1, %v10285_v17, %v4889_v20  ;;  %v5053_v18 = vshrl.u32 %v10431_v4, 16  ;;  %v4434_v56 = vld [vmem:[#allocation2 + $0x6c] sm:$0xf] }
 0x285   : > { %v5055_v7 = vshll.u32 %v10431_v4, 16  ;;  %v4417_v58 = vld [vmem:[#allocation2 + $0x54] sm:$0xe]  ;;  %v5039_v35 = vsel %vm546_vm0, %v5034_v33, %v5038_v41  ;;  %v5045_v31 = vrot.slane %v5043_v59, 1  ;;  %v5060_v53 = vshll.u32 %v10419_v16, 16  ;;  %5082 = vrot.lane.b32.xlu0 %v5027_v21, %s7786_s13 }
 0x286   : > { %v4892_v22 = vrot.slane %v10427_v45, 1  ;;  %v10451_v39 = vld [vmem:[#allocation2 + $0x5c] ss:$0 sps:$4 sm:$0x11]   ;;  %v4611_v17 = vsel %vm546_vm0, %v4606_v63, %v4610_v14  ;;  %v10455_v20 = vcombine.low %v4434_v56, %v10437_v27  ;;  %v5072_v4 = vshll.u32 %v10433_v43, 16  ;;  %4906 = vrot.lane.b32.xlu1 %v10403_v54, %s7786_s13 }
 0x287   : > { %v5057_v61 = vrot.slane %v5055_v7, 1  ;;  %v10458_v0 = vld [vmem:[#allocation2 + $0x68] ss:$0 sps:$4 sm:$0x11]   ;;  %v5046_v6 = vor.u32 %v5045_v31, %v5041_v48  ;;  %v5062_v50 = vrot.slane %v5060_v53, 1  ;;  %v6512_v33 = vcombine.low %v4417_v58, %v10320_v44 }
 0x288   : > { %v10462_v41 = vsel %vm717_vm1, %v10336_v3, %v4892_v22  ;;  %v5065_v63 = vshrl.u32 %v10455_v20, 16  ;;  %v5067_v56 = vshll.u32 %v10455_v20, 16  ;;  %v5074_v14 = vrot.slane %v5072_v4, 1  ;;  %v4418_v7 = vld [vmem:[#allocation2 + $0x60] sm:$0xe] }
 0x289   : > { %v5058_v59 = vor.u32 %v5057_v61, %v5053_v18  ;;  %v5051_v48 = vsel %vm546_vm0, %v5046_v6, %v5050_v32  ;;  %v4894_v53 = vrot.slane %v6512_v33, 1  ;;  %v4895_v31 = vrot.slane %v10451_v39, 1  ;;  %v4378_v22 = vld [vmem:[#allocation2] sm:$0xe]  ;;  %v4379_v4 = vld [vmem:[#allocation2 + $0xc] sm:$0xe]  ;;  %4730 = vrot.lane.b32.xlu0 %v10392_v37, %s7786_s13 }
 0x28a   : > { %v6513_v3 = vcombine.low %v4418_v7, %v10363_v19  ;;  %v5069_v55 = vrot.slane %v5067_v56, 1  ;;  %v4898_v18 = vrot.slane %v10458_v0, 1  ;;  %v6482_v58 = vcombine.low %v4378_v22, %v10092_v34  ;;  %v4380_v33 = vld [vmem:[#allocation2 + $0x18] sm:$0xe]  ;;  %4626 = vrot.lane.b32.xlu1 %v4611_v17, %s7786_s13  ;;  %v4383_v17 = vld [vmem:[#allocation2 + $0x3c] sm:$0xe] }
 0x28b   : > { %v10473_v44 = vsel %vm546_vm0, %v5058_v59, %v5062_v50  ;;  %v10478_v61 = vsel %vm717_vm1, %v4894_v53, %v4895_v31  ;;  %v4653_v6 = vrot.slane %v10098_v30, 1  ;;  %v6483_v32 = vcombine.low %v4379_v4, %v10135_v47  ;;  %v4381_v31 = vld [vmem:[#allocation2 + $0x24] sm:$0xe] }
 0x28c   : > { %v4897_v21 = vrot.slane %v6513_v3, 1  ;;  %v5070_v19 = vor.u32 %v5069_v55, %v5065_v63  ;;  %v4652_v50 = vrot.slane %v6482_v58, 1  ;;  %v4656_v59 = vrot.slane %v10137_v26, 1 }
 0x28d   : > { %v6484_v56 = vcombine.low %v4380_v33, %v10187_v36  ;;  %v4655_v7 = vrot.slane %v6483_v32, 1  ;;  %v4659_v30 = vrot.slane %v10177_v11, 1  ;;  %v11217_v47 = vshrl.u32 %v10034_v28, 16  ;;  %5084 = vrot.lane.b32.xlu0 %v5039_v35, %s7786_s13 }
 0x28e   : > { %v10489_v34 = vsel %vm717_vm1, %v4897_v21, %v4898_v18  ;;  %v10496_v54 = vsel %vm546_vm0, %v5070_v19, %v5074_v14  ;;  %v10499_v26 = vsel %vm717_vm1, %v4652_v50, %v4653_v6  ;;  %v4764_v63 = vshll.u32 %v10218_v1, 16  ;;  %v4382_v14 = vld [vmem:[#allocation2 + $0x30] sm:$0xe]  ;;  %4908 = vrot.lane.b32.xlu1 %v10442_v24, %s7786_s13  ;;  %v4384_v50 = vld [vmem:[#allocation2 + $0x48] sm:$0xe] }
 0x28f   : > { %v4762_v53 = vor.u32 %v10072_v62, %v11217_v47  ;;  %v4658_v36 = vrot.slane %v6484_v56, 1  ;;  %v10503_v3 = vsel %vm717_vm1, %v4655_v7, %v4656_v59  ;;  %v6485_v22 = vcombine.low %v4381_v31, %v10179_v40  ;;  %v11222_v59 = vld [vmem:[#allocation21_spill] sm:$0xff]  ;;  %v4385_v7 = vld [vmem:[#allocation2 + $0x54] sm:$0xe]  ;;  %v11224_v31 = vld [vmem:[#allocation24_spill] sm:$0xff] }
 0x290   : > { %v4662_v11 = vrot.slane %v10205_v52, 1  ;;  %v11218_v28 = vshrl.u32 %v10143_v51, 16  ;;  %v4766_v18 = vrot.slane %v4764_v63, 1  ;;  %v4776_v1 = vshll.u32 %v10278_v8, 16 }
 0x291   : > { %v10512_v55 = vsel %vm717_vm1, %v4658_v36, %v4659_v30  ;;  %v6486_v58 = vcombine.low %v4382_v14, %v10263_v15  ;;  %v4661_v40 = vrot.slane %v6485_v22, 1  ;;  %v4665_v52 = vrot.slane %v10257_v12, 1  ;;  %5086 = vrot.lane.b32.xlu0 %v5051_v48, %s7786_s13  ;;  %v11223_v36 = vld [vmem:[#allocation40_spill] sm:$0xff] }
 0x292   : > { %v4774_v62 = vor.u32 %v10190_v60, %v11218_v28  ;;  %v11219_v51 = vshrl.u32 %v10195_v2, 16  ;;  %v4788_v4 = vshll.u32 %v10314_v25, 16  ;;  %v10523_v21 = vsel %vm546_vm0, %v4762_v53, %v4766_v18  ;;  %v11226_v22 = vld [vmem:[#allocation16_spill] sm:$0xff]  ;;  %4910 = vrot.lane.b32.xlu1 %v10462_v41, %s7786_s13 }
 0x293   : > { %v4778_v6 = vrot.slane %v4776_v1, 1  ;;  %v4664_v32 = vrot.slane %v6486_v58, 1  ;;  %v6487_v8 = vcombine.low %v4383_v17, %v10289_v38  ;;  %v10527_v15 = vsel %vm717_vm1, %v4661_v40, %v4662_v11  ;;  %v4444_v58 = vld [vmem:[#allocation2 + $0x18] sm:$0xe] }
 0x294   : > { %v4786_v60 = vor.u32 %v10231_v5, %v11219_v51  ;;  %v4790_v35 = vrot.slane %v4788_v4, 1  ;;  %v4668_v12 = vrot.slane %v10291_v29, 1  ;;  %v11220_v2 = vshrl.u32 %v10224_v46, 16 }
 0x295   : > { %v10536_v25 = vsel %vm546_vm0, %v4774_v62, %v4778_v6  ;;  %v10539_v33 = vsel %vm717_vm1, %v4664_v32, %v4665_v52  ;;  %v4667_v38 = vrot.slane %v6487_v8, 1  ;;  %v4800_v19 = vshll.u32 %v10355_v13, 16  ;;  %5088 = vrot.lane.b32.xlu0 %v10473_v44, %s7786_s13  ;;  %v11228_v52 = vld [vmem:[#allocation15_spill] sm:$0xff]  ;;  %v4446_v8 = vld [vmem:[#allocation2 + $0x30] sm:$0xe] }
 0x296   : > { %v4798_v5 = vor.u32 %v10250_v57, %v11220_v2  ;;  %v10544_v29 = vsel %vm546_vm0, %v4786_v60, %v4790_v35  ;;  %v6488_v46 = vcombine.low %v4384_v50, %v10322_v42  ;;  %v4671_v57 = vrot.slane %v10324_v23, 1  ;;  %v11229_v60 = vld [vmem:[#allocation31_spill] sm:$0xff]  ;;  %4912 = vrot.lane.b32.xlu1 %v10478_v61, %s7786_s13  ;;  %v11230_v2 = vld [vmem:[#allocation22_spill] sm:$0xff] }
 0x297   : > { %v11221_v24 = vshrl.u32 %v10269_v9, 16  ;;  %v10552_v30 = vsel %vm717_vm1, %v4667_v38, %v4668_v12  ;;  %v4802_v47 = vrot.slane %v4800_v19, 1  ;;  %v4812_v13 = vshll.u32 %v10408_v10, 16  ;;  %v11227_v10 = vld [vmem:[#allocation23_spill] sm:$0xff]  ;;  %v11232_v38 = vld [vmem:[#allocation13_spill] sm:$0xff] }
 0x298   : > { %v6489_v48 = vcombine.low %v4385_v7, %v10375_v49  ;;  %v4670_v53 = vrot.slane %v6488_v46, 1  ;;  %v4674_v63 = vrot.slane %v11223_v36, 1  ;;  %v11225_v42 = vshrl.u32 %v11224_v31, 16  ;;  %v4447_v50 = vld [vmem:[#allocation2 + $0x3c] sm:$0xe]  ;;  %v11237_v31 = vld [vmem:[#allocation33_spill] sm:$0xff] }
 0x299   : > { %v4810_v56 = vor.u32 %v11222_v59, %v11221_v24  ;;  %v4824_v9 = vshll.u32 %v10427_v45, 16  ;;  %v10564_v11 = vsel %vm546_vm0, %v4798_v5, %v4802_v47  ;;  %v4814_v28 = vrot.slane %v4812_v13, 1  ;;  %5090 = vrot.lane.b32.xlu0 %v10496_v54, %s7786_s13  ;;  %v11234_v59 = vld [vmem:[#allocation8_spill] sm:$0xff] }
 0x29a   : > { %v4822_v23 = vor.u32 %v11226_v22, %v11225_v42  ;;  %v4673_v62 = vrot.slane %v6489_v48, 1  ;;  %v4829_v14 = vshrl.u32 %v11227_v10, 16  ;;  %v10570_v49 = vsel %vm717_vm1, %v4670_v53, %v4671_v57  ;;  %v11233_v57 = vld [vmem:[#allocation25_spill] sm:$0xff]  ;;  %v11236_v13 = vld [vmem:[#allocation28_spill] sm:$0xff]  ;;  %v4449_v22 = vld [vmem:[#allocation2 + $0x54] sm:$0xe]  ;;  %4914 = vrot.lane.b32.xlu1 %v10489_v34, %s7786_s13 }
 0x29b   : > { %v4826_v18 = vrot.slane %v4824_v9, 1  ;;  %v4831_v1 = vshll.u32 %v11227_v10, 16  ;;  %v4836_v45 = vshll.u32 %v10451_v39, 16  ;;  %v10575_v41 = vsel %vm546_vm0, %v4810_v56, %v4814_v28  ;;  %v11235_v56 = vld [vmem:[#allocation30_spill] sm:$0xff]  ;;  %v4448_v53 = vld [vmem:[#allocation2 + $0x48] sm:$0xe] }
 0x29c   : > { %v10578_v40 = vsel %vm717_vm1, %v4673_v62, %v4674_v63  ;;  %v6530_v51 = vcombine.low %v4444_v58, %v11228_v52  ;;  %v5117_v4 = vrot.slane %v11229_v60, 1  ;;  %v4841_v32 = vshrl.u32 %v10392_v37, 16  ;;  %v11238_v9 = vld [vmem:[#allocation35_spill] sm:$0xff]  ;;  %v11239_v62 = vld [vmem:[#allocation37_spill] sm:$0xff]  ;;  %s5910_s13 = sshll.u32 %s10803_s9, 4  ;;  %s10886_s13 = int_to_ptr.vmem [resolvable:$true] %s5910_s13 }
 0x29d   : > { %v10583_v44 = vsel %vm546_vm0, %v4822_v23, %v4826_v18  ;;  %v4833_v17 = vrot.slane %v4831_v1, 1  ;;  %v4838_v6 = vrot.slane %v4836_v45, 1  ;;  %v4843_v35 = vshll.u32 %v10392_v37, 16  ;;  %v4450_v1 = vld [vmem:[#allocation2 + $0x60] sm:$0xe]  ;;  %s7692_s28 = scalar_lea.vmem %s10886_s13, 2048  ;;  %p7699_p4 = scmp.lt.s32.totalorder %s10886_s13, %s7697_s22 }
 0x29e   : > { %v5116_v39 = vrot.slane %v6530_v51, 1  ;;  %v4848_v12 = vshll.u32 %v10458_v0, 16  ;;  %v11231_v5 = vrot.slane %v11230_v2, 1  ;;  %v6532_v24 = vcombine.low %v4446_v8, %v11233_v57  ;;  %v11241_v51 = vld [vmem:[#allocation32_spill] sm:$0xff]  ;;  %v7599_v57 = vld [vmem:[%s10950_s5 + $0x110] sm:$0xff]   ;;  %p7693_p1 = scmp.ne.s32.totalorder %s10886_s13, %s7692_s28  ;;  %p7700_p6 = scmp.lt.s32.totalorder %s7698_s23, %s7692_s28 }
 0x29f   : > { %v4834_v46 = vor.u32 %v4833_v17, %v4829_v14  ;;  %v5123_v61 = vrot.slane %v11234_v59, 1  ;;  %v6533_v7 = vcombine.low %v4447_v50, %v11235_v56  ;;  %v4845_v0 = vrot.slane %v4843_v35, 1  ;;  %v11240_v14 = vld [vmem:[#allocation36_spill] sm:$0xff] }
 0x2a0   : > { %v10594_v19 = vsel %vm717_vm1, %v11232_v38, %v11231_v5  ;;  %v10602_v37 = vsel %vm717_vm1, %v5116_v39, %v5117_v4  ;;  %v4850_v47 = vrot.slane %v4848_v12, 1  ;;  %v5126_v48 = vrot.slane %v11236_v13, 1  ;;  %v4451_v4 = vld [vmem:[#allocation2 + $0x6c] sm:$0xe]  ;;  %p7694_p2 = pnand %p7693_p1, %p7884_p5  ;;  %p7701_p8 = por %p7700_p6, %p7699_p4 }
 0x2a1   : > { %v10606_v36 = vsel %vm546_vm0, %v4834_v46, %v4838_v6  ;;  %v5122_v63 = vrot.slane %v6532_v24, 1  ;;  %v5125_v54 = vrot.slane %v6533_v7, 1  ;;  %v6534_v42 = vcombine.low %v4448_v53, %v11237_v31  ;;  %v11242_v24 = vld [vmem:[#allocation29_spill] sm:$0xff]  ;;  %v11245_v31 = vld [vmem:[#allocation7_spill] sm:$0xff] }
 0x2a2   : > { %v4846_v23 = vor.u32 %v4845_v0, %v4841_v32  ;;  %v5129_v28 = vrot.slane %v11238_v9, 1  ;;  %v6535_v10 = vcombine.low %v4449_v22, %v11239_v62  ;;  %v5132_v18 = vrot.slane %v11240_v14, 1  ;;  %v11244_v0 = vld [vmem:[#allocation19_spill] sm:$0xff]  ;;  %v11246_v22 = vld [vmem:[#allocation12_spill] sm:$0xff]  ;;  %p7695_p3 = pneg %p7694_p2 }
 0x2a3   : > { %v10615_v45 = vsel %vm717_vm1, %v5122_v63, %v5123_v61  ;;  %v10618_v58 = vsel %vm717_vm1, %v5125_v54, %v5126_v48  ;;  %v5128_v52 = vrot.slane %v6534_v42, 1  ;;  %v6536_v60 = vcombine.low %v4450_v1, %v11241_v51  ;;  %v11243_v61 = vld [vmem:[#allocation17_spill] sm:$0xff] }
 0x2a4   : > { %v10622_v34 = vsel %vm546_vm0, %v4846_v23, %v4850_v47  ;;  %v5131_v17 = vrot.slane %v6535_v10, 1  ;;  %v5135_v6 = vrot.slane %v10419_v16, 1  ;;  %v6537_v32 = vcombine.low %v4451_v4, %v10437_v27  ;;  %p7702_p9 = pnand %p7701_p8, %p7695_p3 }
 0x2a5   : > { %v10627_v8 = vsel %vm717_vm1, %v5128_v52, %v5129_v28  ;;  %v5134_v39 = vrot.slane %v6536_v60, 1  ;;  %v5138_v35 = vrot.slane %v10433_v43, 1  ;;  %v11248_v52 = vld [vmem:[#allocation20_spill] sm:$0xff] }
 0x2a6   : > { %v10631_v12 = vsel %vm717_vm1, %v5131_v17, %v5132_v18  ;;  %v5137_v2 = vrot.slane %v6537_v32, 1  ;;  %v11247_v18 = vld [vmem:[#allocation26_spill] sm:$0xff] }
 0x2a7   : > { %v10634_v5 = vsel %vm717_vm1, %v5134_v39, %v5135_v6  ;;  %v11249_v32 = vld [vmem:[#allocation14_spill] sm:$0xff] }
 0x2a8   : > { %v10637_v38 = vsel %vm717_vm1, %v5137_v2, %v5138_v35  ;;  %v11250_v35 = vld [vmem:[#allocation18_spill] sm:$0xff] }
 0x2ae   : > { %v4717_v50 = vpop.permute.xlu0 %4716 }
 0x2af   : > { %v5166_v16 = vsel %vm1328_vm2, %v10499_v26, %v4717_v50  ;;  %v7602_v26 = vld [vmem:[%s10950_s5 + $0x108] sm:$0xff]  }
 0x2b0   : > { %5603 = vmatprep.mubr.bf16.mxu0 %v5166_v16 }
 0x2c9   : > { %v4719_v27 = vpop.permute.xlu0 %4718 }
 0x2ca   : > { %v5170_v43 = vsel %vm1328_vm2, %v10503_v3, %v4719_v27  ;;  %v7605_v3 = vld [vmem:[%s10950_s5 + $0x100] sm:$0xff]  }
 0x2cc   : > { %v4613_v46 = vpop.permute.xlu1 %4612 }
 0x2cd   : > { %v5141_v59 = vsel %vm1328_vm2, %v11242_v24, %v4613_v46  ;;  %v4721_v56 = vpop.permute.xlu0 %4720  ;;  %v11252_v24 = vld [vmem:[#allocation34_spill] sm:$0xff] }
 0x2ce   : > { %5604 = vmatmul.mubr.bf16.vlgmr.msra.gmra.mxu0 %v5141_v59  ;;  %v5174_v48 = vsel %vm1328_vm2, %v10512_v55, %v4721_v56 }
 0x2cf   : > { %7139 = vmatpush3.bf16.msra.mxu0 %v11243_v61  ;;  %5611 = vmatprep.mubr.bf16.mxu0 %v5170_v43  ;;  %v11251_v43 = vld [vmem:[#allocation27_spill] sm:$0xff] }
 0x2d0   : > { %7140 = vmatprep.subr.bf16.mxu0 %v7599_v57 }
 0x2d1   : > { %v4723_v13 = vpop.permute.xlu0 %4722 }
 0x2d2   : > { %v5178_v9 = vsel %vm1328_vm2, %v10527_v15, %v4723_v13 }
 0x2d3   : > { %7141 = vmatpush3.bf16.msra.mxu0 %v7599_v57 }
 0x2d4   : > { %v4615_v7 = vpop.permute.xlu1 %4614  ;;  %7142 = vmatprep.subr.bf16.mxu0 %v7602_v26 }
 0x2d5   : > { %v5144_v47 = vsel %vm1328_vm2, %v11244_v0, %v4615_v7 }
 0x2d6   : > { %5612 = vmatmul.mubr.bf16.gmra.mxu0 %v5144_v47  ;;  %v11254_v47 = vld [vmem:[#allocation41_spill] sm:$0xff] }
 0x2d7   : > { %5619 = vmatprep.mubr.bf16.mxu0 %v5174_v48  ;;  %7143 = vmatpush3.bf16.msra.mxu0 %v7602_v26 }
 0x2d8   : > { %v4617_v53 = vpop.permute.xlu1 %4616  ;;  %7144 = vmatprep.subr.bf16.mxu0 %v7605_v3 }
 0x2d9   : > { %v5147_v23 = vsel %vm1328_vm2, %v11246_v22, %v4617_v53 }
 0x2db   : > { %7145 = vmatpush3.bf16.msra.mxu0 %v7605_v3  ;;  %v11253_v3 = vld [vmem:[#allocation11_spill] sm:$0xff] }
 0x2dc   : > { %v4619_v63 = vpop.permute.xlu1 %4618 }
 0x2dd   : > { %v5150_v51 = vsel %vm1328_vm2, %v11248_v52, %v4619_v63  ;;  %v11255_v63 = vld [vmem:[#allocation42_spill] sm:$0xff] }
 0x2de   : > { %v5077_v54 = vpop.permute.xlu0 %5076  ;;  %5620 = vmatmul.mubr.bf16.gmra.mxu0 %v5147_v23 }
 0x2df   : > { %v5229_v42 = vsel %vm1328_vm2, %v11245_v31, %v5077_v54  ;;  %5627 = vmatprep.mubr.bf16.mxu0 %v5178_v9  ;;  %v11256_v31 = vld [vmem:[#allocation38_spill] sm:$0xff]  ;;  %v11257_v9 = vld [vmem:[#allocation39_spill] sm:$0xff] }
 0x2e0   : > { %5700 = vmatprep.mubr.bf16.mxu1 %v5229_v42  ;;  %v4901_v28 = vpop.permute.xlu1 %4900 }
 0x2e1   : > { %v5198_v62 = vsel %vm1328_vm2, %v10523_v21, %v4901_v28 }
 0x2e2   : > { %v4725_v55 = vpop.permute.xlu0 %4724  ;;  %5701 = vmatmul.mubr.bf16.vlgmr.msra.gmra.mxu1 %v5198_v62 }
 0x2e3   : > { %v5182_v15 = vsel %vm1328_vm2, %v10539_v33, %v4725_v55 }
 0x2e4   : > { %v4621_v10 = vpop.permute.xlu1 %4620 }
 0x2e5   : > { %v5153_v2 = vsel %vm1328_vm2, %v11250_v35, %v4621_v10 }
 0x2e6   : > { %v5079_v14 = vpop.permute.xlu0 %5078  ;;  %5628 = vmatmul.mubr.bf16.gmra.mxu0 %v5150_v51 }
 0x2e7   : > { %v5232_v1 = vsel %vm1328_vm2, %v11247_v18, %v5079_v14  ;;  %5635 = vmatprep.mubr.bf16.mxu0 %v5182_v15 }
 0x2e8   : > { %5708 = vmatprep.mubr.bf16.mxu1 %v5232_v1  ;;  %v4903_v60 = vpop.permute.xlu1 %4902 }
 0x2e9   : > { %v5202_v21 = vsel %vm1328_vm2, %v10536_v25, %v4903_v60 }
 0x2ea   : > { %v4727_v4 = vpop.permute.xlu0 %4726  ;;  %5709 = vmatmul.mubr.bf16.gmra.mxu1 %v5202_v21 }
 0x2eb   : > { %v5186_v33 = vsel %vm1328_vm2, %v10552_v30, %v4727_v4 }
 0x2ec   : > { %v4623_v17 = vpop.permute.xlu1 %4622 }
 0x2ed   : > { %v5156_v57 = vsel %vm1328_vm2, %v11251_v43, %v4623_v17 }
 0x2ee   : > { %5636 = vmatmul.mubr.bf16.gmra.mxu0 %v5153_v2 }
 0x2ef   : > { %v5081_v6 = vpop.permute.xlu0 %5080  ;;  %5643 = vmatprep.mubr.bf16.mxu0 %v5186_v33 }
 0x2f0   : > { %v5235_v39 = vsel %vm1328_vm2, %v11249_v32, %v5081_v6  ;;  %v4905_v50 = vpop.permute.xlu1 %4904 }
 0x2f1   : > { %5716 = vmatprep.mubr.bf16.mxu1 %v5235_v39  ;;  %v5206_v25 = vsel %vm1328_vm2, %v10544_v29, %v4905_v50 }
 0x2f2   : > { %5717 = vmatmul.mubr.bf16.gmra.mxu1 %v5206_v25 }
 0x2f3   : > { %v4729_v16 = vpop.permute.xlu0 %4728 }
 0x2f4   : > { %v4625_v27 = vpop.permute.xlu1 %4624  ;;  %v5190_v30 = vsel %vm1328_vm2, %v10570_v49, %v4729_v16 }
 0x2f5   : > { %v5159_v0 = vsel %vm1328_vm2, %v11253_v3, %v4625_v27 }
 0x2f6   : > { %5644 = vmatmul.mubr.bf16.gmra.mxu0 %v5156_v57 }
 0x2f7   : > { %v5083_v46 = vpop.permute.xlu0 %5082  ;;  %5651 = vmatprep.mubr.bf16.mxu0 %v5190_v30 }
 0x2f8   : > { %v5238_v59 = vsel %vm1328_vm2, %v11252_v24, %v5083_v46  ;;  %v4907_v61 = vpop.permute.xlu1 %4906 }
 0x2f9   : > { %5724 = vmatprep.mubr.bf16.mxu1 %v5238_v59  ;;  %v5210_v29 = vsel %vm1328_vm2, %v10564_v11, %v4907_v61 }
 0x2fa   : > { %5725 = vmatmul.mubr.bf16.gmra.mxu1 %v5210_v29 }
 0x2fb   : > { %v4731_v56 = vpop.permute.xlu0 %4730 }
 0x2fc   : > { %v4627_v26 = vpop.permute.xlu1 %4626  ;;  %v5194_v49 = vsel %vm1328_vm2, %v10578_v40, %v4731_v56 }
 0x2fd   : > { %v5162_v42 = vsel %vm1328_vm2, %v11256_v31, %v4627_v26 }
 0x2fe   : > { %5652 = vmatmul.mubr.bf16.gmra.mxu0 %v5159_v0 }
 0x2ff   : > { %v5085_v7 = vpop.permute.xlu0 %5084  ;;  %5659 = vmatprep.mubr.bf16.mxu0 %v5194_v49 }
 0x300   : > { %v5241_v13 = vsel %vm1328_vm2, %v11254_v47, %v5085_v7  ;;  %v4909_v48 = vpop.permute.xlu1 %4908 }
 0x301   : > { %5732 = vmatprep.mubr.bf16.mxu1 %v5241_v13  ;;  %v5214_v11 = vsel %vm1328_vm2, %v10575_v41, %v4909_v48 }
 0x302   : > { %5733 = vmatmul.mubr.bf16.gmra.mxu1 %v5214_v11 }
 0x303   : > { %v5087_v53 = vpop.permute.xlu0 %5086 }
 0x304   : > { %v5244_v54 = vsel %vm1328_vm2, %v11255_v63, %v5087_v53  ;;  %v4911_v22 = vpop.permute.xlu1 %4910 }
 0x305   : > { %5740 = vmatprep.mubr.bf16.mxu1 %v5244_v54  ;;  %v5218_v40 = vsel %vm1328_vm2, %v10583_v44, %v4911_v22 }
 0x306   : > { %5660 = vmatmul.mubr.bf16.gmra.mxu0 %v5162_v42 }
 0x307   : > { %v5089_v23 = vpop.permute.xlu0 %5088  ;;  %7146 = vmatprep.mubr.msk.bf16.mxu0 %vm1328_vm2, %v10602_v37 }
 0x308   : > { %v5247_v41 = vsel %vm1328_vm2, %v11257_v9, %v5089_v23  ;;  %v4913_v28 = vpop.permute.xlu1 %4912  ;;  %v10782_v23 = vld [vmem:[%s10951_s6] ss:$0 sm:$0xff] }
 0x309   : > { %v5222_v62 = vsel %vm1328_vm2, %v10606_v36, %v4913_v28 }
 0x30a   : > { %5741 = vmatmul.mubr.bf16.gmra.mxu1 %v5218_v40 }
 0x30b   : > { %5748 = vmatprep.mubr.bf16.mxu1 %v5247_v41  ;;  %v5091_v55 = vpop.permute.xlu0 %5090 }
 0x30c   : > { %v5250_v44 = vsel %vm1328_vm2, %v10455_v20, %v5091_v55  ;;  %v4915_v37 = vpop.permute.xlu1 %4914 }
 0x30e   : > { %7147 = vmatmul.mubr.msk.bf16.vlgmr.msra.gmra.mxu0 %vm1328_vm2, %v10594_v19  ;;  %v5226_v19 = vsel %vm1328_vm2, %v10622_v34, %v4915_v37 }
 0x30f   : > { %7150 = vmatprep.mubr.msk.bf16.mxu0 %vm1328_vm2, %v10615_v45 }
 0x312   : > { %5749 = vmatmul.mubr.bf16.gmra.mxu1 %v5222_v62 }
 0x313   : > { %5756 = vmatprep.mubr.bf16.mxu1 %v5250_v44 }
 0x316   : > { %7151 = vmatmul.mubr.msk.bf16.gmra.mxu0 %vm1328_vm2, %v10618_v58 }
 0x317   : > { %7154 = vmatprep.mubr.msk.bf16.mxu0 %vm1328_vm2, %v10627_v8 }
 0x31a   : > { %5757 = vmatmul.mubr.bf16.gmra.mxu1 %v5226_v19 }
 0x31e   : > { %7155 = vmatmul.mubr.msk.bf16.gmra.mxu0 %vm1328_vm2, %v10631_v12 }
 0x31f   : > { %7158 = vmatprep.mubr.msk.bf16.mxu0 %vm1328_vm2, %v10634_v5 }
 0x326   : > { %7159 = vmatmul.mubr.msk.bf16.gmra.mxu0 %vm1328_vm2, %v10637_v38 }
 0x38e   : > { %v6958_v20 = vpop.f32.mrf.mxu0 }
 0x390   : > { %v6959_v36 = vpop.f32.mrf.mxu0 }
 0x391   : > { %v6960_v31 = vadd.f32 %v6959_v36, %v6958_v20 }
 0x392   : > { %v6961_v45 = vpop.f32.mrf.mxu0 }
 0x393   : > { %v5606_v37 = vadd.f32 %v6960_v31, %v10782_v23 }
 0x394   : > { %v6962_v58 = vpop.f32.mrf.mxu0 }
 0x395   : > { %v6963_v62 = vadd.f32 %v6962_v58, %v6961_v45 }
 0x396   : > { %v6964_v10 = vpop.f32.mrf.mxu0 }
 0x397   : > { %v5609_v45 = vadd.f32 %v6963_v62, %v10782_v23 }
 0x398   : > { %v6965_v14 = vpop.f32.mrf.mxu0 }
 0x399   : > { %v6966_v11 = vadd.f32 %v6965_v14, %v6964_v10 }
 0x39a   : > { %v6967_v8 = vpop.f32.mrf.mxu0 }
 0x39b   : > { %v5614_v9 = vadd.f32 %v6966_v11, %v10782_v23 }
 0x39c   : > { %v6968_v18 = vpop.f32.mrf.mxu0 }
 0x39d   : > { %v6969_v41 = vadd.f32 %v6968_v18, %v6967_v8 }
 0x39e   : > { %v10729_v1 = vpop.f32.mrf.mxu0 }
 0x3a0   : > { %v10731_v34 = vpop.f32.mrf.mxu0 }
 0x3a1   : > { %v6972_v58 = vadd.f32 %v10731_v34, %v10729_v1 }
 0x3a2   : > { %v7022_v52 = vpop.f32.mrf.mxu1  ;;  %v10733_v12 = vpop.f32.mrf.mxu0 }
 0x3a4   : > { %v7023_v51 = vpop.f32.mrf.mxu1  ;;  %v10735_v5 = vpop.f32.mrf.mxu0 }
 0x3a5   : > { %v7024_v28 = vadd.f32 %v7023_v51, %v7022_v52 }
 0x3a6   : > { %v7025_v15 = vpop.f32.mrf.mxu1  ;;  %v6976_v38 = vpop.f32.mrf.mxu0 }
 0x3a7   : > { %v5703_v18 = vadd.f32 %v7024_v28, %v5606_v37 }
 0x3a8   : > { %v7026_v60 = vpop.f32.mrf.mxu1  ;;  %v6977_v4 = vpop.f32.mrf.mxu0 }
 0x3a9   : > { %v7027_v10 = vadd.f32 %v7026_v60, %v7025_v15 }
 0x3aa   : > { %v7028_v21 = vpop.f32.mrf.mxu1  ;;  %v10737_v17 = vpop.f32.mrf.mxu0 }
 0x3ac   : > { %v7029_v6 = vpop.f32.mrf.mxu1  ;;  %v6980_v32 = vpop.f32.mrf.mxu0 }
 0x3ad   : > { %v7030_v42 = vadd.f32 %v7029_v6, %v7028_v21  ;;  %v5617_v21 = vadd.f32 %v6969_v41, %v10782_v23  ;;  %v6978_v6 = vadd.f32 %v6977_v4, %v6976_v38  ;;  %v6981_v15 = vadd.f32 %v6980_v32, %v10737_v17 }
 0x3ae   : > { %v7031_v39 = vpop.f32.mrf.mxu1  ;;  %v10739_v35 = vpop.f32.mrf.mxu0  ;;  %v6975_v17 = vadd.f32 %v10735_v5, %v10733_v12 }
 0x3af   : > { %v5711_v36 = vadd.f32 %v7030_v42, %v5614_v9  ;;  %v5706_v9 = vadd.f32 %v7027_v10, %v5609_v45  ;;  %v5630_v38 = vadd.f32 %v6978_v6, %v10782_v23  ;;  %v5633_v37 = vadd.f32 %v6981_v15, %v10782_v23 }
 0x3b0   : > { %v7032_v2 = vpop.f32.mrf.mxu1  ;;  %v10741_v33 = vpop.f32.mrf.mxu0 }
 0x3b1   : > { %v7033_v19 = vadd.f32 %v7032_v2, %v7031_v39 }
 0x3b2   : > { %v7034_v50 = vpop.f32.mrf.mxu1  ;;  %v10743_v16 = vpop.f32.mrf.mxu0 }
 0x3b3   : > { %v5714_v42 = vadd.f32 %v7033_v19, %v5617_v21  ;;  %v6984_v21 = vadd.f32 %v10741_v33, %v10739_v35 }
 0x3b4   : > { %v7035_v25 = vpop.f32.mrf.mxu1  ;;  %v10745_v27 = vpop.f32.mrf.mxu0 }
 0x3b5   : > { %v7036_v4 = vadd.f32 %v7035_v25, %v7034_v50 }
 0x3b6   : > { %v10747_v46 = vpop.f32.mrf.mxu1  ;;  %v10749_v43 = vpop.f32.mrf.mxu0 }
 0x3b8   : > { %v10751_v57 = vpop.f32.mrf.mxu1  ;;  %v10753_v24 = vpop.f32.mrf.mxu0 }
 0x3b9   : > { %v7039_v19 = vadd.f32 %v10751_v57, %v10747_v46  ;;  %v6990_v10 = vadd.f32 %v10753_v24, %v10749_v43 }
 0x3ba   : > { %v7040_v59 = vpop.f32.mrf.mxu1  ;;  %v10755_v30 = vpop.f32.mrf.mxu0 }
 0x3bc   : > { %v7041_v61 = vpop.f32.mrf.mxu1  ;;  %v10757_v56 = vpop.f32.mrf.mxu0 }
 0x3bd   : > { %v7042_v51 = vadd.f32 %v7041_v61, %v7040_v59  ;;  %v5622_v61 = vadd.f32 %v6972_v58, %v10782_v23 }
 0x3be   : > { %v7043_v29 = vpop.f32.mrf.mxu1  ;;  %v10759_v26 = vpop.f32.mrf.mxu0 }
 0x3bf   : > { %v5727_v62 = vadd.f32 %v7042_v51, %v5630_v38 }
 0x3c0   : > { %v7044_v7 = vpop.f32.mrf.mxu1  ;;  %v10761_v3 = vpop.f32.mrf.mxu0 }
 0x3c1   : > { %v7045_v41 = vadd.f32 %v7044_v7, %v7043_v29  ;;  %v5719_v7 = vadd.f32 %v7036_v4, %v5622_v61  ;;  %v6996_v4 = vadd.f32 %v10761_v3, %v10759_v26 }
 0x3c2   : > { %v10763_v0 = vpop.f32.mrf.mxu1  ;;  %v10765_v47 = vpop.f32.mrf.mxu0 }
 0x3c3   : > { %v5730_v24 = vadd.f32 %v7045_v41, %v5633_v37 }
 0x3c4   : > { %v10767_v13 = vpop.f32.mrf.mxu1  ;;  %v10769_v49 = vpop.f32.mrf.mxu0 }
 0x3c5   : > { %v7048_v51 = vadd.f32 %v10767_v13, %v10763_v0 }
 0x3c6   : > { %v10771_v48 = vpop.f32.mrf.mxu1  ;;  %v10773_v53 = vpop.f32.mrf.mxu0 }
 0x3c8   : > { %v10775_v63 = vpop.f32.mrf.mxu1  ;;  %v10777_v54 = vpop.f32.mrf.mxu0 }
 0x3c9   : > { %v7051_v15 = vadd.f32 %v10775_v63, %v10771_v48  ;;  %v7002_v38 = vadd.f32 %v10777_v54, %v10773_v53 }
 0x3ca   : > { %v7052_v22 = vpop.f32.mrf.mxu1  ;;  %v10784_v40 = vpop.f32.mrf.mxu0 }
 0x3cb   : > { %v5662_v41 = vadd.f32 %v7002_v38, %v10782_v23 }
 0x3cc   : > { %v7053_v55 = vpop.f32.mrf.mxu1  ;;  %v10788_v44 = vpop.f32.mrf.mxu0 }
 0x3cd   : > { %v7005_v53 = vadd.f32 %v10788_v44, %v10784_v40 }
 0x3ce   : > { %v10791_v20 = vpop.f32.mrf.mxu1  ;;  %v7148_v14 = vpop.f32.mrf.mxu0 }
 0x3cf   : > { %v5808_v8 = vadd.f32 %v7148_v14, %v5711_v36  ;;  %v5625_v14 = vadd.f32 %v6975_v17, %v10782_v23 }
 0x3d0   : > { %v7056_v11 = vpop.f32.mrf.mxu1  ;;  %v5799_v52 = vpop.f32.mrf.mxu0 }
 0x3d1   : > { %v5864_v2 = vmax.f32 %v5808_v8, 0.0  ;;  %v5800_v31 = vadd.f32 %v5799_v52, %v5703_v18  ;;  %v7054_v8 = vadd.f32 %v7053_v55, %v7052_v22  ;;  %v6993_v18 = vadd.f32 %v10757_v56, %v10755_v30 }
 0x3d2   : > { %v10799_v39 = vpop.f32.mrf.mxu1  ;;  %v7149_v60 = vpop.f32.mrf.mxu0  ;;  %v5722_v58 = vadd.f32 %v7039_v19, %v5625_v14  ;;  %v5646_v52 = vadd.f32 %v6990_v10, %v10782_v23  ;;  %v5638_v55 = vadd.f32 %v6984_v21, %v10782_v23  ;;  %v7057_v30 = vadd.f32 %v7056_v11, %v10791_v20 }
 0x3d3   : > { %5880 = vst.msk [vmem:[%s10803_s9 + $0x10] sm:$0xff] %vm1328_vm2, %v5864_v2  ;;  %v5862_v34 = vmax.f32 %v5800_v31, 0.0  ;;  %v5811_v59 = vadd.f32 %v7149_v60, %v5714_v42  ;;  %v6987_v2 = vadd.f32 %v10745_v27, %v10743_v16  ;;  %v5649_v13 = vadd.f32 %v6993_v18, %v10782_v23 }
 0x3d4   : > { %v10807_v1 = vpop.f32.mrf.mxu1  ;;  %v5802_v32 = vpop.f32.mrf.mxu0  ;;  %v5743_v0 = vadd.f32 %v7054_v8, %v5646_v52  ;;  %v5735_v20 = vadd.f32 %v7048_v51, %v5638_v55 }
 0x3d5   : > { %5878 = vst.msk [vmem:[%s10803_s9] sm:$0xff] %vm1328_vm2, %v5862_v34  ;;  %v5865_v25 = vmax.f32 %v5811_v59, 0.0  ;;  %v5803_v28 = vadd.f32 %v5802_v32, %v5706_v9  ;;  %v5641_v11 = vadd.f32 %v6987_v2, %v10782_v23  ;;  %v5746_v61 = vadd.f32 %v7057_v30, %v5649_v13 }
 0x3d6   : > { %v10814_v50 = vpop.f32.mrf.mxu1  ;;  %v7152_v36 = vpop.f32.mrf.mxu0  ;;  %v7060_v26 = vadd.f32 %v10807_v1, %v10799_v39  ;;  %v5665_v39 = vadd.f32 %v7005_v53, %v10782_v23 }
 0x3d7   : > { %5881 = vst.msk [vmem:[%s10803_s9 + $0x18] sm:$0xff] %vm1328_vm2, %v5865_v25  ;;  %v5863_v5 = vmax.f32 %v5803_v28, 0.0  ;;  %v5824_v29 = vadd.f32 %v7152_v36, %v5727_v62  ;;  %v5738_v32 = vadd.f32 %v7051_v15, %v5641_v11  ;;  %v5654_v28 = vadd.f32 %v6996_v4, %v10782_v23 }
 0x3d8   : > { %v10823_v12 = vpop.f32.mrf.mxu1  ;;  %v5815_v6 = vpop.f32.mrf.mxu0  ;;  %v6999_v62 = vadd.f32 %v10769_v49, %v10765_v47 }
 0x3d9   : > { %5879 = vst.msk [vmem:[%s10803_s9 + $0x8] sm:$0xff] %vm1328_vm2, %v5863_v5  ;;  %v5868_v57 = vmax.f32 %v5824_v29, 0.0  ;;  %v5816_v43 = vadd.f32 %v5815_v6, %v5719_v7  ;;  %v7063_v10 = vadd.f32 %v10823_v12, %v10814_v50  ;;  %v5751_v5 = vadd.f32 %v7060_v26, %v5654_v28 }
 0x3da   : > { %v7064_v46 = vpop.f32.mrf.mxu1  ;;  %v7153_v45 = vpop.f32.mrf.mxu0  ;;  %v5657_v7 = vadd.f32 %v6999_v62, %v10782_v23 }
 0x3db   : > { %5884 = vst.msk [vmem:[%s10803_s9 + $0x30] sm:$0xff] %vm1328_vm2, %v5868_v57  ;;  %v5866_v33 = vmax.f32 %v5816_v43, 0.0  ;;  %v5827_v22 = vadd.f32 %v7153_v45, %v5730_v24 }
 0x3dc   : > { %v7065_v35 = vpop.f32.mrf.mxu1  ;;  %v5818_v31 = vpop.f32.mrf.mxu0 }
 0x3dd   : > { %5882 = vst.msk [vmem:[%s10803_s9 + $0x20] sm:$0xff] %vm1328_vm2, %v5866_v33  ;;  %v5869_v56 = vmax.f32 %v5827_v22, 0.0  ;;  %v5819_v42 = vadd.f32 %v5818_v31, %v5722_v58  ;;  %v7066_v59 = vadd.f32 %v7065_v35, %v7064_v46  ;;  %v5754_v46 = vadd.f32 %v7063_v10, %v5657_v7 }
 0x3de   : > { %v7067_v60 = vpop.f32.mrf.mxu1  ;;  %v7156_v9 = vpop.f32.mrf.mxu0 }
 0x3df   : > { %5885 = vst.msk [vmem:[%s10803_s9 + $0x38] sm:$0xff] %vm1328_vm2, %v5869_v56  ;;  %v5867_v16 = vmax.f32 %v5819_v42, 0.0  ;;  %v5840_v27 = vadd.f32 %v7156_v9, %v5743_v0  ;;  %v5759_v36 = vadd.f32 %v7066_v59, %v5662_v41 }
 0x3e0   : > { %v5831_v34 = vpop.f32.mrf.mxu0  ;;  %v7068_v54 = vpop.f32.mrf.mxu1 }
 0x3e1   : > { %5883 = vst.msk [vmem:[%s10803_s9 + $0x28] sm:$0xff] %vm1328_vm2, %v5867_v16  ;;  %v5872_v48 = vmax.f32 %v5840_v27, 0.0  ;;  %v5832_v63 = vadd.f32 %v5831_v34, %v5735_v20  ;;  %v7069_v44 = vadd.f32 %v7068_v54, %v7067_v60 }
 0x3e2   : > { %v7157_v17 = vpop.f32.mrf.mxu0 }
 0x3e3   : > { %5888 = vst.msk [vmem:[%s10803_s9 + $0x50] sm:$0xff] %vm1328_vm2, %v5872_v48  ;;  %v5870_v3 = vmax.f32 %v5832_v63, 0.0  ;;  %v5843_v25 = vadd.f32 %v7157_v17, %v5746_v61  ;;  %v5762_v6 = vadd.f32 %v7069_v44, %v5665_v39 }
 0x3e4   : > { %v5834_v40 = vpop.f32.mrf.mxu0 }
 0x3e5   : > { %5886 = vst.msk [vmem:[%s10803_s9 + $0x40] sm:$0xff] %vm1328_vm2, %v5870_v3  ;;  %v5873_v37 = vmax.f32 %v5843_v25, 0.0  ;;  %v5835_v19 = vadd.f32 %v5834_v40, %v5738_v32 }
 0x3e6   : > { %v7160_v1 = vpop.f32.mrf.mxu0 }
 0x3e7   : > { %5889 = vst.msk [vmem:[%s10803_s9 + $0x58] sm:$0xff] %vm1328_vm2, %v5873_v37  ;;  %v5871_v47 = vmax.f32 %v5835_v19, 0.0  ;;  %v5856_v49 = vadd.f32 %v7160_v1, %v5759_v36 }
 0x3e8   : > { %v5847_v29 = vpop.f32.mrf.mxu0 }
 0x3e9   : > { %5887 = vst.msk [vmem:[%s10803_s9 + $0x48] sm:$0xff] %vm1328_vm2, %v5871_v47  ;;  %v5876_v14 = vmax.f32 %v5856_v49, 0.0  ;;  %v5848_v21 = vadd.f32 %v5847_v29, %v5751_v5 }
 0x3ea   : > { %v7161_v8 = vpop.f32.mrf.mxu0 }
 0x3eb   : > { %5892 = vst.msk [vmem:[%s10803_s9 + $0x70] sm:$0xff] %vm1328_vm2, %v5876_v14  ;;  %v5874_v50 = vmax.f32 %v5848_v21, 0.0  ;;  %v5859_v12 = vadd.f32 %v7161_v8, %v5762_v6 }
 0x3ec   : > { %v5850_v57 = vpop.f32.mrf.mxu0 }
 0x3ed   : > { %5890 = vst.msk [vmem:[%s10803_s9 + $0x60] sm:$0xff] %vm1328_vm2, %v5874_v50  ;;  %v5877_v23 = vmax.f32 %v5859_v12, 0.0  ;;  %v5851_v43 = vadd.f32 %v5850_v57, %v5754_v46 }
 0x3ef   : > { %5893 = vst.msk [vmem:[%s10803_s9 + $0x78] sm:$0xff] %vm1328_vm2, %v5877_v23  ;;  %v5875_v24 = vmax.f32 %v5851_v43, 0.0 }
 0x3f1   : > { %5891 = vst.msk [vmem:[%s10803_s9 + $0x68] sm:$0xff] %vm1328_vm2, %v5875_v24 }
 0x3f2   : > { %7705 = shalt.err (!%p7702_p9)
}
 0x3f3   : > { %s7706_s14 = scalar_lea.hbm %s10884_s20, 2048  ;;  %s7710_s17 = scalar_lea.hbm %s10952_s7, 8192 }
 0x3f4   : > { %p7707_p10 = scmp.ne.s32.totalorder %s10884_s20, %s7706_s14  ;;  %p7711_p13 = scmp.lt.s32.totalorder %s10884_s20, %s10952_s7 }
 0x3f5   : > { %p7712_p0 = scmp.lt.s32.totalorder %s7710_s17, %s7706_s14 }
 0x3f6   : > { %p7708_p11 = pnand %p7707_p10, %p7884_p5 }
 0x3f7   : > { %p7713_p1 = por %p7712_p0, %p7711_p13 }
 0x3f8   : > { %p7709_p12 = pneg %p7708_p11 }
 0x3fa   : > { %p7714_p2 = pnand %p7713_p1, %p7709_p12 }
 0x3fc   : > { %7717 = shalt.err (!%p7714_p2)
}
 0x3fd   : > { %s7789_s28 = smov 128   ;;  %s7790_s19 = smov 8  }
 0x3fe   : > { %7179 = dma.vmem_to_hbm [thread:$0]  (%p7884_p5), %s10886_s13, 2048, %s10884_s20, %s10894_s12, %s7789_s28, %s7789_s28, %s7790_s19  }
 0x3ff PF: > { %p7185_p3 = scmp.ge.s32.totalorder %s7784_s8, 2  ;;  %s5925_s22 = sand.u32 1, %s7756_s24  }
 0x400   : > { %s5926_s23 = scalar_lea.sflag [#allocation4], %s5925_s22 }
 0x401   : > { %p7182_p4 = pnand %p7185_p3, %p7890_p7 }
 0x403   : > { %p7183_p6 = pneg %p7182_p4 }
 0x405   : > { %7751 = dma.done.wait (%p7183_p6), %s5926_s23, 2048  }
 0x406   : > { %7753 = vsyncadd (%p7183_p6), %s5926_s23, 4294965248  ;;  %s20_s8 = sadd.s32 1, %s7784_s8   ;;  %s11258_s15 = sld [smem:[#allocation6_spill]] }
 0x407   : > { %p17_p8 = scmp.ge.s32.totalorder %s20_s8, 6   ;;  %s11259_s24 = smov %s7760_s25 }
 0x408   : > { %s11260_s25 = smov %s7764_s26  ;;  %s11261_s26 = smov %s7900_s21 }
 0x409   : > { %s11262_s27 = smov %s7776_s29  ;;  %s11263_s28 = smov %s7780_s30 }
 0x40a   : > { %s11264_s29 = smov %s11267_s10  ;;  %19 = sbr.rel (!%p17_p8) target bundleno = 5 (0x5), region = 92 }
 0x40c   : > { %s11265_s30 = smov %s11258_s15 }
 0x40f   :  { %5931 = vsyncpa [#allocation4], 1 }
 0x410   :  { %5933 = vsyncpa [#allocation4 + $0x1], 1 }

</bundles_post_ra>
